<compile_context>
chip_gen: v5e
topology: v5e:2x2
jax: 0.10.0
libtpu: 0.0.40
codegen_flags: <defaults>
</compile_context>

<pallas_src>
import functools

import jax
import jax.numpy as jnp
from jax.experimental import pallas as pl
from jax.experimental.pallas import tpu as pltpu

FEAT = 1536      # feature width implied by Linear(in_features=1536, ...)
HID = 128        # classifier hidden width
OUT = 4          # linear1 output width
OUT_PAD = 128    # lane-dense output width
BN_EPS = 1e-5
TK = 512         # K tile for the first (dominant) matmul; multiple of 128


def _fused_forward_kernel(
    x_ref,        # (Bp, TK)        bf16  flattened-image K tile
    wbm1_ref,     # (TK, FEAT)      bf16  base_model stub #1 weight K tile
    bbm1_ref,     # (1, FEAT)       f32
    wc1_ref,      # (FEAT, HID)     bf16  classifier Linear(1536,128)
    bc1_ref,      # (1, HID)        f32
    gamma_ref,    # (1, HID)        f32   BatchNorm1d weight
    beta_ref,     # (1, HID)        f32   BatchNorm1d bias
    wc2t_ref,     # (1, HID)        f32   classifier Linear(128,1) weight (transposed)
    bc2_ref,      # (1, 1)          f32   in SMEM
    wbm2_ref,     # (1, FEAT)       f32   base_model stub #2 weight
    bbm2_ref,     # (1, FEAT)       f32
    wl1_ref,      # (FEAT, OUT_PAD) bf16  linear1 weight (lane-padded)
    bl1_ref,      # (1, OUT_PAD)    f32
    o_ref,        # (Bp, OUT_PAD)   f32
    acc_ref,      # (Bp, FEAT)      f32   scratch accumulator
    *,
    batch: int,
):
    k = pl.program_id(0)

    @pl.when(k == 0)
    def _():
        acc_ref[...] = jnp.zeros_like(acc_ref)

    # --- base_model stub #1: K-tiled Linear(D, 1536), bf16 in / f32 acc ---
    acc_ref[...] += jnp.dot(x_ref[...], wbm1_ref[...],
                            preferred_element_type=jnp.float32)

    @pl.when(k == pl.num_programs(0) - 1)
    def _():
        bp = acc_ref.shape[0]

        # base_model stub ReLU
        h = jnp.maximum(acc_ref[...] + bbm1_ref[...], 0.0)

        # classifier: Linear(1536, 128)
        h = jnp.dot(h.astype(jnp.bfloat16), wc1_ref[...],
                    preferred_element_type=jnp.float32) + bc1_ref[...]

        # ELU(alpha=1.0)
        h = jnp.where(h > 0.0, h, jnp.exp(h) - 1.0)

        # BatchNorm1d(128): train-mode batch stats (biased variance, eps=1e-5),
        # computed only over the real batch rows (padding masked out).
        row_mask = (jax.lax.broadcasted_iota(jnp.int32, (bp, 1), 0)
                    < batch).astype(jnp.float32)
        inv_b = 1.0 / float(batch)
        mean = jnp.sum(h * row_mask, axis=0, keepdims=True) * inv_b
        cen = h - mean
        var = jnp.sum((cen * row_mask) ** 2, axis=0, keepdims=True) * inv_b
        h = cen * jax.lax.rsqrt(var + BN_EPS) * gamma_ref[...] + beta_ref[...]

        # classifier: Linear(128, 1) on the VPU (N=1 matmul would waste the MXU)
        s = jnp.sum(h * wc2t_ref[...], axis=-1, keepdims=True) + bc2_ref[0, 0]

        # Sigmoid (numerically stable), reciprocal on the EUP
        e = jnp.exp(-jnp.abs(s))
        inv = pl.reciprocal(1.0 + e, approx=True)
        sig = jnp.where(s >= 0.0, inv, e * inv)

        # base_model stub #2 on (B, 1): K=1 matmul -> broadcast multiply (VPU)
        h2 = jnp.maximum(sig * wbm2_ref[...] + bbm2_ref[...], 0.0)

        # linear1: Linear(1536, 4) (lane-padded to 128) + ReLU
        out = jnp.dot(h2.astype(jnp.bfloat16), wl1_ref[...],
                      preferred_element_type=jnp.float32) + bl1_ref[...]
        o_ref[...] = jnp.maximum(out, 0.0)


def init_params(key, d_in):
    ks = jax.random.split(key, 8)
    s = 0.02
    return {
        "w_bm1":  jax.random.normal(ks[0], (d_in, FEAT), jnp.float32) * s,
        "b_bm1":  jnp.zeros((1, FEAT), jnp.float32),
        "w_c1":   jax.random.normal(ks[1], (FEAT, HID), jnp.float32) * s,
        "b_c1":   jax.random.normal(ks[2], (1, HID), jnp.float32) * s,
        "gamma":  jnp.ones((1, HID), jnp.float32),
        "beta":   jnp.zeros((1, HID), jnp.float32),
        "w_c2_t": jax.random.normal(ks[3], (1, HID), jnp.float32) * s,   # Linear(128,1) weight, transposed layout
        "b_c2":   jax.random.normal(ks[4], (1, 1), jnp.float32) * s,
        "w_bm2":  jax.random.normal(ks[5], (1, FEAT), jnp.float32) * s,
        "b_bm2":  jnp.zeros((1, FEAT), jnp.float32),
        "w_l1":   jax.random.normal(ks[6], (FEAT, OUT), jnp.float32) * s,
        "b_l1":   jax.random.normal(ks[7], (1, OUT), jnp.float32) * s,
    }


def model_forward(x_nchw, params):
    B = x_nchw.shape[0]
    x2d = x_nchw.reshape(B, -1)
    D = x2d.shape[1]

    # Pad batch to the f32 sublane multiple, pad D to a multiple of the K tile.
    b_pad = max(8, -(-B // 8) * 8)
    d_pad = -(-D // TK) * TK
    n_k = d_pad // TK

    x_p = jnp.zeros((b_pad, d_pad), jnp.bfloat16)
    x_p = x_p.at[:B, :D].set(x2d.astype(jnp.bfloat16))

    wbm1_p = jnp.zeros((d_pad, FEAT), jnp.bfloat16)
    wbm1_p = wbm1_p.at[:D, :].set(params["w_bm1"].astype(jnp.bfloat16))

    # Lane-dense output: pad linear1 weight/bias to 128 output lanes with zeros.
    wl1_p = jnp.zeros((FEAT, OUT_PAD), jnp.bfloat16)
    wl1_p = wl1_p.at[:, :OUT].set(params["w_l1"].astype(jnp.bfloat16))
    bl1_p = jnp.zeros((1, OUT_PAD), jnp.float32)
    bl1_p = bl1_p.at[:, :OUT].set(params["b_l1"])

    kernel = functools.partial(_fused_forward_kernel, batch=B)

    def full(shape):
        return pl.BlockSpec(shape, lambda k: (0, 0))

    grid_spec = pltpu.PrefetchScalarGridSpec(
        num_scalar_prefetch=0,
        grid=(n_k,),
        in_specs=[
            pl.BlockSpec((b_pad, TK), lambda k: (0, k)),     # x (K-tiled)
            pl.BlockSpec((TK, FEAT), lambda k: (k, 0)),      # w_bm1 (K-tiled)
            full((1, FEAT)),                                 # b_bm1
            full((FEAT, HID)),                               # w_c1
            full((1, HID)),                                  # b_c1
            full((1, HID)),                                  # gamma
            full((1, HID)),                                  # beta
            full((1, HID)),                                  # w_c2_t
            pl.BlockSpec(memory_space=pltpu.MemorySpace.SMEM),  # b_c2 scalar
            full((1, FEAT)),                                 # w_bm2
            full((1, FEAT)),                                 # b_bm2
            full((FEAT, OUT_PAD)),                           # w_l1 (padded)
            full((1, OUT_PAD)),                              # b_l1 (padded)
        ],
        out_specs=pl.BlockSpec((b_pad, OUT_PAD), lambda k: (0, 0)),
        scratch_shapes=[pltpu.VMEM((b_pad, FEAT), jnp.float32)],
    )

    out_p = pl.pallas_call(
        kernel,
        out_shape=jax.ShapeDtypeStruct((b_pad, OUT_PAD), jnp.float32),
        grid_spec=grid_spec,
        compiler_params=pltpu.CompilerParams(
            dimension_semantics=("arbitrary",),   # K reduction axis
            vmem_limit_bytes=32 << 20,
        ),
    )(
        x_p, wbm1_p, params["b_bm1"],
        params["w_c1"].astype(jnp.bfloat16), params["b_c1"],
        params["gamma"], params["beta"],
        params["w_c2_t"], params["b_c2"],
        params["w_bm2"], params["b_bm2"],
        wl1_p, bl1_p,
    )
    return out_p[:B, :OUT]


if __name__ == "__main__":
    key = jax.random.PRNGKey(0)
    k_x, k_p = jax.random.split(key)

    B, C, H, W = 2, 4, 16, 16            # NCHW, small synthetic shapes
    x = jax.random.normal(k_x, (B, C, H, W), jnp.float32)
    params = init_params(k_p, C * H * W)

    out = jax.jit(model_forward)(x, params)
    out = jax.block_until_ready(out)
    assert out.shape == (B, OUT) and out.dtype == jnp.float32
    assert bool(jnp.all(jnp.isfinite(out))) and bool(jnp.all(out >= 0.0))
    print("KERNEL_OK")
</pallas_src>

<mosaic_0001>
module attributes {stable_mosaic.version = 11 : i64} {
  func.func @_fused_forward_kernel(%arg0: i32, %arg1: memref<8x512xbf16, #tpu.memory_space<vmem>>, %arg2: memref<512x1536xbf16, #tpu.memory_space<vmem>>, %arg3: memref<1x1536xf32, #tpu.memory_space<vmem>>, %arg4: memref<1536x128xbf16, #tpu.memory_space<vmem>>, %arg5: memref<1x128xf32, #tpu.memory_space<vmem>>, %arg6: memref<1x128xf32, #tpu.memory_space<vmem>>, %arg7: memref<1x128xf32, #tpu.memory_space<vmem>>, %arg8: memref<1x128xf32, #tpu.memory_space<vmem>>, %arg9: memref<1x1xf32, #tpu.memory_space<smem>>, %arg10: memref<1x1536xf32, #tpu.memory_space<vmem>>, %arg11: memref<1x1536xf32, #tpu.memory_space<vmem>>, %arg12: memref<1536x128xbf16, #tpu.memory_space<vmem>>, %arg13: memref<1x128xf32, #tpu.memory_space<vmem>>, %arg14: memref<8x128xf32, #tpu.memory_space<vmem>>, %arg15: memref<8x1536xf32, #tpu.memory_space<vmem>>) attributes {dimension_semantics = [#tpu.dimension_semantics<arbitrary>], iteration_bounds = array<i64: 2>, scalar_prefetch = 0 : i64, scratch_operands = 1 : i64, tpu.core_type = #tpu.core_type<tc>, window_params = [{transform_indices = @transform_0, window_bounds = array<i64: 8, 512>}, {transform_indices = @transform_1, window_bounds = array<i64: 512, 1536>}, {pipeline_mode = #tpu.pipeline_mode<synchronous>, transform_indices = @transform_2, window_bounds = array<i64: 1, 1536>}, {pipeline_mode = #tpu.pipeline_mode<synchronous>, transform_indices = @transform_3, window_bounds = array<i64: 1536, 128>}, {pipeline_mode = #tpu.pipeline_mode<synchronous>, transform_indices = @transform_4, window_bounds = array<i64: 1, 128>}, {pipeline_mode = #tpu.pipeline_mode<synchronous>, transform_indices = @transform_5, window_bounds = array<i64: 1, 128>}, {pipeline_mode = #tpu.pipeline_mode<synchronous>, transform_indices = @transform_6, window_bounds = array<i64: 1, 128>}, {pipeline_mode = #tpu.pipeline_mode<synchronous>, transform_indices = @transform_7, window_bounds = array<i64: 1, 128>}, {transform_indices = @transform_8, window_bounds = array<i64: 1, 1>}, {pipeline_mode = #tpu.pipeline_mode<synchronous>, transform_indices = @transform_9, window_bounds = array<i64: 1, 1536>}, {pipeline_mode = #tpu.pipeline_mode<synchronous>, transform_indices = @transform_10, window_bounds = array<i64: 1, 1536>}, {pipeline_mode = #tpu.pipeline_mode<synchronous>, transform_indices = @transform_11, window_bounds = array<i64: 1536, 128>}, {pipeline_mode = #tpu.pipeline_mode<synchronous>, transform_indices = @transform_12, window_bounds = array<i64: 1, 128>}, {pipeline_mode = #tpu.pipeline_mode<synchronous>, transform_indices = @transform_13, window_bounds = array<i64: 8, 128>}]} {
    %c0_i32 = arith.constant 0 : i32
    %0 = arith.cmpi eq, %arg0, %c0_i32 : i32
    %1 = arith.extui %0 : i1 to i32
    %c0_i32_0 = arith.constant 0 : i32
    %2 = arith.cmpi ne, %1, %c0_i32_0 : i32
    scf.if %2 {
      %cst_9 = arith.constant 0.000000e+00 : f32
      %12 = vector.broadcast %cst_9 : f32 to vector<8x1536xf32>
      %c0_10 = arith.constant 0 : index
      %c0_11 = arith.constant 0 : index
      %13 = vector.load %arg15[%c0_10, %c0_11] : memref<8x1536xf32, #tpu.memory_space<vmem>>, vector<8x1536xf32>
      tpu.vector_store %arg15[%c0_10, %c0_11], %12 {strides = array<i32>} : memref<8x1536xf32, #tpu.memory_space<vmem>>, vector<8x1536xf32>,
    } else {
    }
    %c0 = arith.constant 0 : index
    %c0_1 = arith.constant 0 : index
    %3 = vector.load %arg15[%c0, %c0_1] : memref<8x1536xf32, #tpu.memory_space<vmem>>, vector<8x1536xf32>
    %c0_2 = arith.constant 0 : index
    %c0_3 = arith.constant 0 : index
    %4 = vector.load %arg1[%c0_2, %c0_3] : memref<8x512xbf16, #tpu.memory_space<vmem>>, vector<8x512xbf16>
    %c0_4 = arith.constant 0 : index
    %c0_5 = arith.constant 0 : index
    %5 = vector.load %arg2[%c0_4, %c0_5] : memref<512x1536xbf16, #tpu.memory_space<vmem>>, vector<512x1536xbf16>
    %cst = arith.constant dense<0.000000e+00> : vector<8x1536xf32>
    %6 = tpu.matmul %4, %5, %cst {dimension_numbers = #tpu.dot_dimension_numbers<[1], [0], [0], [1], [0, 0, 1, 1], [], []>} : vector<8x512xbf16>, vector<512x1536xbf16>, vector<8x1536xf32> -> vector<8x1536xf32>
    %7 = arith.addf %3, %6 : vector<8x1536xf32>
    %c0_6 = arith.constant 0 : index
    %c0_7 = arith.constant 0 : index
    %8 = vector.load %arg15[%c0_6, %c0_7] : memref<8x1536xf32, #tpu.memory_space<vmem>>, vector<8x1536xf32>
    tpu.vector_store %arg15[%c0_6, %c0_7], %7 {strides = array<i32>} : memref<8x1536xf32, #tpu.memory_space<vmem>>, vector<8x1536xf32>,
    %c1_i32 = arith.constant 1 : i32
    %9 = arith.cmpi eq, %arg0, %c1_i32 : i32
    %10 = arith.extui %9 : i1 to i32
    %c0_i32_8 = arith.constant 0 : i32
    %11 = arith.cmpi ne, %10, %c0_i32_8 : i32
    scf.if %11 {
      %c0_9 = arith.constant 0 : index
      %c0_10 = arith.constant 0 : index
      %12 = vector.load %arg15[%c0_9, %c0_10] : memref<8x1536xf32, #tpu.memory_space<vmem>>, vector<8x1536xf32>
      %c0_11 = arith.constant 0 : index
      %c0_12 = arith.constant 0 : index
      %13 = vector.load %arg3[%c0_11, %c0_12] : memref<1x1536xf32, #tpu.memory_space<vmem>>, vector<1x1536xf32>
      %14 = vector.broadcast %13 : vector<1x1536xf32> to vector<8x1536xf32>
      %15 = arith.addf %12, %14 : vector<8x1536xf32>
      %cst_13 = arith.constant 0.000000e+00 : f32
      %16 = vector.broadcast %cst_13 : f32 to vector<8x1536xf32>
      %17 = arith.maximumf %15, %16 : vector<8x1536xf32>
      %18 = arith.truncf %17 : vector<8x1536xf32> to vector<8x1536xbf16>
      %c0_14 = arith.constant 0 : index
      %c0_15 = arith.constant 0 : index
      %19 = vector.load %arg4[%c0_14, %c0_15] : memref<1536x128xbf16, #tpu.memory_space<vmem>>, vector<1536x128xbf16>
      %cst_16 = arith.constant dense<0.000000e+00> : vector<8x128xf32>
      %20 = tpu.matmul %18, %19, %cst_16 {dimension_numbers = #tpu.dot_dimension_numbers<[1], [0], [0], [1], [0, 0, 1, 1], [], []>} : vector<8x1536xbf16>, vector<1536x128xbf16>, vector<8x128xf32> -> vector<8x128xf32>
      %c0_17 = arith.constant 0 : index
      %c0_18 = arith.constant 0 : index
      %21 = vector.load %arg5[%c0_17, %c0_18] : memref<1x128xf32, #tpu.memory_space<vmem>>, vector<1x128xf32>
      %22 = vector.broadcast %21 : vector<1x128xf32> to vector<8x128xf32>
      %23 = arith.addf %20, %22 : vector<8x128xf32>
      %cst_19 = arith.constant 0.000000e+00 : f32
      %24 = vector.broadcast %cst_19 : f32 to vector<8x128xf32>
      %25 = arith.cmpf ogt, %23, %24 : vector<8x128xf32>
      %26 = math.exp %23 : vector<8x128xf32>
      %cst_20 = arith.constant 1.000000e+00 : f32
      %27 = vector.broadcast %cst_20 : f32 to vector<8x128xf32>
      %28 = arith.subf %26, %27 : vector<8x128xf32>
      %29 = arith.select %25, %23, %28 : vector<8x128xi1>, vector<8x128xf32>
      %30 = tpu.iota {dimensions = array<i32: 0>} : vector<8x1xi32>
      %c2_i32 = arith.constant 2 : i32
      %31 = vector.broadcast %c2_i32 : i32 to vector<8x1xi32>
      %32 = arith.cmpi slt, %30, %31 : vector<8x1xi32>
      %33 = arith.extui %32 : vector<8x1xi1> to vector<8x1xi32>
      %34 = arith.sitofp %33 : vector<8x1xi32> to vector<8x1xf32>
      %35 = vector.broadcast %34 : vector<8x1xf32> to vector<8x128xf32>
      %36 = arith.mulf %29, %35 : vector<8x128xf32>
      %cst_21 = arith.constant dense<0.000000e+00> : vector<128xf32>
      %37 = vector.multi_reduction <add>, %36, %cst_21 [0] : vector<8x128xf32> to vector<128xf32>
      %38 = vector.shape_cast %37 : vector<128xf32> to vector<1x128xf32>
      %cst_22 = arith.constant 5.000000e-01 : f32
      %39 = vector.broadcast %cst_22 : f32 to vector<1x128xf32>
      %40 = arith.mulf %38, %39 : vector<1x128xf32>
      %41 = vector.broadcast %40 : vector<1x128xf32> to vector<8x128xf32>
      %42 = arith.subf %29, %41 : vector<8x128xf32>
      %43 = vector.broadcast %34 : vector<8x1xf32> to vector<8x128xf32>
      %44 = arith.mulf %42, %43 : vector<8x128xf32>
      %45 = arith.mulf %44, %44 : vector<8x128xf32>
      %cst_23 = arith.constant dense<0.000000e+00> : vector<128xf32>
      %46 = vector.multi_reduction <add>, %45, %cst_23 [0] : vector<8x128xf32> to vector<128xf32>
      %47 = vector.shape_cast %46 : vector<128xf32> to vector<1x128xf32>
      %cst_24 = arith.constant 5.000000e-01 : f32
      %48 = vector.broadcast %cst_24 : f32 to vector<1x128xf32>
      %49 = arith.mulf %47, %48 : vector<1x128xf32>
      %cst_25 = arith.constant 9.99999974E-6 : f32
      %50 = vector.broadcast %cst_25 : f32 to vector<1x128xf32>
      %51 = arith.addf %49, %50 : vector<1x128xf32>
      %52 = math.rsqrt %51 : vector<1x128xf32>
      %53 = vector.broadcast %52 : vector<1x128xf32> to vector<8x128xf32>
      %54 = arith.mulf %42, %53 : vector<8x128xf32>
      %c0_26 = arith.constant 0 : index
      %c0_27 = arith.constant 0 : index
      %55 = vector.load %arg6[%c0_26, %c0_27] : memref<1x128xf32, #tpu.memory_space<vmem>>, vector<1x128xf32>
      %56 = vector.broadcast %55 : vector<1x128xf32> to vector<8x128xf32>
      %57 = arith.mulf %54, %56 : vector<8x128xf32>
      %c0_28 = arith.constant 0 : index
      %c0_29 = arith.constant 0 : index
      %58 = vector.load %arg7[%c0_28, %c0_29] : memref<1x128xf32, #tpu.memory_space<vmem>>, vector<1x128xf32>
      %59 = vector.broadcast %58 : vector<1x128xf32> to vector<8x128xf32>
      %60 = arith.addf %57, %59 : vector<8x128xf32>
      %c0_30 = arith.constant 0 : index
      %c0_31 = arith.constant 0 : index
      %61 = vector.load %arg8[%c0_30, %c0_31] : memref<1x128xf32, #tpu.memory_space<vmem>>, vector<1x128xf32>
      %62 = vector.broadcast %61 : vector<1x128xf32> to vector<8x128xf32>
      %63 = arith.mulf %60, %62 : vector<8x128xf32>
      %cst_32 = arith.constant dense<0.000000e+00> : vector<8xf32>
      %64 = vector.multi_reduction <add>, %63, %cst_32 [1] : vector<8x128xf32> to vector<8xf32>
      %65 = vector.shape_cast %64 : vector<8xf32> to vector<8x1xf32>
      %c0_33 = arith.constant 0 : index
      %c0_34 = arith.constant 0 : index
      %66 = memref.load %arg9[%c0_33, %c0_34] : memref<1x1xf32, #tpu.memory_space<smem>>
      %67 = vector.broadcast %66 : f32 to vector<8x1xf32>
      %68 = arith.addf %65, %67 : vector<8x1xf32>
      %69 = math.absf %68 : vector<8x1xf32>
      %cst_35 = arith.constant 0.000000e+00 : f32
      %70 = vector.broadcast %cst_35 : f32 to vector<8x1xf32>
      %71 = arith.subf %70, %69 : vector<8x1xf32>
      %72 = math.exp %71 : vector<8x1xf32>
      %cst_36 = arith.constant 1.000000e+00 : f32
      %73 = vector.broadcast %cst_36 : f32 to vector<8x1xf32>
      %74 = arith.addf %73, %72 : vector<8x1xf32>
      %75 = tpu.reciprocal %74 {approx = true} : vector<8x1xf32> -> vector<8x1xf32>
      %cst_37 = arith.constant 0.000000e+00 : f32
      %76 = vector.broadcast %cst_37 : f32 to vector<8x1xf32>
      %77 = arith.cmpf oge, %68, %76 : vector<8x1xf32>
      %78 = arith.mulf %72, %75 : vector<8x1xf32>
      %79 = arith.select %77, %75, %78 : vector<8x1xi1>, vector<8x1xf32>
      %c0_38 = arith.constant 0 : index
      %c0_39 = arith.constant 0 : index
      %80 = vector.load %arg10[%c0_38, %c0_39] : memref<1x1536xf32, #tpu.memory_space<vmem>>, vector<1x1536xf32>
      %81 = vector.broadcast %79 : vector<8x1xf32> to vector<8x1536xf32>
      %82 = vector.broadcast %80 : vector<1x1536xf32> to vector<8x1536xf32>
      %83 = arith.mulf %81, %82 : vector<8x1536xf32>
      %c0_40 = arith.constant 0 : index
      %c0_41 = arith.constant 0 : index
      %84 = vector.load %arg11[%c0_40, %c0_41] : memref<1x1536xf32, #tpu.memory_space<vmem>>, vector<1x1536xf32>
      %85 = vector.broadcast %84 : vector<1x1536xf32> to vector<8x1536xf32>
      %86 = arith.addf %83, %85 : vector<8x1536xf32>
      %cst_42 = arith.constant 0.000000e+00 : f32
      %87 = vector.broadcast %cst_42 : f32 to vector<8x1536xf32>
      %88 = arith.maximumf %86, %87 : vector<8x1536xf32>
      %89 = arith.truncf %88 : vector<8x1536xf32> to vector<8x1536xbf16>
      %c0_43 = arith.constant 0 : index
      %c0_44 = arith.constant 0 : index
      %90 = vector.load %arg12[%c0_43, %c0_44] : memref<1536x128xbf16, #tpu.memory_space<vmem>>, vector<1536x128xbf16>
      %cst_45 = arith.constant dense<0.000000e+00> : vector<8x128xf32>
      %91 = tpu.matmul %89, %90, %cst_45 {dimension_numbers = #tpu.dot_dimension_numbers<[1], [0], [0], [1], [0, 0, 1, 1], [], []>} : vector<8x1536xbf16>, vector<1536x128xbf16>, vector<8x128xf32> -> vector<8x128xf32>
      %c0_46 = arith.constant 0 : index
      %c0_47 = arith.constant 0 : index
      %92 = vector.load %arg13[%c0_46, %c0_47] : memref<1x128xf32, #tpu.memory_space<vmem>>, vector<1x128xf32>
      %93 = vector.broadcast %92 : vector<1x128xf32> to vector<8x128xf32>
      %94 = arith.addf %91, %93 : vector<8x128xf32>
      %cst_48 = arith.constant 0.000000e+00 : f32
      %95 = vector.broadcast %cst_48 : f32 to vector<8x128xf32>
      %96 = arith.maximumf %94, %95 : vector<8x128xf32>
      %c0_49 = arith.constant 0 : index
      %c0_50 = arith.constant 0 : index
      %97 = vector.load %arg14[%c0_49, %c0_50] : memref<8x128xf32, #tpu.memory_space<vmem>>, vector<8x128xf32>
      tpu.vector_store %arg14[%c0_49, %c0_50], %96 {strides = array<i32>} : memref<8x128xf32, #tpu.memory_space<vmem>>, vector<8x128xf32>,
    } else {
    }
    return
  }
  func.func @transform_0(%arg0: i32) -> (i32, i32) {
    %c0_i32 = arith.constant 0 : i32
    %c0_i32_0 = arith.constant 0 : i32
    return %c0_i32, %arg0 : i32, i32
  }
  func.func @transform_1(%arg0: i32) -> (i32, i32) {
    %c0_i32 = arith.constant 0 : i32
    %c0_i32_0 = arith.constant 0 : i32
    return %arg0, %c0_i32 : i32, i32
  }
  func.func @transform_2(%arg0: i32) -> (i32, i32) {
    %c0_i32 = arith.constant 0 : i32
    %c0_i32_0 = arith.constant 0 : i32
    %c0_i32_1 = arith.constant 0 : i32
    return %c0_i32, %c0_i32_0 : i32, i32
  }
  func.func @transform_3(%arg0: i32) -> (i32, i32) {
    %c0_i32 = arith.constant 0 : i32
    %c0_i32_0 = arith.constant 0 : i32
    %c0_i32_1 = arith.constant 0 : i32
    return %c0_i32, %c0_i32_0 : i32, i32
  }
  func.func @transform_4(%arg0: i32) -> (i32, i32) {
    %c0_i32 = arith.constant 0 : i32
    %c0_i32_0 = arith.constant 0 : i32
    %c0_i32_1 = arith.constant 0 : i32
    return %c0_i32, %c0_i32_0 : i32, i32
  }
  func.func @transform_5(%arg0: i32) -> (i32, i32) {
    %c0_i32 = arith.constant 0 : i32
    %c0_i32_0 = arith.constant 0 : i32
    %c0_i32_1 = arith.constant 0 : i32
    return %c0_i32, %c0_i32_0 : i32, i32
  }
  func.func @transform_6(%arg0: i32) -> (i32, i32) {
    %c0_i32 = arith.constant 0 : i32
    %c0_i32_0 = arith.constant 0 : i32
    %c0_i32_1 = arith.constant 0 : i32
    return %c0_i32, %c0_i32_0 : i32, i32
  }
  func.func @transform_7(%arg0: i32) -> (i32, i32) {
    %c0_i32 = arith.constant 0 : i32
    %c0_i32_0 = arith.constant 0 : i32
    %c0_i32_1 = arith.constant 0 : i32
    return %c0_i32, %c0_i32_0 : i32, i32
  }
  func.func @transform_8(%arg0: i32) -> (i32, i32) {
    %c0_i32 = arith.constant 0 : i32
    %c0_i32_0 = arith.constant 0 : i32
    %c0_i32_1 = arith.constant 0 : i32
    return %c0_i32, %c0_i32_0 : i32, i32
  }
  func.func @transform_9(%arg0: i32) -> (i32, i32) {
    %c0_i32 = arith.constant 0 : i32
    %c0_i32_0 = arith.constant 0 : i32
    %c0_i32_1 = arith.constant 0 : i32
    return %c0_i32, %c0_i32_0 : i32, i32
  }
  func.func @transform_10(%arg0: i32) -> (i32, i32) {
    %c0_i32 = arith.constant 0 : i32
    %c0_i32_0 = arith.constant 0 : i32
    %c0_i32_1 = arith.constant 0 : i32
    return %c0_i32, %c0_i32_0 : i32, i32
  }
  func.func @transform_11(%arg0: i32) -> (i32, i32) {
    %c0_i32 = arith.constant 0 : i32
    %c0_i32_0 = arith.constant 0 : i32
    %c0_i32_1 = arith.constant 0 : i32
    return %c0_i32, %c0_i32_0 : i32, i32
  }
  func.func @transform_12(%arg0: i32) -> (i32, i32) {
    %c0_i32 = arith.constant 0 : i32
    %c0_i32_0 = arith.constant 0 : i32
    %c0_i32_1 = arith.constant 0 : i32
    return %c0_i32, %c0_i32_0 : i32, i32
  }
  func.func @transform_13(%arg0: i32) -> (i32, i32) {
    %c0_i32 = arith.constant 0 : i32
    %c0_i32_0 = arith.constant 0 : i32
    %c0_i32_1 = arith.constant 0 : i32
    return %c0_i32, %c0_i32_0 : i32, i32
  }
}

</mosaic_0001>

<bundles_post_ra>
// kernel: model_forward.1
= control target key start
LH: loop header
LB: loop body
LE: loop exit
PB: predicated region body
PF: predicated region fallthrough
CT: control target
= control target key end

     0   :  { %s8602_s27 = smov 0   ;;  %s10105_s0 = inlined_call_operand.vmem [shape: bf16[8,1024], index: 0, kind: input, shape index: {}]   ;;  %s10106_s1 = inlined_call_operand.vmem [shape: bf16[1024,1536], index: 1, kind: input, shape index: {}]   ;;  %s10107_s2 = inlined_call_operand.vmem [shape: f32[1,1536], index: 2, kind: input, shape index: {}]   ;;  %s10108_s3 = inlined_call_operand.vmem [shape: bf16[1536,128], index: 3, kind: input, shape index: {}]   ;;  %s10109_s4 = inlined_call_operand.vmem [shape: f32[1,128], index: 4, kind: input, shape index: {}]   ;;  %s10110_s5 = inlined_call_operand.vmem [shape: f32[1,128], index: 5, kind: input, shape index: {}]   ;;  %s10111_s6 = inlined_call_operand.vmem [shape: f32[1,128], index: 6, kind: input, shape index: {}]   ;;  %s10112_s7 = inlined_call_operand.vmem [shape: f32[1,128], index: 7, kind: input, shape index: {}]   ;;  %s10113_s8 = inlined_call_operand.<no memory space> [shape: f32[1,1], index: 8, kind: input, shape index: {}]   ;;  %s10114_s9 = inlined_call_operand.vmem [shape: f32[1,1536], index: 9, kind: input, shape index: {}]   ;;  %s10115_s10 = inlined_call_operand.vmem [shape: f32[1,1536], index: 10, kind: input, shape index: {}]   ;;  %s10116_s11 = inlined_call_operand.vmem [shape: bf16[1536,128], index: 11, kind: input, shape index: {}]   ;;  %s10117_s12 = inlined_call_operand.vmem [shape: f32[1,128], index: 12, kind: input, shape index: {}]   ;;  %s10118_s13 = inlined_call_operand.vmem [shape: f32[8,128], index: 13, kind: output, shape index: {}]  }
   0x1   :  { %18 = sst [smem:[#allocation3]] %s10113_s8 }
   0x2 LB: > { %s8608_s28 = sadd.s32 4294967295, %s8525_s27   ;;  %p5604_p0 = scmp.ge.s32.totalorder %s8525_s27, 1  ;;  %s8525_s27 = sphi %s8602_s27, %s24_s27  }
   0x3   : > { %p396_p1 = scmp.lt.s32.totalorder %s8525_s27, 3 }
   0x5   : > { %p397_p2 = pnand %p5604_p0, %p396_p1 }
   0x6   : > { %s5605_s29 = sshll.u32 (!%p397_p2), %s8608_s28, 2  ;;  %s5607_s8 = sshll.u32 (!%p397_p2), %s8608_s28, 6 }
   0x7   : > { %400 = sbr.rel (%p397_p2) target bundleno = 1196 (0x4ac), region = 72  ;;  %p442_p3 = scmp.lt.s32.totalorder (!%p397_p2), %s5605_s29, 7 }
   0x8   : > { %p448_p4 = scmp.lt.s32.totalorder (!%p397_p2), %s5607_s8, 127  ;;  %p5609_p5 = scmp.ne.s32.totalorder (!%p397_p2), %s8608_s28, 0 }
   0xc   : > { %s10120_s29 = smov (!%p442_p3, %s5605_s29), 7  ;;  %s10122_s8 = smov (!%p448_p4, %s5607_s8), 127 }
   0xd   : > { %s5606_s30 = sshll.u32 %s10120_s29, 2  ;;  %s8495_s17 = smul.u32 48, %s10122_s8 }
   0xe   : > { %s8617_s16 = scalar_lea.vmem %s10105_s0, %s5606_s30  ;;  %457 = sbr.rel (%p5609_p5) target bundleno = 32 (0x20), region = 76 }
   0xf   : > { %s8622_s20 = scalar_lea.vmem %s10106_s1, %s8495_s17 }
  0x13   : > { %v8527_v0 = vmov 0.0  }
  0x14   : > { %458 = vst [vmem:[#allocation2 + $0x30] sm:$0xff] %v8527_v0 }
  0x15   : > { %459 = vst [vmem:[#allocation2] sm:$0xff] %v8527_v0 }
  0x16   : > { %460 = vst [vmem:[#allocation2 + $0x58] sm:$0xff] %v8527_v0 }
  0x17   : > { %461 = vst [vmem:[#allocation2 + $0x18] sm:$0xff] %v8527_v0 }
  0x18   : > { %462 = vst [vmem:[#allocation2 + $0x50] sm:$0xff] %v8527_v0 }
  0x19   : > { %463 = vst [vmem:[#allocation2 + $0x20] sm:$0xff] %v8527_v0 }
  0x1a   : > { %464 = vst [vmem:[#allocation2 + $0x8] sm:$0xff] %v8527_v0 }
  0x1b   : > { %465 = vst [vmem:[#allocation2 + $0x38] sm:$0xff] %v8527_v0 }
  0x1c   : > { %466 = vst [vmem:[#allocation2 + $0x28] sm:$0xff] %v8527_v0 }
  0x1d   : > { %467 = vst [vmem:[#allocation2 + $0x48] sm:$0xff] %v8527_v0 }
  0x1e   : > { %468 = vst [vmem:[#allocation2 + $0x10] sm:$0xff] %v8527_v0 }
  0x1f   : > { %469 = vst [vmem:[#allocation2 + $0x40] sm:$0xff] %v8527_v0 }
  0x20 PF: > { %v5948_v1 = vld [vmem:[%s8622_s20 + $0x2a0] sm:$0xf]  ;;  %v8009_v2 = vld [vmem:[%s8622_s20 + $0x2cc] sm:$0xf0]  ;;  %p7146_p6 = scmp.ne.s32.totalorder %s8608_s28, 1 }
  0x21   : > { %v6332_v3 = vld [vmem:[%s8622_s20 + $0x5a0] sm:$0xf]  ;;  %v5949_v4 = vor.u32 %v8009_v2, %v5948_v1  ;;  %v8105_v5 = vld [vmem:[%s8622_s20 + $0x5cc] sm:$0xf0]  ;;  %s4515_s15 = sld [smem:[#allocation3]] (!%p7146_p6) }
  0x22   : > { %v6716_v6 = vld [vmem:[%s8622_s20 + $0x8a0] sm:$0xf]  ;;  %v8201_v7 = vld [vmem:[%s8622_s20 + $0x8cc] sm:$0xf0]  ;;  %v6333_v8 = vor.u32 %v8105_v5, %v6332_v3 }
  0x23   : > { %v6717_v9 = vor.u32 %v8201_v7, %v6716_v6  ;;  %v7100_v10 = vld [vmem:[%s8622_s20 + $0xba0] sm:$0xf]  ;;  %v8297_v11 = vld [vmem:[%s8622_s20 + $0xbcc] sm:$0xf0]  ;;  %2802 = vmatpush.bf16.msra.mxu0 %v5949_v4 }
  0x24   : > { %v5900_v12 = vld [vmem:[%s8622_s20 + $0x240] sm:$0xf]  ;;  %v7101_v13 = vor.u32 %v8297_v11, %v7100_v10  ;;  %v7997_v14 = vld [vmem:[%s8622_s20 + $0x26c] sm:$0xf0]  ;;  %2815 = vmatpush.bf16.msra.mxu1 %v6333_v8 }
  0x25   : > { %v6284_v15 = vld [vmem:[%s8622_s20 + $0x540] sm:$0xf]  ;;  %v8093_v16 = vld [vmem:[%s8622_s20 + $0x56c] sm:$0xf0]  ;;  %2828 = vmatpush.bf16.msra.mxu2 %v6717_v9  ;;  %v5901_v17 = vor.u32 %v7997_v14, %v5900_v12 }
  0x26   : > { %v6285_v18 = vor.u32 %v8093_v16, %v6284_v15  ;;  %v6668_v19 = vld [vmem:[%s8622_s20 + $0x840] sm:$0xf]  ;;  %v8189_v20 = vld [vmem:[%s8622_s20 + $0x86c] sm:$0xf0]  ;;  %2841 = vmatpush.bf16.msra.mxu3 %v7101_v13 }
  0x27   : > { %v7052_v21 = vld [vmem:[%s8622_s20 + $0xb40] sm:$0xf]  ;;  %v6669_v22 = vor.u32 %v8189_v20, %v6668_v19  ;;  %v8285_v23 = vld [vmem:[%s8622_s20 + $0xb6c] sm:$0xf0]  ;;  %2803 = vmatpush.bf16.msra.mxu0 %v5901_v17 }
  0x28   : > { %v5852_v24 = vld [vmem:[%s8622_s20 + $0x1e0] sm:$0xf]  ;;  %v7985_v25 = vld [vmem:[%s8622_s20 + $0x20c] sm:$0xf0]  ;;  %v7053_v26 = vor.u32 %v8285_v23, %v7052_v21  ;;  %2816 = vmatpush.bf16.msra.mxu1 %v6285_v18 }
  0x29   : > { %v6236_v27 = vld [vmem:[%s8622_s20 + $0x4e0] sm:$0xf]  ;;  %v8081_v28 = vld [vmem:[%s8622_s20 + $0x50c] sm:$0xf0]  ;;  %v5853_v30 = vor.u32 %v7985_v25, %v5852_v24  ;;  %2829 = vmatpush.bf16.msra.mxu2 %v6669_v22 }
  0x2a   : > { %v6620_v29 = vld [vmem:[%s8622_s20 + $0x7e0] sm:$0xf]  ;;  %v8177_v31 = vld [vmem:[%s8622_s20 + $0x80c] sm:$0xf0]  ;;  %v6237_v34 = vor.u32 %v8081_v28, %v6236_v27  ;;  %2842 = vmatpush.bf16.msra.mxu3 %v7053_v26 }
  0x2b   : > { %v7004_v32 = vld [vmem:[%s8622_s20 + $0xae0] sm:$0xf]  ;;  %v8273_v33 = vld [vmem:[%s8622_s20 + $0xb0c] sm:$0xf0]  ;;  %v6621_v35 = vor.u32 %v8177_v31, %v6620_v29  ;;  %2804 = vmatpush.bf16.msra.mxu0 %v5853_v30  ;;  %v8003_v29 = vld [vmem:[%s8622_s20 + $0x2a4] sm:$0xf] }
  0x2c   : > { %v5804_v36 = vld [vmem:[%s8622_s20 + $0x180] sm:$0xf]  ;;  %v7973_v37 = vld [vmem:[%s8622_s20 + $0x1ac] sm:$0xf0]  ;;  %v7005_v39 = vor.u32 %v8273_v33, %v7004_v32  ;;  %2817 = vmatpush.bf16.msra.mxu1 %v6237_v34  ;;  %v5950_v30 = vld [vmem:[%s8622_s20 + $0x2d0] sm:$0xf0] }
  0x2d   : > { %v6188_v38 = vld [vmem:[%s8622_s20 + $0x480] sm:$0xf]  ;;  %v8069_v40 = vld [vmem:[%s8622_s20 + $0x4ac] sm:$0xf0]  ;;  %v5805_v45 = vor.u32 %v7973_v37, %v5804_v36  ;;  %2830 = vmatpush.bf16.msra.mxu2 %v6621_v35  ;;  %v8099_v31 = vld [vmem:[%s8622_s20 + $0x5a4] sm:$0xf] }
  0x2e   : > { %v6572_v41 = vld [vmem:[%s8622_s20 + $0x780] sm:$0xf]  ;;  %v8165_v42 = vld [vmem:[%s8622_s20 + $0x7ac] sm:$0xf0]  ;;  %v6189_v46 = vor.u32 %v8069_v40, %v6188_v38  ;;  %2843 = vmatpush.bf16.msra.mxu3 %v7005_v39  ;;  %v6334_v33 = vld [vmem:[%s8622_s20 + $0x5d0] sm:$0xf0] }
  0x2f   : > { %v6956_v43 = vld [vmem:[%s8622_s20 + $0xa80] sm:$0xf]  ;;  %v8261_v44 = vld [vmem:[%s8622_s20 + $0xaac] sm:$0xf0]  ;;  %v6573_v47 = vor.u32 %v8165_v42, %v6572_v41  ;;  %2805 = vmatpush.bf16.msra.mxu0 %v5805_v45  ;;  %v8195_v34 = vld [vmem:[%s8622_s20 + $0x8a4] sm:$0xf]  ;;  %v5953_v41 = vor.u32 %v8003_v29, %v5950_v30  ;;  %v6337_v42 = vor.u32 %v8099_v31, %v6334_v33 }
  0x30   : > { %v5756_v48 = vld [vmem:[%s8622_s20 + $0x120] sm:$0xf]  ;;  %v7961_v49 = vld [vmem:[%s8622_s20 + $0x14c] sm:$0xf0]  ;;  %v6957_v51 = vor.u32 %v8261_v44, %v6956_v43  ;;  %2818 = vmatpush.bf16.msra.mxu1 %v6189_v46  ;;  %v6718_v35 = vld [vmem:[%s8622_s20 + $0x8d0] sm:$0xf0] }
  0x31   : > { %v6140_v50 = vld [vmem:[%s8622_s20 + $0x420] sm:$0xf]  ;;  %v8057_v52 = vld [vmem:[%s8622_s20 + $0x44c] sm:$0xf0]  ;;  %v5757_v57 = vor.u32 %v7961_v49, %v5756_v48  ;;  %2831 = vmatpush.bf16.msra.mxu2 %v6573_v47  ;;  %v8291_v38 = vld [vmem:[%s8622_s20 + $0xba4] sm:$0xf]  ;;  %v6721_v43 = vor.u32 %v8195_v34, %v6718_v35 }
  0x32   : > { %v6524_v53 = vld [vmem:[%s8622_s20 + $0x720] sm:$0xf]  ;;  %v8153_v54 = vld [vmem:[%s8622_s20 + $0x74c] sm:$0xf0]  ;;  %v6141_v58 = vor.u32 %v8057_v52, %v6140_v50  ;;  %2844 = vmatpush.bf16.msra.mxu3 %v6957_v51  ;;  %v7102_v39 = vld [vmem:[%s8622_s20 + $0xbd0] sm:$0xf0] }
  0x33   : > { %v6908_v55 = vld [vmem:[%s8622_s20 + $0xa20] sm:$0xf]  ;;  %v8249_v56 = vld [vmem:[%s8622_s20 + $0xa4c] sm:$0xf0]  ;;  %v6525_v59 = vor.u32 %v8153_v54, %v6524_v53  ;;  %2806 = vmatpush.bf16.msra.mxu0 %v5757_v57  ;;  %v7991_v44 = vld [vmem:[%s8622_s20 + $0x244] sm:$0xf]  ;;  %v7105_v47 = vor.u32 %v8291_v38, %v7102_v39 }
  0x34   : > { %v5708_v60 = vld [vmem:[%s8622_s20 + $0xc0] sm:$0xf]  ;;  %v7949_v61 = vld [vmem:[%s8622_s20 + $0xec] sm:$0xf0]  ;;  %v6909_v63 = vor.u32 %v8249_v56, %v6908_v55  ;;  %2819 = vmatpush.bf16.msra.mxu1 %v6141_v58  ;;  %v5902_v45 = vld [vmem:[%s8622_s20 + $0x270] sm:$0xf0] }
  0x35   : > { %v6092_v62 = vld [vmem:[%s8622_s20 + $0x3c0] sm:$0xf]  ;;  %v8045_v0 = vld [vmem:[%s8622_s20 + $0x3ec] sm:$0xf0]  ;;  %v5709_v5 = vor.u32 %v7949_v61, %v5708_v60  ;;  %2832 = vmatpush.bf16.msra.mxu2 %v6525_v59  ;;  %v8087_v46 = vld [vmem:[%s8622_s20 + $0x544] sm:$0xf]  ;;  %v5905_v53 = vor.u32 %v7991_v44, %v5902_v45 }
  0x36   : > { %v6476_v1 = vld [vmem:[%s8622_s20 + $0x6c0] sm:$0xf]  ;;  %v8141_v2 = vld [vmem:[%s8622_s20 + $0x6ec] sm:$0xf0]  ;;  %v6093_v6 = vor.u32 %v8045_v0, %v6092_v62  ;;  %2845 = vmatpush.bf16.msra.mxu3 %v6909_v63  ;;  %v6286_v48 = vld [vmem:[%s8622_s20 + $0x570] sm:$0xf0] }
  0x37   : > { %v6860_v3 = vld [vmem:[%s8622_s20 + $0x9c0] sm:$0xf]  ;;  %v8237_v4 = vld [vmem:[%s8622_s20 + $0x9ec] sm:$0xf0]  ;;  %v6477_v7 = vor.u32 %v8141_v2, %v6476_v1  ;;  %2807 = vmatpush.bf16.msra.mxu0 %v5709_v5  ;;  %v8183_v49 = vld [vmem:[%s8622_s20 + $0x844] sm:$0xf]  ;;  %v6289_v54 = vor.u32 %v8087_v46, %v6286_v48 }
  0x38   : > { %v5660_v8 = vld [vmem:[%s8622_s20 + $0x60] sm:$0xf]  ;;  %v7937_v9 = vld [vmem:[%s8622_s20 + $0x8c] sm:$0xf0]  ;;  %v6861_v11 = vor.u32 %v8237_v4, %v6860_v3  ;;  %2820 = vmatpush.bf16.msra.mxu1 %v6093_v6  ;;  %v6670_v50 = vld [vmem:[%s8622_s20 + $0x870] sm:$0xf0] }
  0x39   : > { %v6044_v10 = vld [vmem:[%s8622_s20 + $0x360] sm:$0xf]  ;;  %v8033_v12 = vld [vmem:[%s8622_s20 + $0x38c] sm:$0xf0]  ;;  %v5661_v17 = vor.u32 %v7937_v9, %v5660_v8  ;;  %2833 = vmatpush.bf16.msra.mxu2 %v6477_v7  ;;  %v8279_v51 = vld [vmem:[%s8622_s20 + $0xb44] sm:$0xf]  ;;  %v6673_v55 = vor.u32 %v8183_v49, %v6670_v50 }
  0x3a   : > { %v6428_v13 = vld [vmem:[%s8622_s20 + $0x660] sm:$0xf]  ;;  %v8129_v14 = vld [vmem:[%s8622_s20 + $0x68c] sm:$0xf0]  ;;  %v6045_v20 = vor.u32 %v8033_v12, %v6044_v10  ;;  %2846 = vmatpush.bf16.msra.mxu3 %v6861_v11  ;;  %v7054_v52 = vld [vmem:[%s8622_s20 + $0xb70] sm:$0xf0] }
  0x3b   : > { %v6812_v15 = vld [vmem:[%s8622_s20 + $0x960] sm:$0xf]  ;;  %v8225_v16 = vld [vmem:[%s8622_s20 + $0x98c] sm:$0xf0]  ;;  %v6429_v21 = vor.u32 %v8129_v14, %v6428_v13  ;;  %2808 = vmatpush.bf16.msra.mxu0 %v5661_v17  ;;  %v7979_v56 = vld [vmem:[%s8622_s20 + $0x1e4] sm:$0xf]  ;;  %v7057_v59 = vor.u32 %v8279_v51, %v7054_v52 }
  0x3c   : > { %v5612_v18 = vld [vmem:[%s8622_s20] sm:$0xf]  ;;  %v7925_v19 = vld [vmem:[%s8622_s20 + $0x2c] sm:$0xf0]  ;;  %v6813_v25 = vor.u32 %v8225_v16, %v6812_v15  ;;  %2821 = vmatpush.bf16.msra.mxu1 %v6045_v20  ;;  %v5854_v57 = vld [vmem:[%s8622_s20 + $0x210] sm:$0xf0] }
  0x3d   : > { %v5996_v22 = vld [vmem:[%s8622_s20 + $0x300] sm:$0xf]  ;;  %v8021_v23 = vld [vmem:[%s8622_s20 + $0x32c] sm:$0xf0]  ;;  %v5613_v32 = vor.u32 %v7925_v19, %v5612_v18  ;;  %2834 = vmatpush.bf16.msra.mxu2 %v6429_v21  ;;  %v8075_v58 = vld [vmem:[%s8622_s20 + $0x4e4] sm:$0xf]  ;;  %v5857_v1 = vor.u32 %v7979_v56, %v5854_v57 }
  0x3e   : > { %v6380_v24 = vld [vmem:[%s8622_s20 + $0x600] sm:$0xf]  ;;  %v8117_v26 = vld [vmem:[%s8622_s20 + $0x62c] sm:$0xf0]  ;;  %v5997_v36 = vor.u32 %v8021_v23, %v5996_v22  ;;  %2847 = vmatpush.bf16.msra.mxu3 %v6813_v25  ;;  %v6238_v60 = vld [vmem:[%s8622_s20 + $0x510] sm:$0xf0] }
  0x3f   : > { %v6764_v27 = vld [vmem:[%s8622_s20 + $0x900] sm:$0xf]  ;;  %v8213_v28 = vld [vmem:[%s8622_s20 + $0x92c] sm:$0xf0]  ;;  %v6381_v37 = vor.u32 %v8117_v26, %v6380_v24  ;;  %2809 = vmatpush.bf16.msra.mxu0 %v5613_v32  ;;  %v8171_v61 = vld [vmem:[%s8622_s20 + $0x7e4] sm:$0xf]  ;;  %v6241_v3 = vor.u32 %v8075_v58, %v6238_v60 }
  0x40   : > { %v6765_v40 = vor.u32 %v8213_v28, %v6764_v27  ;;  %2822 = vmatpush.bf16.msra.mxu1 %v5997_v36  ;;  %v6622_v62 = vld [vmem:[%s8622_s20 + $0x810] sm:$0xf0]  ;;  %v8267_v63 = vld [vmem:[%s8622_s20 + $0xae4] sm:$0xf]  ;;  %v483_v2 = vld [vmem:[%s8617_s16 + $0x8] sm:$0xff] }
  0x41   : > { %2835 = vmatpush.bf16.msra.mxu2 %v6381_v37  ;;  %v7006_v0 = vld [vmem:[%s8622_s20 + $0xb10] sm:$0xf0]  ;;  %v6625_v4 = vor.u32 %v8171_v61, %v6622_v62  ;;  %v7967_v5 = vld [vmem:[%s8622_s20 + $0x184] sm:$0xf]  ;;  %v872_v8 = vunpack.c.l.b16 %v483_v2  ;;  %v873_v9 = vunpack.c.h.b16 %v483_v2 }
  0x42   : > { %2848 = vmatpush.bf16.msra.mxu3 %v6765_v40  ;;  %v5806_v6 = vld [vmem:[%s8622_s20 + $0x1b0] sm:$0xf0]  ;;  %v8063_v7 = vld [vmem:[%s8622_s20 + $0x484] sm:$0xf]  ;;  %v7009_v10 = vor.u32 %v8267_v63, %v7006_v0 }
  0x43   : > { %2854 = vmatpush.bf16.msrb.mxu0 %v5953_v41  ;;  %v6190_v11 = vld [vmem:[%s8622_s20 + $0x4b0] sm:$0xf0]  ;;  %v8159_v12 = vld [vmem:[%s8622_s20 + $0x784] sm:$0xf]  ;;  %v8722_v16 = vpack.c.b16 %v872_v8, %v872_v8  ;;  %v8724_v17 = vpack.c.b16 %v873_v9, %v873_v9  ;;  %v5809_v19 = vor.u32 %v7967_v5, %v5806_v6  ;;  %v8010_v8 = vld [vmem:[%s8622_s20 + $0x2d4] sm:$0xf0] }
  0x44   : > { %2867 = vmatpush.bf16.msrb.mxu1 %v6337_v42  ;;  %v6574_v13 = vld [vmem:[%s8622_s20 + $0x7b0] sm:$0xf0]  ;;  %v8255_v14 = vld [vmem:[%s8622_s20 + $0xa84] sm:$0xf]  ;;  %v6193_v22 = vor.u32 %v8063_v7, %v6190_v11  ;;  %v5956_v7 = vld [vmem:[%s8622_s20 + $0x2a8] sm:$0xf] }
  0x45   : > { %2880 = vmatpush.bf16.msrb.mxu2 %v6721_v43  ;;  %v6958_v15 = vld [vmem:[%s8622_s20 + $0xab0] sm:$0xf0]  ;;  %v482_v18 = vld [vmem:[%s8617_s16] sm:$0xff]  ;;  %v6577_v23 = vor.u32 %v8159_v12, %v6574_v13  ;;  %2849 = vmatmul.bf16.vlgmr.msra.gmra.mxu3 %v8724_v17  ;;  %v6340_v9 = vld [vmem:[%s8622_s20 + $0x5a8] sm:$0xf] }
  0x46   : > { %2893 = vmatpush.bf16.msrb.mxu3 %v7105_v47  ;;  %v870_v20 = vunpack.c.l.b16 %v482_v18  ;;  %v871_v21 = vunpack.c.h.b16 %v482_v18  ;;  %v7955_v24 = vld [vmem:[%s8622_s20 + $0x124] sm:$0xf]  ;;  %v5758_v25 = vld [vmem:[%s8622_s20 + $0x150] sm:$0xf0]  ;;  %v6961_v27 = vor.u32 %v8255_v14, %v6958_v15  ;;  %2836 = vmatmul.bf16.vlgmr.msra.gmra.mxu2 %v8722_v16  ;;  %v8106_v11 = vld [vmem:[%s8622_s20 + $0x5d4] sm:$0xf0] }
  0x47   : > { %2855 = vmatpush.bf16.msrb.mxu0 %v5905_v53  ;;  %v8051_v26 = vld [vmem:[%s8622_s20 + $0x424] sm:$0xf]  ;;  %v6142_v28 = vld [vmem:[%s8622_s20 + $0x450] sm:$0xf0]  ;;  %v5761_v35 = vor.u32 %v7955_v24, %v5758_v25  ;;  %v6724_v12 = vld [vmem:[%s8622_s20 + $0x8a8] sm:$0xf] }
  0x48   : > { %2868 = vmatpush.bf16.msrb.mxu1 %v6289_v54  ;;  %v8147_v29 = vld [vmem:[%s8622_s20 + $0x724] sm:$0xf]  ;;  %v6526_v30 = vld [vmem:[%s8622_s20 + $0x750] sm:$0xf0]  ;;  %v8734_v31 = vpack.c.b16 %v870_v20, %v870_v20  ;;  %v8736_v32 = vpack.c.b16 %v871_v21, %v871_v21  ;;  %v6145_v36 = vor.u32 %v8051_v26, %v6142_v28  ;;  %v8202_v13 = vld [vmem:[%s8622_s20 + $0x8d4] sm:$0xf0]  ;;  %v5957_v21 = vor.u32 %v8010_v8, %v5956_v7 }
  0x49   : > { %2881 = vmatpush.bf16.msrb.mxu2 %v6673_v55  ;;  %v8243_v33 = vld [vmem:[%s8622_s20 + $0xa24] sm:$0xf]  ;;  %v6910_v34 = vld [vmem:[%s8622_s20 + $0xa50] sm:$0xf0]  ;;  %v6529_v37 = vor.u32 %v8147_v29, %v6526_v30  ;;  %v7108_v18 = vld [vmem:[%s8622_s20 + $0xba8] sm:$0xf] }
  0x4a   : > { %2894 = vmatpush.bf16.msrb.mxu3 %v7057_v59  ;;  %2823 = vmatmul.bf16.vlgmr.msra.gmra.mxu1 %v8736_v32  ;;  %v7943_v38 = vld [vmem:[%s8622_s20 + $0xc4] sm:$0xf]  ;;  %v5710_v39 = vld [vmem:[%s8622_s20 + $0xf0] sm:$0xf0]  ;;  %v6913_v41 = vor.u32 %v8243_v33, %v6910_v34  ;;  %v5908_v24 = vld [vmem:[%s8622_s20 + $0x248] sm:$0xf] }
  0x4b   : > { %2856 = vmatpush.bf16.msrb.mxu0 %v5857_v1  ;;  %v8039_v40 = vld [vmem:[%s8622_s20 + $0x3c4] sm:$0xf]  ;;  %v6094_v42 = vld [vmem:[%s8622_s20 + $0x3f0] sm:$0xf0]  ;;  %v5713_v47 = vor.u32 %v7943_v38, %v5710_v39  ;;  %v7998_v25 = vld [vmem:[%s8622_s20 + $0x274] sm:$0xf0] }
  0x4c   : > { %2869 = vmatpush.bf16.msrb.mxu1 %v6241_v3  ;;  %v8135_v43 = vld [vmem:[%s8622_s20 + $0x6c4] sm:$0xf]  ;;  %v6478_v44 = vld [vmem:[%s8622_s20 + $0x6f0] sm:$0xf0]  ;;  %2810 = vmatmul.bf16.vlgmr.msra.gmra.mxu0 %v8734_v31  ;;  %v6097_v48 = vor.u32 %v8039_v40, %v6094_v42  ;;  %v6292_v26 = vld [vmem:[%s8622_s20 + $0x548] sm:$0xf] }
  0x4d   : > { %2882 = vmatpush.bf16.msrb.mxu2 %v6625_v4  ;;  %v8231_v45 = vld [vmem:[%s8622_s20 + $0x9c4] sm:$0xf]  ;;  %v6862_v46 = vld [vmem:[%s8622_s20 + $0x9f0] sm:$0xf0]  ;;  %v6481_v49 = vor.u32 %v8135_v43, %v6478_v44  ;;  %v8094_v28 = vld [vmem:[%s8622_s20 + $0x574] sm:$0xf0] }
  0x4e   : > { %2895 = vmatpush.bf16.msrb.mxu3 %v7009_v10  ;;  %v7931_v50 = vld [vmem:[%s8622_s20 + $0x64] sm:$0xf]  ;;  %v5662_v51 = vld [vmem:[%s8622_s20 + $0x90] sm:$0xf0]  ;;  %v6865_v53 = vor.u32 %v8231_v45, %v6862_v46  ;;  %v6676_v29 = vld [vmem:[%s8622_s20 + $0x848] sm:$0xf] }
  0x4f   : > { %2857 = vmatpush.bf16.msrb.mxu0 %v5809_v19  ;;  %v8027_v52 = vld [vmem:[%s8622_s20 + $0x364] sm:$0xf]  ;;  %v6046_v54 = vld [vmem:[%s8622_s20 + $0x390] sm:$0xf0]  ;;  %v5665_v59 = vor.u32 %v7931_v50, %v5662_v51  ;;  %v8298_v19 = vld [vmem:[%s8622_s20 + $0xbd4] sm:$0xf0] }
  0x50   : > { %2870 = vmatpush.bf16.msrb.mxu1 %v6193_v22  ;;  %v8123_v55 = vld [vmem:[%s8622_s20 + $0x664] sm:$0xf]  ;;  %v6430_v56 = vld [vmem:[%s8622_s20 + $0x690] sm:$0xf0]  ;;  %v6049_v62 = vor.u32 %v8027_v52, %v6046_v54  ;;  %v6341_v22 = vor.u32 %v8106_v11, %v6340_v9  ;;  %v8190_v30 = vld [vmem:[%s8622_s20 + $0x874] sm:$0xf0] }
  0x51   : > { %2883 = vmatpush.bf16.msrb.mxu2 %v6577_v23  ;;  %v8219_v57 = vld [vmem:[%s8622_s20 + $0x964] sm:$0xf]  ;;  %v6814_v58 = vld [vmem:[%s8622_s20 + $0x990] sm:$0xf0]  ;;  %v6433_v63 = vor.u32 %v8123_v55, %v6430_v56  ;;  %v6725_v23 = vor.u32 %v8202_v13, %v6724_v12  ;;  %v7060_v33 = vld [vmem:[%s8622_s20 + $0xb48] sm:$0xf] }
  0x52   : > { %2896 = vmatpush.bf16.msrb.mxu3 %v6961_v27  ;;  %v7919_v60 = vld [vmem:[%s8622_s20 + $0x4] sm:$0xf]  ;;  %v5614_v61 = vld [vmem:[%s8622_s20 + $0x30] sm:$0xf0]  ;;  %v6817_v3 = vor.u32 %v8219_v57, %v6814_v58  ;;  %v7109_v27 = vor.u32 %v8298_v19, %v7108_v18  ;;  %v8286_v34 = vld [vmem:[%s8622_s20 + $0xb74] sm:$0xf0] }
  0x53   : > { %2858 = vmatpush.bf16.msrb.mxu0 %v5761_v35  ;;  %v8015_v0 = vld [vmem:[%s8622_s20 + $0x304] sm:$0xf]  ;;  %v5998_v1 = vld [vmem:[%s8622_s20 + $0x330] sm:$0xf0]  ;;  %v5617_v10 = vor.u32 %v7919_v60, %v5614_v61  ;;  %v5909_v35 = vor.u32 %v7998_v25, %v5908_v24  ;;  %v5860_v38 = vld [vmem:[%s8622_s20 + $0x1e8] sm:$0xf] }
  0x54   : > { %2871 = vmatpush.bf16.msrb.mxu1 %v6145_v36  ;;  %v8111_v2 = vld [vmem:[%s8622_s20 + $0x604] sm:$0xf]  ;;  %v6382_v4 = vld [vmem:[%s8622_s20 + $0x630] sm:$0xf0]  ;;  %v6001_v14 = vor.u32 %v8015_v0, %v5998_v1  ;;  %v6293_v36 = vor.u32 %v8094_v28, %v6292_v26  ;;  %v7986_v39 = vld [vmem:[%s8622_s20 + $0x214] sm:$0xf0] }
  0x55   : > { %2884 = vmatpush.bf16.msrb.mxu2 %v6529_v37  ;;  %v8207_v5 = vld [vmem:[%s8622_s20 + $0x904] sm:$0xf]  ;;  %v6766_v6 = vld [vmem:[%s8622_s20 + $0x930] sm:$0xf0]  ;;  %v6385_v15 = vor.u32 %v8111_v2, %v6382_v4  ;;  %v6677_v37 = vor.u32 %v8190_v30, %v6676_v29  ;;  %v6244_v40 = vld [vmem:[%s8622_s20 + $0x4e8] sm:$0xf] }
  0x56   : > { %2897 = vmatpush.bf16.msrb.mxu3 %v6913_v41  ;;  %v6769_v20 = vor.u32 %v8207_v5, %v6766_v6  ;;  %v7061_v41 = vor.u32 %v8286_v34, %v7060_v33  ;;  %v8082_v42 = vld [vmem:[%s8622_s20 + $0x514] sm:$0xf0]  ;;  %v6628_v43 = vld [vmem:[%s8622_s20 + $0x7e8] sm:$0xf] }
  0x57   : > { %2859 = vmatpush.bf16.msrb.mxu0 %v5713_v47  ;;  %v8178_v44 = vld [vmem:[%s8622_s20 + $0x814] sm:$0xf0]  ;;  %v7012_v45 = vld [vmem:[%s8622_s20 + $0xae8] sm:$0xf]  ;;  %v5861_v47 = vor.u32 %v7986_v39, %v5860_v38 }
  0x58   : > { %2872 = vmatpush.bf16.msrb.mxu1 %v6097_v48  ;;  %v8274_v46 = vld [vmem:[%s8622_s20 + $0xb14] sm:$0xf0]  ;;  %v6245_v48 = vor.u32 %v8082_v42, %v6244_v40  ;;  %v5812_v50 = vld [vmem:[%s8622_s20 + $0x188] sm:$0xf] }
  0x59   : > { %2885 = vmatpush.bf16.msrb.mxu2 %v6481_v49  ;;  %v6629_v49 = vor.u32 %v8178_v44, %v6628_v43  ;;  %v7974_v51 = vld [vmem:[%s8622_s20 + $0x1b4] sm:$0xf0]  ;;  %v6196_v52 = vld [vmem:[%s8622_s20 + $0x488] sm:$0xf] }
  0x5a   : > { %2898 = vmatpush.bf16.msrb.mxu3 %v6865_v53  ;;  %v7013_v53 = vor.u32 %v8274_v46, %v7012_v45  ;;  %v8070_v54 = vld [vmem:[%s8622_s20 + $0x4b4] sm:$0xf0]  ;;  %v6580_v55 = vld [vmem:[%s8622_s20 + $0x788] sm:$0xf] }
  0x5b   : > { %2860 = vmatpush.bf16.msrb.mxu0 %v5665_v59  ;;  %v8166_v56 = vld [vmem:[%s8622_s20 + $0x7b4] sm:$0xf0]  ;;  %v6964_v57 = vld [vmem:[%s8622_s20 + $0xa88] sm:$0xf]  ;;  %v5813_v59 = vor.u32 %v7974_v51, %v5812_v50  ;;  %v6197_v60 = vor.u32 %v8070_v54, %v6196_v52  ;;  %v6342_v51 = vld [vmem:[%s8622_s20 + $0x5d8] sm:$0xf0] }
  0x5c   : > { %2873 = vmatpush.bf16.msrb.mxu1 %v6049_v62  ;;  %v8262_v58 = vld [vmem:[%s8622_s20 + $0xab4] sm:$0xf0]  ;;  %v6581_v61 = vor.u32 %v8166_v56, %v6580_v55  ;;  %v5764_v62 = vld [vmem:[%s8622_s20 + $0x128] sm:$0xf]  ;;  %v8196_v52 = vld [vmem:[%s8622_s20 + $0x8ac] sm:$0xf] }
  0x5d   : > { %2886 = vmatpush.bf16.msrb.mxu2 %v6433_v63  ;;  %v7962_v63 = vld [vmem:[%s8622_s20 + $0x154] sm:$0xf0]  ;;  %v6148_v0 = vld [vmem:[%s8622_s20 + $0x428] sm:$0xf]  ;;  %v6965_v1 = vor.u32 %v8262_v58, %v6964_v57  ;;  %v8292_v56 = vld [vmem:[%s8622_s20 + $0xbac] sm:$0xf] }
  0x5e   : > { %2899 = vmatpush.bf16.msrb.mxu3 %v6817_v3  ;;  %v8058_v2 = vld [vmem:[%s8622_s20 + $0x454] sm:$0xf0]  ;;  %v6532_v3 = vld [vmem:[%s8622_s20 + $0x728] sm:$0xf]  ;;  %v5765_v7 = vor.u32 %v7962_v63, %v5764_v62  ;;  %v7110_v57 = vld [vmem:[%s8622_s20 + $0xbd8] sm:$0xf0] }
  0x5f   : > { %2861 = vmatpush.bf16.msrb.mxu0 %v5617_v10  ;;  %v8154_v4 = vld [vmem:[%s8622_s20 + $0x754] sm:$0xf0]  ;;  %v6916_v5 = vld [vmem:[%s8622_s20 + $0xa28] sm:$0xf]  ;;  %v6149_v8 = vor.u32 %v8058_v2, %v6148_v0  ;;  %v7992_v62 = vld [vmem:[%s8622_s20 + $0x24c] sm:$0xf] }
  0x60   : > { %2874 = vmatpush.bf16.msrb.mxu1 %v6001_v14  ;;  %v8250_v6 = vld [vmem:[%s8622_s20 + $0xa54] sm:$0xf0]  ;;  %v6533_v9 = vor.u32 %v8154_v4, %v6532_v3  ;;  %v5716_v10 = vld [vmem:[%s8622_s20 + $0xc8] sm:$0xf]  ;;  %v5910_v63 = vld [vmem:[%s8622_s20 + $0x278] sm:$0xf0] }
  0x61   : > { %2887 = vmatpush.bf16.msrb.mxu2 %v6385_v15  ;;  %v7950_v11 = vld [vmem:[%s8622_s20 + $0xf4] sm:$0xf0]  ;;  %v6100_v12 = vld [vmem:[%s8622_s20 + $0x3c8] sm:$0xf]  ;;  %v6917_v13 = vor.u32 %v8250_v6, %v6916_v5  ;;  %v8088_v0 = vld [vmem:[%s8622_s20 + $0x54c] sm:$0xf] }
  0x62   : > { %2900 = vmatpush.bf16.msrb.mxu3 %v6769_v20  ;;  %2862 = vmatmul.bf16.vlgmr.msrb.gmra.mxu0 %v8734_v31  ;;  %v8046_v14 = vld [vmem:[%s8622_s20 + $0x3f4] sm:$0xf0]  ;;  %v6484_v15 = vld [vmem:[%s8622_s20 + $0x6c8] sm:$0xf]  ;;  %v6294_v2 = vld [vmem:[%s8622_s20 + $0x578] sm:$0xf0] }
  0x63   : > { %2906 = vmatpush.bf16.msra.mxu0 %v5957_v21  ;;  %2875 = vmatmul.bf16.vlgmr.msrb.gmra.mxu1 %v8736_v32  ;;  %v8142_v18 = vld [vmem:[%s8622_s20 + $0x6f4] sm:$0xf0]  ;;  %v6868_v19 = vld [vmem:[%s8622_s20 + $0x9c8] sm:$0xf]  ;;  %v5717_v21 = vor.u32 %v7950_v11, %v5716_v10  ;;  %v8184_v3 = vld [vmem:[%s8622_s20 + $0x84c] sm:$0xf] }
  0x64   : > { %2919 = vmatpush.bf16.msra.mxu1 %v6341_v22  ;;  %2888 = vmatmul.bf16.vlgmr.msrb.gmra.mxu2 %v8722_v16  ;;  %v8238_v20 = vld [vmem:[%s8622_s20 + $0x9f4] sm:$0xf0]  ;;  %v6101_v22 = vor.u32 %v8046_v14, %v6100_v12  ;;  %v5668_v24 = vld [vmem:[%s8622_s20 + $0x68] sm:$0xf]  ;;  %v6678_v4 = vld [vmem:[%s8622_s20 + $0x878] sm:$0xf0] }
  0x65   : > { %2932 = vmatpush.bf16.msra.mxu2 %v6725_v23  ;;  %2901 = vmatmul.bf16.vlgmr.msrb.gmra.mxu3 %v8724_v17  ;;  %v6485_v23 = vor.u32 %v8142_v18, %v6484_v15  ;;  %v7938_v25 = vld [vmem:[%s8622_s20 + $0x94] sm:$0xf0]  ;;  %v6052_v26 = vld [vmem:[%s8622_s20 + $0x368] sm:$0xf]  ;;  %v8280_v5 = vld [vmem:[%s8622_s20 + $0xb4c] sm:$0xf] }
  0x66   : > { %2945 = vmatpush.bf16.msra.mxu3 %v7109_v27  ;;  %v6869_v27 = vor.u32 %v8238_v20, %v6868_v19  ;;  %v8034_v28 = vld [vmem:[%s8622_s20 + $0x394] sm:$0xf0]  ;;  %v6436_v29 = vld [vmem:[%s8622_s20 + $0x668] sm:$0xf]  ;;  %v7062_v6 = vld [vmem:[%s8622_s20 + $0xb78] sm:$0xf0] }
  0x67   : > { %2907 = vmatpush.bf16.msra.mxu0 %v5909_v35  ;;  %v8130_v30 = vld [vmem:[%s8622_s20 + $0x694] sm:$0xf0]  ;;  %v6820_v33 = vld [vmem:[%s8622_s20 + $0x968] sm:$0xf]  ;;  %v5669_v35 = vor.u32 %v7938_v25, %v5668_v24  ;;  %v6053_v38 = vor.u32 %v8034_v28, %v6052_v26  ;;  %v7980_v10 = vld [vmem:[%s8622_s20 + $0x1ec] sm:$0xf] }
  0x68   : > { %2920 = vmatpush.bf16.msra.mxu1 %v6293_v36  ;;  %v8226_v34 = vld [vmem:[%s8622_s20 + $0x994] sm:$0xf0]  ;;  %v5620_v36 = vld [vmem:[%s8622_s20 + $0x8] sm:$0xf]  ;;  %v6437_v39 = vor.u32 %v8130_v30, %v6436_v29  ;;  %v5862_v11 = vld [vmem:[%s8622_s20 + $0x218] sm:$0xf0] }
  0x69   : > { %2933 = vmatpush.bf16.msra.mxu2 %v6677_v37  ;;  %v7926_v37 = vld [vmem:[%s8622_s20 + $0x34] sm:$0xf0]  ;;  %v6004_v40 = vld [vmem:[%s8622_s20 + $0x308] sm:$0xf]  ;;  %v6821_v43 = vor.u32 %v8226_v34, %v6820_v33  ;;  %v8076_v12 = vld [vmem:[%s8622_s20 + $0x4ec] sm:$0xf] }
  0x6a   : > { %2946 = vmatpush.bf16.msra.mxu3 %v7061_v41  ;;  %v8022_v41 = vld [vmem:[%s8622_s20 + $0x334] sm:$0xf0]  ;;  %v6388_v42 = vld [vmem:[%s8622_s20 + $0x608] sm:$0xf]  ;;  %v5621_v50 = vor.u32 %v7926_v37, %v5620_v36  ;;  %v6246_v14 = vld [vmem:[%s8622_s20 + $0x518] sm:$0xf0] }
  0x6b   : > { %2908 = vmatpush.bf16.msra.mxu0 %v5861_v47  ;;  %v8118_v44 = vld [vmem:[%s8622_s20 + $0x634] sm:$0xf0]  ;;  %v6772_v45 = vld [vmem:[%s8622_s20 + $0x908] sm:$0xf]  ;;  %v8004_v47 = vld [vmem:[%s8622_s20 + $0x2ac] sm:$0xf]  ;;  %v6005_v54 = vor.u32 %v8022_v41, %v6004_v40 }
  0x6c   : > { %2921 = vmatpush.bf16.msra.mxu1 %v6245_v48  ;;  %v8214_v46 = vld [vmem:[%s8622_s20 + $0x934] sm:$0xf0]  ;;  %v5958_v48 = vld [vmem:[%s8622_s20 + $0x2d8] sm:$0xf0]  ;;  %v6389_v55 = vor.u32 %v8118_v44, %v6388_v42  ;;  %v8172_v15 = vld [vmem:[%s8622_s20 + $0x7ec] sm:$0xf] }
  0x6d   : > { %2934 = vmatpush.bf16.msra.mxu2 %v6629_v49  ;;  %v8100_v49 = vld [vmem:[%s8622_s20 + $0x5ac] sm:$0xf]  ;;  %v6773_v58 = vor.u32 %v8214_v46, %v6772_v45  ;;  %v6630_v18 = vld [vmem:[%s8622_s20 + $0x818] sm:$0xf0] }
  0x6e   : > { %2947 = vmatpush.bf16.msra.mxu3 %v7013_v53  ;;  %v6726_v53 = vld [vmem:[%s8622_s20 + $0x8d8] sm:$0xf0]  ;;  %v8268_v19 = vld [vmem:[%s8622_s20 + $0xaec] sm:$0xf] }
  0x6f   : > { %2909 = vmatpush.bf16.msra.mxu0 %v5813_v59  ;;  %v5961_v59 = vor.u32 %v8004_v47, %v5958_v48  ;;  %v7014_v20 = vld [vmem:[%s8622_s20 + $0xb18] sm:$0xf0]  ;;  %v7968_v24 = vld [vmem:[%s8622_s20 + $0x18c] sm:$0xf] }
  0x70   : > { %2922 = vmatpush.bf16.msra.mxu1 %v6197_v60  ;;  %v6345_v60 = vor.u32 %v8100_v49, %v6342_v51  ;;  %v5814_v25 = vld [vmem:[%s8622_s20 + $0x1b8] sm:$0xf0]  ;;  %v8064_v26 = vld [vmem:[%s8622_s20 + $0x48c] sm:$0xf] }
  0x71   : > { %2935 = vmatpush.bf16.msra.mxu2 %v6581_v61  ;;  %v6729_v61 = vor.u32 %v8196_v52, %v6726_v53  ;;  %v6198_v28 = vld [vmem:[%s8622_s20 + $0x4b8] sm:$0xf0]  ;;  %v8160_v29 = vld [vmem:[%s8622_s20 + $0x78c] sm:$0xf] }
  0x72   : > { %2948 = vmatpush.bf16.msra.mxu3 %v6965_v1  ;;  %v7113_v1 = vor.u32 %v8292_v56, %v7110_v57  ;;  %v6582_v30 = vld [vmem:[%s8622_s20 + $0x7b8] sm:$0xf0]  ;;  %v8256_v33 = vld [vmem:[%s8622_s20 + $0xa8c] sm:$0xf]  ;;  %v6201_v36 = vor.u32 %v8064_v26, %v6198_v28  ;;  %v6732_v26 = vld [vmem:[%s8622_s20 + $0x8b0] sm:$0xf] }
  0x73   : > { %2910 = vmatpush.bf16.msra.mxu0 %v5765_v7  ;;  %v5913_v7 = vor.u32 %v7992_v62, %v5910_v63  ;;  %v6966_v34 = vld [vmem:[%s8622_s20 + $0xab8] sm:$0xf0]  ;;  %v6585_v37 = vor.u32 %v8160_v29, %v6582_v30  ;;  %v8052_v40 = vld [vmem:[%s8622_s20 + $0x42c] sm:$0xf]  ;;  %v7116_v30 = vld [vmem:[%s8622_s20 + $0xbb0] sm:$0xf] }
  0x74   : > { %2923 = vmatpush.bf16.msra.mxu1 %v6149_v8  ;;  %v6297_v8 = vor.u32 %v8088_v0, %v6294_v2  ;;  %v6969_v41 = vor.u32 %v8256_v33, %v6966_v34  ;;  %v6150_v42 = vld [vmem:[%s8622_s20 + $0x458] sm:$0xf0]  ;;  %v8244_v45 = vld [vmem:[%s8622_s20 + $0xa2c] sm:$0xf]  ;;  %v8299_v33 = vld [vmem:[%s8622_s20 + $0xbdc] sm:$0xf0] }
  0x75   : > { %2936 = vmatpush.bf16.msra.mxu2 %v6533_v9  ;;  %v6681_v9 = vor.u32 %v8184_v3, %v6678_v4  ;;  %v6534_v44 = vld [vmem:[%s8622_s20 + $0x758] sm:$0xf0]  ;;  %v6153_v48 = vor.u32 %v8052_v40, %v6150_v42  ;;  %v8040_v52 = vld [vmem:[%s8622_s20 + $0x3cc] sm:$0xf]  ;;  %v6300_v40 = vld [vmem:[%s8622_s20 + $0x550] sm:$0xf] }
  0x76   : > { %2949 = vmatpush.bf16.msra.mxu3 %v6917_v13  ;;  %v7065_v13 = vor.u32 %v8280_v5, %v7062_v6  ;;  %v6918_v46 = vld [vmem:[%s8622_s20 + $0xa58] sm:$0xf0]  ;;  %v8232_v57 = vld [vmem:[%s8622_s20 + $0x9cc] sm:$0xf]  ;;  %v8095_v42 = vld [vmem:[%s8622_s20 + $0x57c] sm:$0xf0] }
  0x77   : > { %2911 = vmatpush.bf16.msra.mxu0 %v5717_v21  ;;  %v5865_v21 = vor.u32 %v7980_v10, %v5862_v11  ;;  %v5718_v51 = vld [vmem:[%s8622_s20 + $0xf8] sm:$0xf0]  ;;  %v6921_v53 = vor.u32 %v8244_v45, %v6918_v46  ;;  %v7932_v62 = vld [vmem:[%s8622_s20 + $0x6c] sm:$0xf]  ;;  %v7068_v45 = vld [vmem:[%s8622_s20 + $0xb50] sm:$0xf] }
  0x78   : > { %2924 = vmatpush.bf16.msra.mxu1 %v6101_v22  ;;  %v6249_v22 = vor.u32 %v8076_v12, %v6246_v14  ;;  %v6486_v56 = vld [vmem:[%s8622_s20 + $0x6f8] sm:$0xf0]  ;;  %v8028_v0 = vld [vmem:[%s8622_s20 + $0x36c] sm:$0xf]  ;;  %v8287_v46 = vld [vmem:[%s8622_s20 + $0xb7c] sm:$0xf0] }
  0x79   : > { %2937 = vmatpush.bf16.msra.mxu2 %v6485_v23  ;;  %v6633_v23 = vor.u32 %v8172_v15, %v6630_v18  ;;  %v5670_v63 = vld [vmem:[%s8622_s20 + $0x98] sm:$0xf0]  ;;  %v8124_v3 = vld [vmem:[%s8622_s20 + $0x66c] sm:$0xf] }
  0x7a   : > { %2950 = vmatpush.bf16.msra.mxu3 %v6869_v27  ;;  %v7017_v27 = vor.u32 %v8268_v19, %v7014_v20  ;;  %v6054_v2 = vld [vmem:[%s8622_s20 + $0x398] sm:$0xf0]  ;;  %v8220_v5 = vld [vmem:[%s8622_s20 + $0x96c] sm:$0xf] }
  0x7b   : > { %2912 = vmatpush.bf16.msra.mxu0 %v5669_v35  ;;  %v5817_v35 = vor.u32 %v7968_v24, %v5814_v25  ;;  %v6438_v4 = vld [vmem:[%s8622_s20 + $0x698] sm:$0xf0]  ;;  %v6057_v10 = vor.u32 %v8028_v0, %v6054_v2  ;;  %v8016_v12 = vld [vmem:[%s8622_s20 + $0x30c] sm:$0xf]  ;;  %v8107_v25 = vld [vmem:[%s8622_s20 + $0x5dc] sm:$0xf0] }
  0x7c   : > { %2925 = vmatpush.bf16.msra.mxu1 %v6053_v38  ;;  %v7956_v38 = vld [vmem:[%s8622_s20 + $0x12c] sm:$0xf]  ;;  %v6822_v6 = vld [vmem:[%s8622_s20 + $0x998] sm:$0xf0]  ;;  %v6441_v11 = vor.u32 %v8124_v3, %v6438_v4  ;;  %v6204_v0 = vld [vmem:[%s8622_s20 + $0x490] sm:$0xf] }
  0x7d   : > { %2938 = vmatpush.bf16.msra.mxu2 %v6437_v39  ;;  %v5766_v39 = vld [vmem:[%s8622_s20 + $0x158] sm:$0xf0]  ;;  %v8112_v14 = vld [vmem:[%s8622_s20 + $0x60c] sm:$0xf]  ;;  %v6825_v15 = vor.u32 %v8220_v5, %v6822_v6  ;;  %v8071_v2 = vld [vmem:[%s8622_s20 + $0x4bc] sm:$0xf0] }
  0x7e   : > { %2951 = vmatpush.bf16.msra.mxu3 %v6821_v43  ;;  %v8148_v43 = vld [vmem:[%s8622_s20 + $0x72c] sm:$0xf]  ;;  %v5769_v47 = vor.u32 %v7956_v38, %v5766_v39  ;;  %v6390_v18 = vld [vmem:[%s8622_s20 + $0x638] sm:$0xf0]  ;;  %v5916_v38 = vld [vmem:[%s8622_s20 + $0x250] sm:$0xf] }
  0x7f   : > { %2913 = vmatpush.bf16.msra.mxu0 %v5621_v50  ;;  %v6537_v49 = vor.u32 %v8148_v43, %v6534_v44  ;;  %v7944_v50 = vld [vmem:[%s8622_s20 + $0xcc] sm:$0xf]  ;;  %v6774_v20 = vld [vmem:[%s8622_s20 + $0x938] sm:$0xf0]  ;;  %v6393_v29 = vor.u32 %v8112_v14, %v6390_v18  ;;  %v7999_v39 = vld [vmem:[%s8622_s20 + $0x27c] sm:$0xf0] }
  0x80   : > { %2926 = vmatpush.bf16.msra.mxu1 %v6005_v54  ;;  %v6102_v54 = vld [vmem:[%s8622_s20 + $0x3f8] sm:$0xf0]  ;;  %v8208_v19 = vld [vmem:[%s8622_s20 + $0x90c] sm:$0xf]  ;;  %v6684_v43 = vld [vmem:[%s8622_s20 + $0x850] sm:$0xf] }
  0x81   : > { %2939 = vmatpush.bf16.msra.mxu2 %v6389_v55  ;;  %v8136_v55 = vld [vmem:[%s8622_s20 + $0x6cc] sm:$0xf]  ;;  %v6777_v34 = vor.u32 %v8208_v19, %v6774_v20  ;;  %v8191_v44 = vld [vmem:[%s8622_s20 + $0x87c] sm:$0xf0]  ;;  %v6588_v3 = vld [vmem:[%s8622_s20 + $0x790] sm:$0xf] }
  0x82   : > { %2952 = vmatpush.bf16.msra.mxu3 %v6773_v58  ;;  %2914 = vmatmul.bf16.vlgmr.msra.gmra.mxu0 %v8734_v31  ;;  %v6870_v58 = vld [vmem:[%s8622_s20 + $0x9f8] sm:$0xf0]  ;;  %v8167_v4 = vld [vmem:[%s8622_s20 + $0x7bc] sm:$0xf0]  ;;  %v6972_v5 = vld [vmem:[%s8622_s20 + $0xa90] sm:$0xf] }
  0x83   : > { %2958 = vmatpush.bf16.msrb.mxu0 %v5961_v59  ;;  %2927 = vmatmul.bf16.vlgmr.msra.gmra.mxu1 %v8736_v32  ;;  %v5721_v59 = vor.u32 %v7944_v50, %v5718_v51  ;;  %v5868_v50 = vld [vmem:[%s8622_s20 + $0x1f0] sm:$0xf]  ;;  %v7987_v51 = vld [vmem:[%s8622_s20 + $0x21c] sm:$0xf0] }
  0x84   : > { %2971 = vmatpush.bf16.msrb.mxu1 %v6345_v60  ;;  %2940 = vmatmul.bf16.vlgmr.msra.gmra.mxu2 %v8722_v16  ;;  %v6105_v60 = vor.u32 %v8040_v52, %v6102_v54  ;;  %v6252_v52 = vld [vmem:[%s8622_s20 + $0x4f0] sm:$0xf]  ;;  %v8083_v54 = vld [vmem:[%s8622_s20 + $0x51c] sm:$0xf0] }
  0x85   : > { %2984 = vmatpush.bf16.msrb.mxu2 %v6729_v61  ;;  %2953 = vmatmul.bf16.vlgmr.msra.gmra.mxu3 %v8724_v17  ;;  %v6489_v61 = vor.u32 %v8136_v55, %v6486_v56  ;;  %v6636_v55 = vld [vmem:[%s8622_s20 + $0x7f0] sm:$0xf]  ;;  %v8179_v56 = vld [vmem:[%s8622_s20 + $0x81c] sm:$0xf0] }
  0x86   : > { %2997 = vmatpush.bf16.msrb.mxu3 %v7113_v1  ;;  %v6873_v1 = vor.u32 %v8232_v57, %v6870_v58  ;;  %v7020_v57 = vld [vmem:[%s8622_s20 + $0xaf0] sm:$0xf]  ;;  %v8275_v58 = vld [vmem:[%s8622_s20 + $0xb1c] sm:$0xf0] }
  0x87   : > { %2959 = vmatpush.bf16.msrb.mxu0 %v5913_v7  ;;  %v5673_v7 = vor.u32 %v7932_v62, %v5670_v63  ;;  %v5820_v62 = vld [vmem:[%s8622_s20 + $0x190] sm:$0xf]  ;;  %v7975_v63 = vld [vmem:[%s8622_s20 + $0x1bc] sm:$0xf0] }
  0x88   : > { %2972 = vmatpush.bf16.msrb.mxu1 %v6297_v8  ;;  %v7920_v8 = vld [vmem:[%s8622_s20 + $0xc] sm:$0xf]  ;;  %v8263_v6 = vld [vmem:[%s8622_s20 + $0xabc] sm:$0xf0]  ;;  %v6924_v19 = vld [vmem:[%s8622_s20 + $0xa30] sm:$0xf] }
  0x89   : > { %2985 = vmatpush.bf16.msrb.mxu2 %v6681_v9  ;;  %v5622_v9 = vld [vmem:[%s8622_s20 + $0x38] sm:$0xf0]  ;;  %v8059_v14 = vld [vmem:[%s8622_s20 + $0x45c] sm:$0xf0] }
  0x8a   : > { %2998 = vmatpush.bf16.msrb.mxu3 %v7065_v13  ;;  %v6006_v13 = vld [vmem:[%s8622_s20 + $0x338] sm:$0xf0]  ;;  %v5625_v24 = vor.u32 %v7920_v8, %v5622_v9  ;;  %v6205_v8 = vor.u32 %v8071_v2, %v6204_v0  ;;  %v6589_v9 = vor.u32 %v8167_v4, %v6588_v3  ;;  %v8155_v18 = vld [vmem:[%s8622_s20 + $0x75c] sm:$0xf0]  ;;  %v8197_v0 = vld [vmem:[%s8622_s20 + $0x8b4] sm:$0xf] }
  0x8b   : > { %2960 = vmatpush.bf16.msrb.mxu0 %v5865_v21  ;;  %v5964_v21 = vld [vmem:[%s8622_s20 + $0x2b0] sm:$0xf]  ;;  %v6009_v28 = vor.u32 %v8016_v12, %v6006_v13  ;;  %v6973_v13 = vor.u32 %v8263_v6, %v6972_v5  ;;  %v8251_v20 = vld [vmem:[%s8622_s20 + $0xa5c] sm:$0xf0]  ;;  %v8293_v4 = vld [vmem:[%s8622_s20 + $0xbb4] sm:$0xf] }
  0x8c   : > { %2973 = vmatpush.bf16.msrb.mxu1 %v6249_v22  ;;  %v8011_v22 = vld [vmem:[%s8622_s20 + $0x2dc] sm:$0xf0]  ;;  %v6156_v12 = vld [vmem:[%s8622_s20 + $0x430] sm:$0xf]  ;;  %v7118_v5 = vld [vmem:[%s8622_s20 + $0xbe0] sm:$0xf0] }
  0x8d   : > { %2986 = vmatpush.bf16.msrb.mxu2 %v6633_v23  ;;  %v6348_v23 = vld [vmem:[%s8622_s20 + $0x5b0] sm:$0xf] }
  0x8e   : > { %2999 = vmatpush.bf16.msrb.mxu3 %v7017_v27  ;;  %v8203_v27 = vld [vmem:[%s8622_s20 + $0x8dc] sm:$0xf0] }
  0x8f   : > { %2961 = vmatpush.bf16.msrb.mxu0 %v5817_v35  ;;  %v5965_v35 = vor.u32 %v8011_v22, %v5964_v21  ;;  %v6157_v22 = vor.u32 %v8059_v14, %v6156_v12  ;;  %v8089_v12 = vld [vmem:[%s8622_s20 + $0x554] sm:$0xf]  ;;  %v6302_v14 = vld [vmem:[%s8622_s20 + $0x580] sm:$0xf0] }
  0x90   : > { %2974 = vmatpush.bf16.msrb.mxu1 %v6201_v36  ;;  %v6349_v36 = vor.u32 %v8107_v25, %v6348_v23  ;;  %v7951_v25 = vld [vmem:[%s8622_s20 + $0xfc] sm:$0xf0] }
  0x91   : > { %2987 = vmatpush.bf16.msrb.mxu2 %v6585_v37  ;;  %v6733_v37 = vor.u32 %v8203_v27, %v6732_v26  ;;  %v6108_v26 = vld [vmem:[%s8622_s20 + $0x3d0] sm:$0xf]  ;;  %v6925_v27 = vor.u32 %v8251_v20, %v6924_v19  ;;  %v8281_v19 = vld [vmem:[%s8622_s20 + $0xb54] sm:$0xf]  ;;  %v7070_v20 = vld [vmem:[%s8622_s20 + $0xb80] sm:$0xf0] }
  0x92   : > { %3000 = vmatpush.bf16.msrb.mxu3 %v6969_v41  ;;  %v7117_v41 = vor.u32 %v8299_v33, %v7116_v30  ;;  %v8143_v30 = vld [vmem:[%s8622_s20 + $0x6fc] sm:$0xf0]  ;;  %v6876_v33 = vld [vmem:[%s8622_s20 + $0x9d0] sm:$0xf] }
  0x93   : > { %2962 = vmatpush.bf16.msrb.mxu0 %v5769_v47  ;;  %v5917_v47 = vor.u32 %v7999_v39, %v5916_v38  ;;  %v5676_v38 = vld [vmem:[%s8622_s20 + $0x70] sm:$0xf]  ;;  %v7939_v39 = vld [vmem:[%s8622_s20 + $0x9c] sm:$0xf0] }
  0x94   : > { %2975 = vmatpush.bf16.msrb.mxu1 %v6153_v48  ;;  %v6301_v48 = vor.u32 %v8095_v42, %v6300_v40  ;;  %v6060_v40 = vld [vmem:[%s8622_s20 + $0x370] sm:$0xf]  ;;  %v8035_v42 = vld [vmem:[%s8622_s20 + $0x39c] sm:$0xf0] }
  0x95   : > { %2988 = vmatpush.bf16.msrb.mxu2 %v6537_v49  ;;  %v6685_v49 = vor.u32 %v8191_v44, %v6684_v43  ;;  %v6444_v43 = vld [vmem:[%s8622_s20 + $0x670] sm:$0xf]  ;;  %v8131_v44 = vld [vmem:[%s8622_s20 + $0x69c] sm:$0xf0] }
  0x96   : > { %3001 = vmatpush.bf16.msrb.mxu3 %v6921_v53  ;;  %v7069_v53 = vor.u32 %v8287_v46, %v7068_v45  ;;  %v6828_v45 = vld [vmem:[%s8622_s20 + $0x970] sm:$0xf]  ;;  %v8227_v46 = vld [vmem:[%s8622_s20 + $0x99c] sm:$0xf0] }
  0x97   : > { %2963 = vmatpush.bf16.msrb.mxu0 %v5721_v59  ;;  %v5869_v59 = vor.u32 %v7987_v51, %v5868_v50  ;;  %v6061_v50 = vor.u32 %v8035_v42, %v6060_v40  ;;  %v6445_v51 = vor.u32 %v8131_v44, %v6444_v43  ;;  %v8065_v40 = vld [vmem:[%s8622_s20 + $0x494] sm:$0xf]  ;;  %v6206_v42 = vld [vmem:[%s8622_s20 + $0x4c0] sm:$0xf0] }
  0x98   : > { %2976 = vmatpush.bf16.msrb.mxu1 %v6105_v60  ;;  %v6253_v60 = vor.u32 %v8083_v54, %v6252_v52  ;;  %v6012_v52 = vld [vmem:[%s8622_s20 + $0x310] sm:$0xf]  ;;  %v8161_v43 = vld [vmem:[%s8622_s20 + $0x794] sm:$0xf]  ;;  %v6590_v44 = vld [vmem:[%s8622_s20 + $0x7c0] sm:$0xf0] }
  0x99   : > { %2989 = vmatpush.bf16.msrb.mxu2 %v6489_v61  ;;  %v6637_v61 = vor.u32 %v8179_v56, %v6636_v55  ;;  %v6396_v54 = vld [vmem:[%s8622_s20 + $0x610] sm:$0xf]  ;;  %v6829_v55 = vor.u32 %v8227_v46, %v6828_v45  ;;  %v8119_v56 = vld [vmem:[%s8622_s20 + $0x63c] sm:$0xf0]  ;;  %v8257_v45 = vld [vmem:[%s8622_s20 + $0xa94] sm:$0xf] }
  0x9a   : > { %3002 = vmatpush.bf16.msrb.mxu3 %v6873_v1  ;;  %v7021_v1 = vor.u32 %v8275_v58, %v7020_v57  ;;  %v6780_v57 = vld [vmem:[%s8622_s20 + $0x910] sm:$0xf]  ;;  %v8215_v58 = vld [vmem:[%s8622_s20 + $0x93c] sm:$0xf0]  ;;  %v6397_v3 = vor.u32 %v8119_v56, %v6396_v54  ;;  %v6974_v46 = vld [vmem:[%s8622_s20 + $0xac0] sm:$0xf0] }
  0x9b   : > { %2964 = vmatpush.bf16.msrb.mxu0 %v5673_v7  ;;  %v5821_v7 = vor.u32 %v7975_v63, %v5820_v62  ;;  %v6350_v63 = vld [vmem:[%s8622_s20 + $0x5e0] sm:$0xf0]  ;;  %v6781_v6 = vor.u32 %v8215_v58, %v6780_v57  ;;  %v8245_v57 = vld [vmem:[%s8622_s20 + $0xa34] sm:$0xf] }
  0x9c   : > { %2977 = vmatpush.bf16.msrb.mxu1 %v6057_v10  ;;  %v5772_v10 = vld [vmem:[%s8622_s20 + $0x130] sm:$0xf]  ;;  %v6158_v54 = vld [vmem:[%s8622_s20 + $0x460] sm:$0xf0] }
  0x9d   : > { %2990 = vmatpush.bf16.msrb.mxu2 %v6441_v11  ;;  %v7963_v11 = vld [vmem:[%s8622_s20 + $0x15c] sm:$0xf0]  ;;  %v6542_v56 = vld [vmem:[%s8622_s20 + $0x760] sm:$0xf0] }
  0x9e   : > { %3003 = vmatpush.bf16.msrb.mxu3 %v6825_v15  ;;  %v6540_v15 = vld [vmem:[%s8622_s20 + $0x730] sm:$0xf]  ;;  %v5773_v21 = vor.u32 %v7963_v11, %v5772_v10  ;;  %v7993_v10 = vld [vmem:[%s8622_s20 + $0x254] sm:$0xf]  ;;  %v5918_v11 = vld [vmem:[%s8622_s20 + $0x280] sm:$0xf0] }
  0x9f   : > { %2965 = vmatpush.bf16.msrb.mxu0 %v5625_v24  ;;  %v6541_v23 = vor.u32 %v8155_v18, %v6540_v15  ;;  %v5724_v24 = vld [vmem:[%s8622_s20 + $0xd0] sm:$0xf]  ;;  %v8185_v15 = vld [vmem:[%s8622_s20 + $0x854] sm:$0xf]  ;;  %v6686_v18 = vld [vmem:[%s8622_s20 + $0x880] sm:$0xf0] }
  0xa0   : > { %2978 = vmatpush.bf16.msrb.mxu1 %v6009_v28  ;;  %v8047_v28 = vld [vmem:[%s8622_s20 + $0x3fc] sm:$0xf0]  ;;  %v6926_v58 = vld [vmem:[%s8622_s20 + $0xa60] sm:$0xf0] }
  0xa1   : > { %2991 = vmatpush.bf16.msrb.mxu2 %v6393_v29  ;;  %v6492_v29 = vld [vmem:[%s8622_s20 + $0x6d0] sm:$0xf] }
  0xa2   : > { %3004 = vmatpush.bf16.msrb.mxu3 %v6777_v34  ;;  %2966 = vmatmul.bf16.vlgmr.msrb.gmra.mxu0 %v8734_v31  ;;  %v8239_v34 = vld [vmem:[%s8622_s20 + $0x9fc] sm:$0xf0] }
  0xa3   : > { %3010 = vmatpush.bf16.msra.mxu0 %v5965_v35  ;;  %2979 = vmatmul.bf16.vlgmr.msrb.gmra.mxu1 %v8736_v32  ;;  %v5725_v35 = vor.u32 %v7951_v25, %v5724_v24  ;;  %v7981_v24 = vld [vmem:[%s8622_s20 + $0x1f4] sm:$0xf]  ;;  %v5870_v25 = vld [vmem:[%s8622_s20 + $0x220] sm:$0xf0] }
  0xa4   : > { %3023 = vmatpush.bf16.msra.mxu1 %v6349_v36  ;;  %2992 = vmatmul.bf16.vlgmr.msrb.gmra.mxu2 %v8722_v16  ;;  %v6109_v36 = vor.u32 %v8047_v28, %v6108_v26  ;;  %v8077_v26 = vld [vmem:[%s8622_s20 + $0x4f4] sm:$0xf]  ;;  %v6254_v28 = vld [vmem:[%s8622_s20 + $0x520] sm:$0xf0] }
  0xa5   : > { %3036 = vmatpush.bf16.msra.mxu2 %v6733_v37  ;;  %3005 = vmatmul.bf16.vlgmr.msrb.gmra.mxu3 %v8724_v17  ;;  %v6493_v37 = vor.u32 %v8143_v30, %v6492_v29  ;;  %v8173_v29 = vld [vmem:[%s8622_s20 + $0x7f4] sm:$0xf]  ;;  %v6638_v30 = vld [vmem:[%s8622_s20 + $0x820] sm:$0xf0] }
  0xa6   : > { %3049 = vmatpush.bf16.msra.mxu3 %v7117_v41  ;;  %v6877_v41 = vor.u32 %v8239_v34, %v6876_v33  ;;  %v8269_v33 = vld [vmem:[%s8622_s20 + $0xaf4] sm:$0xf]  ;;  %v7022_v34 = vld [vmem:[%s8622_s20 + $0xb20] sm:$0xf0] }
  0xa7   : > { %3011 = vmatpush.bf16.msra.mxu0 %v5917_v47  ;;  %v5677_v47 = vor.u32 %v7939_v39, %v5676_v38  ;;  %v7969_v38 = vld [vmem:[%s8622_s20 + $0x194] sm:$0xf]  ;;  %v5822_v39 = vld [vmem:[%s8622_s20 + $0x1c0] sm:$0xf0] }
  0xa8   : > { %3024 = vmatpush.bf16.msra.mxu1 %v6301_v48  ;;  %v5628_v48 = vld [vmem:[%s8622_s20 + $0x10] sm:$0xf] }
  0xa9   : > { %3037 = vmatpush.bf16.msra.mxu2 %v6685_v49  ;;  %v7927_v49 = vld [vmem:[%s8622_s20 + $0x3c] sm:$0xf0] }
  0xaa   : > { %3050 = vmatpush.bf16.msra.mxu3 %v7069_v53  ;;  %v8023_v53 = vld [vmem:[%s8622_s20 + $0x33c] sm:$0xf0]  ;;  %v5629_v62 = vor.u32 %v7927_v49, %v5628_v48  ;;  %v6209_v48 = vor.u32 %v8065_v40, %v6206_v42  ;;  %v6593_v49 = vor.u32 %v8161_v43, %v6590_v44  ;;  %v8012_v42 = vld [vmem:[%s8622_s20 + $0x2e4] sm:$0xf0]  ;;  %v6356_v43 = vld [vmem:[%s8622_s20 + $0x5b8] sm:$0xf] }
  0xab   : > { %3012 = vmatpush.bf16.msra.mxu0 %v5869_v59  ;;  %v8005_v59 = vld [vmem:[%s8622_s20 + $0x2b4] sm:$0xf]  ;;  %v6013_v2 = vor.u32 %v8023_v53, %v6012_v52  ;;  %v6977_v53 = vor.u32 %v8257_v45, %v6974_v46  ;;  %v8108_v46 = vld [vmem:[%s8622_s20 + $0x5e4] sm:$0xf0] }
  0xac   : > { %3025 = vmatpush.bf16.msra.mxu1 %v6253_v60  ;;  %v5966_v60 = vld [vmem:[%s8622_s20 + $0x2e0] sm:$0xf0]  ;;  %v8053_v52 = vld [vmem:[%s8622_s20 + $0x434] sm:$0xf] }
  0xad   : > { %3038 = vmatpush.bf16.msra.mxu2 %v6637_v61  ;;  %v8101_v61 = vld [vmem:[%s8622_s20 + $0x5b4] sm:$0xf] }
  0xae   : > { %3051 = vmatpush.bf16.msra.mxu3 %v7021_v1  ;;  %v6734_v1 = vld [vmem:[%s8622_s20 + $0x8e0] sm:$0xf0]  ;;  %v470_v44 = vld [vmem:[#allocation2 + $0x30] sm:$0xff] }
  0xaf   : > { %3013 = vmatpush.bf16.msra.mxu0 %v5821_v7  ;;  %v5969_v7 = vor.u32 %v8005_v59, %v5966_v60  ;;  %v6161_v60 = vor.u32 %v8053_v52, %v6158_v54  ;;  %v7124_v52 = vld [vmem:[%s8622_s20 + $0xbb8] sm:$0xf] }
  0xb0   : > { %3026 = vmatpush.bf16.msra.mxu1 %v6205_v8  ;;  %v6353_v8 = vor.u32 %v8101_v61, %v6350_v63  ;;  %v5726_v63 = vld [vmem:[%s8622_s20 + $0x100] sm:$0xf0] }
  0xb1   : > { %3039 = vmatpush.bf16.msra.mxu2 %v6589_v9  ;;  %v6737_v9 = vor.u32 %v8197_v0, %v6734_v1  ;;  %v8041_v0 = vld [vmem:[%s8622_s20 + $0x3d4] sm:$0xf]  ;;  %v6929_v1 = vor.u32 %v8245_v57, %v6926_v58  ;;  %v5924_v57 = vld [vmem:[%s8622_s20 + $0x258] sm:$0xf] }
  0xb2   : > { %3052 = vmatpush.bf16.msra.mxu3 %v6973_v13  ;;  %v7121_v13 = vor.u32 %v8293_v4, %v7118_v5  ;;  %v6494_v4 = vld [vmem:[%s8622_s20 + $0x700] sm:$0xf0]  ;;  %v8233_v5 = vld [vmem:[%s8622_s20 + $0x9d4] sm:$0xf] }
  0xb3   : > { %3014 = vmatpush.bf16.msra.mxu0 %v5773_v21  ;;  %v5921_v21 = vor.u32 %v7993_v10, %v5918_v11  ;;  %v7933_v10 = vld [vmem:[%s8622_s20 + $0x74] sm:$0xf]  ;;  %v5678_v11 = vld [vmem:[%s8622_s20 + $0xa0] sm:$0xf0] }
  0xb4   : > { %3027 = vmatpush.bf16.msra.mxu1 %v6157_v22  ;;  %v6305_v22 = vor.u32 %v8089_v12, %v6302_v14  ;;  %v8029_v12 = vld [vmem:[%s8622_s20 + $0x374] sm:$0xf] }
  0xb5   : > { %3040 = vmatpush.bf16.msra.mxu2 %v6541_v23  ;;  %v6689_v23 = vor.u32 %v8185_v15, %v6686_v18  ;;  %v6062_v15 = vld [vmem:[%s8622_s20 + $0x3a0] sm:$0xf0]  ;;  %v8125_v18 = vld [vmem:[%s8622_s20 + $0x674] sm:$0xf] }
  0xb6   : > { %3053 = vmatpush.bf16.msra.mxu3 %v6925_v27  ;;  %v7073_v27 = vor.u32 %v8281_v19, %v7070_v20  ;;  %v6446_v19 = vld [vmem:[%s8622_s20 + $0x6a0] sm:$0xf0]  ;;  %v8221_v20 = vld [vmem:[%s8622_s20 + $0x974] sm:$0xf] }
  0xb7   : > { %3015 = vmatpush.bf16.msra.mxu0 %v5725_v35  ;;  %v5873_v35 = vor.u32 %v7981_v24, %v5870_v25  ;;  %v7921_v24 = vld [vmem:[%s8622_s20 + $0x14] sm:$0xf]  ;;  %v5630_v25 = vld [vmem:[%s8622_s20 + $0x40] sm:$0xf0] }
  0xb8   : > { %3028 = vmatpush.bf16.msra.mxu1 %v6109_v36  ;;  %v6257_v36 = vor.u32 %v8077_v26, %v6254_v28  ;;  %v8017_v26 = vld [vmem:[%s8622_s20 + $0x314] sm:$0xf]  ;;  %v6065_v28 = vor.u32 %v8029_v12, %v6062_v15  ;;  %v5633_v45 = vor.u32 %v7921_v24, %v5630_v25  ;;  %v7988_v12 = vld [vmem:[%s8622_s20 + $0x224] sm:$0xf0]  ;;  %v5828_v25 = vld [vmem:[%s8622_s20 + $0x198] sm:$0xf] }
  0xb9   : > { %3041 = vmatpush.bf16.msra.mxu2 %v6493_v37  ;;  %v6641_v37 = vor.u32 %v8173_v29, %v6638_v30  ;;  %v6449_v29 = vor.u32 %v8125_v18, %v6446_v19  ;;  %v6014_v30 = vld [vmem:[%s8622_s20 + $0x340] sm:$0xf0]  ;;  %v8084_v15 = vld [vmem:[%s8622_s20 + $0x524] sm:$0xf0]  ;;  %v6644_v18 = vld [vmem:[%s8622_s20 + $0x7f8] sm:$0xf] }
  0xba   : > { %3054 = vmatpush.bf16.msra.mxu3 %v6877_v41  ;;  %v7025_v41 = vor.u32 %v8269_v33, %v7022_v34  ;;  %v8113_v33 = vld [vmem:[%s8622_s20 + $0x614] sm:$0xf]  ;;  %v6398_v34 = vld [vmem:[%s8622_s20 + $0x640] sm:$0xf0]  ;;  %v8180_v19 = vld [vmem:[%s8622_s20 + $0x824] sm:$0xf0] }
  0xbb   : > { %3016 = vmatpush.bf16.msra.mxu0 %v5677_v47  ;;  %v5825_v47 = vor.u32 %v7969_v38, %v5822_v39  ;;  %v6782_v38 = vld [vmem:[%s8622_s20 + $0x940] sm:$0xf0]  ;;  %v5972_v39 = vld [vmem:[%s8622_s20 + $0x2b8] sm:$0xf]  ;;  %v6645_v24 = vor.u32 %v8180_v19, %v6644_v18 }
  0xbc   : > { %3029 = vmatpush.bf16.msra.mxu1 %v6061_v50  ;;  %v7957_v50 = vld [vmem:[%s8622_s20 + $0x134] sm:$0xf]  ;;  %v6836_v19 = vld [vmem:[%s8622_s20 + $0x978] sm:$0xf] }
  0xbd   : > { %3042 = vmatpush.bf16.msra.mxu2 %v6445_v51  ;;  %v5774_v51 = vld [vmem:[%s8622_s20 + $0x160] sm:$0xf0] }
  0xbe   : > { %3055 = vmatpush.bf16.msra.mxu3 %v6829_v55  ;;  %v8149_v55 = vld [vmem:[%s8622_s20 + $0x734] sm:$0xf]  ;;  %v5777_v59 = vor.u32 %v7957_v50, %v5774_v51  ;;  %v6017_v50 = vor.u32 %v8017_v26, %v6014_v30  ;;  %v6401_v51 = vor.u32 %v8113_v33, %v6398_v34  ;;  %v7976_v26 = vld [vmem:[%s8622_s20 + $0x1c4] sm:$0xf0]  ;;  %v6596_v30 = vld [vmem:[%s8622_s20 + $0x798] sm:$0xf] }
  0xbf   : > { %3017 = vmatpush.bf16.msra.mxu0 %v5629_v62  ;;  %v6545_v61 = vor.u32 %v8149_v55, %v6542_v56  ;;  %v7945_v62 = vld [vmem:[%s8622_s20 + $0xd4] sm:$0xf]  ;;  %v5973_v56 = vor.u32 %v8012_v42, %v5972_v39  ;;  %v8168_v33 = vld [vmem:[%s8622_s20 + $0x7c4] sm:$0xf0]  ;;  %v6980_v34 = vld [vmem:[%s8622_s20 + $0xa98] sm:$0xf] }
  0xc0   : > { %3030 = vmatpush.bf16.msra.mxu1 %v6013_v2  ;;  %v6110_v2 = vld [vmem:[%s8622_s20 + $0x400] sm:$0xf0]  ;;  %v6597_v39 = vor.u32 %v8168_v33, %v6596_v30  ;;  %v6164_v42 = vld [vmem:[%s8622_s20 + $0x438] sm:$0xf]  ;;  %v8120_v33 = vld [vmem:[%s8622_s20 + $0x644] sm:$0xf0] }
  0xc1   : > { %3043 = vmatpush.bf16.msra.mxu2 %v6397_v3  ;;  %v8137_v3 = vld [vmem:[%s8622_s20 + $0x6d4] sm:$0xf] }
  0xc2   : > { %3056 = vmatpush.bf16.msra.mxu3 %v6781_v6  ;;  %3018 = vmatmul.bf16.vlgmr.msra.gmra.mxu0 %v8734_v31  ;;  %v6878_v6 = vld [vmem:[%s8622_s20 + $0xa00] sm:$0xf0] }
  0xc3   : > { %3062 = vmatpush.bf16.msrb.mxu0 %v5969_v7  ;;  %3031 = vmatmul.bf16.vlgmr.msra.gmra.mxu1 %v8736_v32  ;;  %v5729_v7 = vor.u32 %v7945_v62, %v5726_v63  ;;  %v6881_v14 = vor.u32 %v8233_v5, %v6878_v6  ;;  %v6308_v62 = vld [vmem:[%s8622_s20 + $0x558] sm:$0xf]  ;;  %v8096_v63 = vld [vmem:[%s8622_s20 + $0x584] sm:$0xf0] }
  0xc4   : > { %3075 = vmatpush.bf16.msrb.mxu1 %v6353_v8  ;;  %3044 = vmatmul.bf16.vlgmr.msra.gmra.mxu2 %v8722_v16  ;;  %v6113_v8 = vor.u32 %v8041_v0, %v6110_v2  ;;  %v6692_v2 = vld [vmem:[%s8622_s20 + $0x858] sm:$0xf]  ;;  %v8288_v5 = vld [vmem:[%s8622_s20 + $0xb84] sm:$0xf0] }
  0xc5   : > { %3088 = vmatpush.bf16.msrb.mxu2 %v6737_v9  ;;  %3057 = vmatmul.bf16.vlgmr.msra.gmra.mxu3 %v8724_v17  ;;  %v6497_v9 = vor.u32 %v8137_v3, %v6494_v4  ;;  %v8192_v3 = vld [vmem:[%s8622_s20 + $0x884] sm:$0xf0]  ;;  %v7076_v4 = vld [vmem:[%s8622_s20 + $0xb58] sm:$0xf] }
  0xc6   : > { %3101 = vmatpush.bf16.msrb.mxu3 %v7121_v13 }
  0xc7   : > { %3063 = vmatpush.bf16.msrb.mxu0 %v5921_v21  ;;  %v2824_v13 = vpop.f32.mrf.mxu1  ;;  %v6830_v21 = vld [vmem:[%s8622_s20 + $0x9a0] sm:$0xf0] }
  0xc8   : > { %3076 = vmatpush.bf16.msrb.mxu1 %v6305_v22 }
  0xc9   : > { %3089 = vmatpush.bf16.msrb.mxu2 %v6689_v23  ;;  %v2811_v22 = vpop.f32.mrf.mxu0  ;;  %v5681_v23 = vor.u32 %v7933_v10, %v5678_v11  ;;  %v6693_v10 = vor.u32 %v8192_v3, %v6692_v2  ;;  %v5876_v11 = vld [vmem:[%s8622_s20 + $0x1f8] sm:$0xf]  ;;  %v471_v2 = vld [vmem:[#allocation2] sm:$0xff] }
  0xca   : > { %3102 = vmatpush.bf16.msrb.mxu3 %v7073_v27  ;;  %v2825_v27 = vadd.f32 %v2824_v13, %v2811_v22  ;;  %v6260_v13 = vld [vmem:[%s8622_s20 + $0x4f8] sm:$0xf]  ;;  %v5877_v22 = vor.u32 %v7988_v12, %v5876_v11 }
  0xcb   : > { %3064 = vmatpush.bf16.msrb.mxu0 %v5873_v35  ;;  %v2837_v35 = vpop.f32.mrf.mxu2 }
  0xcc   : > { %3077 = vmatpush.bf16.msrb.mxu1 %v6257_v36  ;;  %v6833_v36 = vor.u32 %v8221_v20, %v6830_v21  ;;  %v2838_v40 = vadd.f32 %v2837_v35, %v2825_v27  ;;  %v7028_v20 = vld [vmem:[%s8622_s20 + $0xaf8] sm:$0xf]  ;;  %v8276_v21 = vld [vmem:[%s8622_s20 + $0xb24] sm:$0xf0] }
  0xcd   : > { %3090 = vmatpush.bf16.msrb.mxu2 %v6641_v37  ;;  %v8209_v37 = vld [vmem:[%s8622_s20 + $0x914] sm:$0xf]  ;;  %v6212_v27 = vld [vmem:[%s8622_s20 + $0x498] sm:$0xf]  ;;  %v8264_v35 = vld [vmem:[%s8622_s20 + $0xac4] sm:$0xf0] }
  0xce   : > { %3103 = vmatpush.bf16.msrb.mxu3 %v7025_v41  ;;  %v2850_v41 = vpop.f32.mrf.mxu3  ;;  %v6785_v55 = vor.u32 %v8209_v37, %v6782_v38 }
  0xcf   : > { %3065 = vmatpush.bf16.msrb.mxu0 %v5825_v47  ;;  %v6740_v47 = vld [vmem:[%s8622_s20 + $0x8b8] sm:$0xf]  ;;  %v2826_v54 = vpop.f32.mrf.mxu1 }
  0xd0   : > { %3078 = vmatpush.bf16.msrb.mxu1 %v6209_v48  ;;  %v8204_v48 = vld [vmem:[%s8622_s20 + $0x8e4] sm:$0xf0]  ;;  %v5732_v54 = vld [vmem:[%s8622_s20 + $0xd8] sm:$0xf] }
  0xd1   : > { %3091 = vmatpush.bf16.msrb.mxu2 %v6593_v49  ;;  %v2851_v49 = vadd.f32 %v2850_v41, %v2838_v40  ;;  %v2813_v0 = vpop.f32.mrf.mxu0  ;;  %v5780_v40 = vld [vmem:[%s8622_s20 + $0x138] sm:$0xf]  ;;  %v7964_v41 = vld [vmem:[%s8622_s20 + $0x164] sm:$0xf0] }
  0xd2   : > { %3104 = vmatpush.bf16.msrb.mxu3 %v6977_v53  ;;  %v8300_v53 = vld [vmem:[%s8622_s20 + $0xbe4] sm:$0xf0]  ;;  %v6884_v0 = vld [vmem:[%s8622_s20 + $0x9d8] sm:$0xf] }
  0xd3   : > { %3066 = vmatpush.bf16.msrb.mxu0 %v5777_v59  ;;  %v3426_v58 = vadd.f32 %v2851_v49, %v470_v44  ;;  %v6357_v59 = vor.u32 %v8108_v46, %v6356_v43  ;;  %v2839_v6 = vpop.f32.mrf.mxu2  ;;  %v6981_v44 = vor.u32 %v8264_v35, %v6980_v34  ;;  %v6548_v46 = vld [vmem:[%s8622_s20 + $0x738] sm:$0xf]  ;;  %v8216_v35 = vld [vmem:[%s8622_s20 + $0x944] sm:$0xf0] }
  0xd4   : > { %3079 = vmatpush.bf16.msrb.mxu1 %v6161_v60  ;;  %v6741_v60 = vor.u32 %v8204_v48, %v6740_v47  ;;  %v8156_v47 = vld [vmem:[%s8622_s20 + $0x764] sm:$0xf0]  ;;  %v6932_v49 = vld [vmem:[%s8622_s20 + $0xa38] sm:$0xf] }
  0xd5   : > { %3092 = vmatpush.bf16.msrb.mxu2 %v6545_v61  ;;  %v8000_v61 = vld [vmem:[%s8622_s20 + $0x284] sm:$0xf0]  ;;  %3438 = vst [vmem:[#allocation2 + $0x30] sm:$0xff] %v3426_v58  ;;  %v6788_v34 = vld [vmem:[%s8622_s20 + $0x918] sm:$0xf] }
  0xd6   : > { %3105 = vmatpush.bf16.msrb.mxu3 %v6929_v1  ;;  %v7125_v1 = vor.u32 %v8300_v53, %v7124_v52  ;;  %v6549_v53 = vor.u32 %v8156_v47, %v6548_v46  ;;  %v8294_v46 = vld [vmem:[%s8622_s20 + $0xbbc] sm:$0xf]  ;;  %v7126_v47 = vld [vmem:[%s8622_s20 + $0xbe8] sm:$0xf0] }
  0xd7   : > { %3067 = vmatpush.bf16.msrb.mxu0 %v5729_v7  ;;  %v5925_v7 = vor.u32 %v8000_v61, %v5924_v57  ;;  %v8144_v61 = vld [vmem:[%s8622_s20 + $0x704] sm:$0xf0] }
  0xd8   : > { %3080 = vmatpush.bf16.msrb.mxu1 %v6113_v8  ;;  %v2852_v8 = vpop.f32.mrf.mxu3 }
  0xd9   : > { %3093 = vmatpush.bf16.msrb.mxu2 %v6497_v9  ;;  %v6309_v9 = vor.u32 %v8096_v63, %v6308_v62  ;;  %v5684_v8 = vld [vmem:[%s8622_s20 + $0x78] sm:$0xf] }
  0xda   : > { %3106 = vmatpush.bf16.msrb.mxu3 %v6881_v14  ;;  %v7077_v14 = vor.u32 %v8288_v5, %v7076_v4 }
  0xdb   : > { %3068 = vmatpush.bf16.msrb.mxu0 %v5681_v23  ;;  %v6261_v23 = vor.u32 %v8084_v15, %v6260_v13  ;;  %v8036_v13 = vld [vmem:[%s8622_s20 + $0x3a4] sm:$0xf0] }
  0xdc   : > { %3081 = vmatpush.bf16.msrb.mxu1 %v6065_v28  ;;  %v7029_v28 = vor.u32 %v8276_v21, %v7028_v20  ;;  %v8132_v15 = vld [vmem:[%s8622_s20 + $0x6a4] sm:$0xf0] }
  0xdd   : > { %3094 = vmatpush.bf16.msrb.mxu2 %v6449_v29  ;;  %v8072_v29 = vld [vmem:[%s8622_s20 + $0x4c4] sm:$0xf0] }
  0xde   : > { %3107 = vmatpush.bf16.msrb.mxu3 %v6833_v36  ;;  %v5829_v36 = vor.u32 %v7976_v26, %v5828_v25  ;;  %v6213_v38 = vor.u32 %v8072_v29, %v6212_v27  ;;  %v8228_v20 = vld [vmem:[%s8622_s20 + $0x9a4] sm:$0xf0]  ;;  %v6020_v26 = vld [vmem:[%s8622_s20 + $0x318] sm:$0xf] }
  0xdf   : > { %3069 = vmatpush.bf16.msrb.mxu0 %v5633_v45  ;;  %v2863_v37 = vpop.f32.mrf.mxu0  ;;  %v8060_v45 = vld [vmem:[%s8622_s20 + $0x464] sm:$0xf0]  ;;  %v6837_v30 = vor.u32 %v8228_v20, %v6836_v19  ;;  %v8162_v19 = vld [vmem:[%s8622_s20 + $0x79c] sm:$0xf]  ;;  %v6598_v20 = vld [vmem:[%s8622_s20 + $0x7c8] sm:$0xf0] }
  0xe0   : > { %3082 = vmatpush.bf16.msrb.mxu1 %v6017_v50  ;;  %v2876_v43 = vpop.f32.mrf.mxu1  ;;  %v8252_v50 = vld [vmem:[%s8622_s20 + $0xa64] sm:$0xf0]  ;;  %v6165_v52 = vor.u32 %v8060_v45, %v6164_v42  ;;  %v8198_v42 = vld [vmem:[%s8622_s20 + $0x8bc] sm:$0xf] }
  0xe1   : > { %3095 = vmatpush.bf16.msrb.mxu2 %v6401_v51  ;;  %v2877_v48 = vadd.f32 %v2876_v43, %v2863_v37  ;;  %v5781_v51 = vor.u32 %v7964_v41, %v5780_v40  ;;  %v6933_v58 = vor.u32 %v8252_v50, %v6932_v49  ;;  %v8024_v27 = vld [vmem:[%s8622_s20 + $0x344] sm:$0xf0]  ;;  %v8006_v37 = vld [vmem:[%s8622_s20 + $0x2bc] sm:$0xf]  ;;  %v6358_v41 = vld [vmem:[%s8622_s20 + $0x5e8] sm:$0xf0] }
  0xe2   : > { %3108 = vmatpush.bf16.msrb.mxu3 %v6785_v55  ;;  %3070 = vmatmul.bf16.vlgmr.msrb.gmra.mxu0 %v8734_v31  ;;  %v7952_v55 = vld [vmem:[%s8622_s20 + $0x104] sm:$0xf0]  ;;  %v6742_v43 = vld [vmem:[%s8622_s20 + $0x8e8] sm:$0xf0] }
  0xe3   : > { %3114 = vmatpush.bf16.msra.mxu0 %v5973_v56  ;;  %3083 = vmatmul.bf16.vlgmr.msrb.gmra.mxu1 %v8736_v32  ;;  %v6116_v56 = vld [vmem:[%s8622_s20 + $0x3d8] sm:$0xf]  ;;  %v5733_v3 = vor.u32 %v7952_v55, %v5732_v54  ;;  %v8090_v54 = vld [vmem:[%s8622_s20 + $0x55c] sm:$0xf]  ;;  %v7129_v55 = vor.u32 %v8294_v46, %v7126_v47 }
  0xe4   : > { %3127 = vmatpush.bf16.msra.mxu1 %v6357_v59  ;;  %3096 = vmatmul.bf16.vlgmr.msrb.gmra.mxu2 %v8722_v16  ;;  %v8048_v59 = vld [vmem:[%s8622_s20 + $0x404] sm:$0xf0] }
  0xe5   : > { %3140 = vmatpush.bf16.msra.mxu2 %v6741_v60  ;;  %3109 = vmatmul.bf16.vlgmr.msrb.gmra.mxu3 %v8724_v17  ;;  %v6500_v60 = vld [vmem:[%s8622_s20 + $0x6d8] sm:$0xf]  ;;  %v6117_v6 = vor.u32 %v8048_v59, %v6116_v56  ;;  %v6310_v56 = vld [vmem:[%s8622_s20 + $0x588] sm:$0xf0]  ;;  %v8282_v59 = vld [vmem:[%s8622_s20 + $0xb5c] sm:$0xf] }
  0xe6   : > { %3153 = vmatpush.bf16.msra.mxu3 %v7125_v1  ;;  %v8240_v1 = vld [vmem:[%s8622_s20 + $0xa04] sm:$0xf0] }
  0xe7   : > { %3115 = vmatpush.bf16.msra.mxu0 %v5925_v7  ;;  %v2889_v57 = vpop.f32.mrf.mxu2  ;;  %v2865_v5 = vpop.f32.mrf.mxu0  ;;  %v6501_v7 = vor.u32 %v8144_v61, %v6500_v60  ;;  %v6885_v12 = vor.u32 %v8240_v1, %v6884_v0  ;;  %v7078_v60 = vld [vmem:[%s8622_s20 + $0xb88] sm:$0xf0]  ;;  %v7982_v0 = vld [vmem:[%s8622_s20 + $0x1fc] sm:$0xf] }
  0xe8   : > { %3128 = vmatpush.bf16.msra.mxu1 %v6309_v9  ;;  %v2890_v62 = vadd.f32 %v2889_v57, %v2877_v48  ;;  %v2902_v63 = vpop.f32.mrf.mxu3  ;;  %v7940_v9 = vld [vmem:[%s8622_s20 + $0xa4] sm:$0xf0]  ;;  %v2878_v11 = vpop.f32.mrf.mxu1  ;;  %v6789_v48 = vor.u32 %v8216_v35, %v6788_v34  ;;  %v8186_v57 = vld [vmem:[%s8622_s20 + $0x85c] sm:$0xf]  ;;  %v5878_v1 = vld [vmem:[%s8622_s20 + $0x228] sm:$0xf0] }
  0xe9   : > { %3141 = vmatpush.bf16.msra.mxu2 %v6693_v10  ;;  %v6068_v10 = vld [vmem:[%s8622_s20 + $0x378] sm:$0xf]  ;;  %v5685_v21 = vor.u32 %v7940_v9, %v5684_v8  ;;  %v8174_v5 = vld [vmem:[%s8622_s20 + $0x7fc] sm:$0xf]  ;;  %v7030_v8 = vld [vmem:[%s8622_s20 + $0xb28] sm:$0xf0]  ;;  %v5881_v9 = vor.u32 %v7982_v0, %v5878_v1 }
  0xea   : > { %3154 = vmatpush.bf16.msra.mxu3 %v7077_v14  ;;  %v2903_v4 = vadd.f32 %v2902_v63, %v2890_v62  ;;  %v6452_v14 = vld [vmem:[%s8622_s20 + $0x678] sm:$0xf]  ;;  %v6313_v62 = vor.u32 %v8090_v54, %v6310_v56  ;;  %v6166_v34 = vld [vmem:[%s8622_s20 + $0x468] sm:$0xf0]  ;;  %v8150_v35 = vld [vmem:[%s8622_s20 + $0x73c] sm:$0xf] }
  0xeb   : > { %3116 = vmatpush.bf16.msra.mxu0 %v5877_v22  ;;  %v5636_v22 = vld [vmem:[%s8622_s20 + $0x18] sm:$0xf]  ;;  %v6453_v25 = vor.u32 %v8132_v15, %v6452_v14  ;;  %v8066_v14 = vld [vmem:[%s8622_s20 + $0x49c] sm:$0xf]  ;;  %v6886_v54 = vld [vmem:[%s8622_s20 + $0xa08] sm:$0xf0] }
  0xec   : > { %3129 = vmatpush.bf16.msra.mxu1 %v6261_v23  ;;  %v3427_v18 = vadd.f32 %v2903_v4, %v471_v2  ;;  %v7928_v23 = vld [vmem:[%s8622_s20 + $0x44] sm:$0xf0]  ;;  %v8078_v2 = vld [vmem:[%s8622_s20 + $0x4fc] sm:$0xf]  ;;  %v6262_v4 = vld [vmem:[%s8622_s20 + $0x528] sm:$0xf0] }
  0xed   : > { %3142 = vmatpush.bf16.msra.mxu2 %v6645_v24  ;;  %v6069_v24 = vor.u32 %v8036_v13, %v6068_v10  ;;  %v5637_v40 = vor.u32 %v7928_v23, %v5636_v22  ;;  %v6265_v10 = vor.u32 %v8078_v2, %v6262_v4  ;;  %v5830_v13 = vld [vmem:[%s8622_s20 + $0x1c8] sm:$0xf0] }
  0xee   : > { %3155 = vmatpush.bf16.msra.mxu3 %v7029_v28  ;;  %3439 = vst [vmem:[#allocation2] sm:$0xff] %v3427_v18  ;;  %v6404_v28 = vld [vmem:[%s8622_s20 + $0x618] sm:$0xf]  ;;  %v6214_v18 = vld [vmem:[%s8622_s20 + $0x4c8] sm:$0xf0] }
  0xef   : > { %3117 = vmatpush.bf16.msra.mxu0 %v5829_v36  ;;  %v2891_v29 = vpop.f32.mrf.mxu2  ;;  %v6405_v45 = vor.u32 %v8120_v33, %v6404_v28  ;;  %v6982_v22 = vld [vmem:[%s8622_s20 + $0xac8] sm:$0xf0] }
  0xf0   : > { %3130 = vmatpush.bf16.msra.mxu1 %v6213_v38  ;;  %v2904_v36 = vpop.f32.mrf.mxu3  ;;  %v5974_v38 = vld [vmem:[%s8622_s20 + $0x2e8] sm:$0xf0]  ;;  %v8054_v29 = vld [vmem:[%s8622_s20 + $0x43c] sm:$0xf] }
  0xf1   : > { %3143 = vmatpush.bf16.msra.mxu2 %v6597_v39  ;;  %v8102_v39 = vld [vmem:[%s8622_s20 + $0x5bc] sm:$0xf]  ;;  %v5977_v49 = vor.u32 %v8006_v37, %v5974_v38  ;;  %v5782_v28 = vld [vmem:[%s8622_s20 + $0x168] sm:$0xf0] }
  0xf2   : > { %3156 = vmatpush.bf16.msra.mxu3 %v6981_v44  ;;  %v6021_v44 = vor.u32 %v8024_v27, %v6020_v26  ;;  %v6361_v50 = vor.u32 %v8102_v39, %v6358_v41  ;;  %v6601_v26 = vor.u32 %v8162_v19, %v6598_v20  ;;  %v7958_v27 = vld [vmem:[%s8622_s20 + $0x13c] sm:$0xf]  ;;  %v6550_v36 = vld [vmem:[%s8622_s20 + $0x768] sm:$0xf0]  ;;  %v6169_v41 = vor.u32 %v8054_v29, %v6166_v34  ;;  %v6748_v29 = vld [vmem:[%s8622_s20 + $0x8c0] sm:$0xf] }
  0xf3   : > { %3118 = vmatpush.bf16.msra.mxu0 %v5781_v51  ;;  %v6745_v51 = vor.u32 %v8198_v42, %v6742_v43  ;;  %v8246_v38 = vld [vmem:[%s8622_s20 + $0xa3c] sm:$0xf]  ;;  %v6934_v39 = vld [vmem:[%s8622_s20 + $0xa68] sm:$0xf0]  ;;  %v6553_v42 = vor.u32 %v8150_v35, %v6550_v36  ;;  %v7132_v35 = vld [vmem:[%s8622_s20 + $0xbc0] sm:$0xf] }
  0xf4   : > { %3131 = vmatpush.bf16.msra.mxu1 %v6165_v52  ;;  %v7994_v52 = vld [vmem:[%s8622_s20 + $0x25c] sm:$0xf]  ;;  %v6937_v47 = vor.u32 %v8246_v38, %v6934_v39  ;;  %v6070_v2 = vld [vmem:[%s8622_s20 + $0x3a8] sm:$0xf0]  ;;  %v8301_v36 = vld [vmem:[%s8622_s20 + $0xbec] sm:$0xf0] }
  0xf5   : > { %3144 = vmatpush.bf16.msra.mxu2 %v6549_v53  ;;  %v5926_v53 = vld [vmem:[%s8622_s20 + $0x288] sm:$0xf0]  ;;  %v7946_v43 = vld [vmem:[%s8622_s20 + $0xdc] sm:$0xf] }
  0xf6   : > { %3157 = vmatpush.bf16.msra.mxu3 %v6933_v58  ;;  %v6694_v58 = vld [vmem:[%s8622_s20 + $0x888] sm:$0xf0]  ;;  %v5929_v61 = vor.u32 %v7994_v52, %v5926_v53  ;;  %v8234_v53 = vld [vmem:[%s8622_s20 + $0x9dc] sm:$0xf] }
  0xf7   : > { %3119 = vmatpush.bf16.msra.mxu0 %v5733_v3  ;;  %v6697_v63 = vor.u32 %v8186_v57, %v6694_v58  ;;  %v7081_v3 = vor.u32 %v8282_v59, %v7078_v60  ;;  %v6889_v1 = vor.u32 %v8234_v53, %v6886_v54  ;;  %v6454_v4 = vld [vmem:[%s8622_s20 + $0x6a8] sm:$0xf0]  ;;  %v5884_v53 = vld [vmem:[%s8622_s20 + $0x200] sm:$0xf]  ;;  %v7989_v54 = vld [vmem:[%s8622_s20 + $0x22c] sm:$0xf0] }
  0xf8   : > { %3132 = vmatpush.bf16.msra.mxu1 %v6117_v6  ;;  %v6646_v6 = vld [vmem:[%s8622_s20 + $0x828] sm:$0xf0] }
  0xf9   : > { %3145 = vmatpush.bf16.msra.mxu2 %v6501_v7  ;;  %v8270_v7 = vld [vmem:[%s8622_s20 + $0xafc] sm:$0xf]  ;;  %v6649_v11 = vor.u32 %v8174_v5, %v6646_v6  ;;  %v6406_v20 = vld [vmem:[%s8622_s20 + $0x648] sm:$0xf0] }
  0xfa   : > { %3158 = vmatpush.bf16.msra.mxu3 %v6885_v12  ;;  %v7970_v12 = vld [vmem:[%s8622_s20 + $0x19c] sm:$0xf]  ;;  %v7033_v15 = vor.u32 %v8270_v7, %v7030_v8  ;;  %v6838_v7 = vld [vmem:[%s8622_s20 + $0x9a8] sm:$0xf0] }
  0xfb   : > { %3120 = vmatpush.bf16.msra.mxu0 %v5685_v21  ;;  %v8258_v21 = vld [vmem:[%s8622_s20 + $0xa9c] sm:$0xf]  ;;  %v5833_v23 = vor.u32 %v7970_v12, %v5830_v13 }
  0xfc   : > { %3133 = vmatpush.bf16.msra.mxu1 %v6069_v24  ;;  %v6985_v33 = vor.u32 %v8258_v21, %v6982_v22  ;;  %v8222_v6 = vld [vmem:[%s8622_s20 + $0x97c] sm:$0xf]  ;;  %v6790_v22 = vld [vmem:[%s8622_s20 + $0x948] sm:$0xf0] }
  0xfd   : > { %3146 = vmatpush.bf16.msra.mxu2 %v6453_v25  ;;  %v6217_v25 = vor.u32 %v8066_v14, %v6214_v18  ;;  %v8018_v13 = vld [vmem:[%s8622_s20 + $0x31c] sm:$0xf]  ;;  %v6022_v14 = vld [vmem:[%s8622_s20 + $0x348] sm:$0xf0]  ;;  %v6841_v19 = vor.u32 %v8222_v6, %v6838_v7  ;;  %v6604_v6 = vld [vmem:[%s8622_s20 + $0x7a0] sm:$0xf] }
  0xfe   : > { %3159 = vmatpush.bf16.msra.mxu3 %v6837_v30  ;;  %v8210_v21 = vld [vmem:[%s8622_s20 + $0x91c] sm:$0xf]  ;;  %v8169_v7 = vld [vmem:[%s8622_s20 + $0x7cc] sm:$0xf0] }
  0xff   : > { %3121 = vmatpush.bf16.msra.mxu0 %v5637_v40  ;;  %v2915_v24 = vpop.f32.mrf.mxu0  ;;  %v5785_v40 = vor.u32 %v7958_v27, %v5782_v28  ;;  %v8109_v28 = vld [vmem:[%s8622_s20 + $0x5ec] sm:$0xf0] }
 0x100   : > { %3134 = vmatpush.bf16.msra.mxu1 %v6021_v44  ;;  %v2928_v30 = vpop.f32.mrf.mxu1  ;;  %v5734_v44 = vld [vmem:[%s8622_s20 + $0x108] sm:$0xf0] }
 0x101   : > { %3147 = vmatpush.bf16.msra.mxu2 %v6405_v45  ;;  %v2929_v37 = vadd.f32 %v2928_v30, %v2915_v24  ;;  %v8042_v45 = vld [vmem:[%s8622_s20 + $0x3dc] sm:$0xf]  ;;  %v5737_v56 = vor.u32 %v7946_v43, %v5734_v44  ;;  %v5980_v24 = vld [vmem:[%s8622_s20 + $0x2c0] sm:$0xf]  ;;  %v8205_v30 = vld [vmem:[%s8622_s20 + $0x8ec] sm:$0xf0]  ;;  %v7133_v44 = vor.u32 %v8301_v36, %v7132_v35 }
 0x102   : > { %3160 = vmatpush.bf16.msra.mxu3 %v6789_v48  ;;  %3122 = vmatmul.bf16.vlgmr.msra.gmra.mxu0 %v8734_v31  ;;  %v6118_v48 = vld [vmem:[%s8622_s20 + $0x408] sm:$0xf0]  ;;  %v6316_v43 = vld [vmem:[%s8622_s20 + $0x560] sm:$0xf] }
 0x103   : > { %3166 = vmatpush.bf16.msrb.mxu0 %v5977_v49  ;;  %3135 = vmatmul.bf16.vlgmr.msra.gmra.mxu1 %v8736_v32  ;;  %v8138_v49 = vld [vmem:[%s8622_s20 + $0x6dc] sm:$0xf]  ;;  %v6121_v59 = vor.u32 %v8042_v45, %v6118_v48  ;;  %v8097_v45 = vld [vmem:[%s8622_s20 + $0x58c] sm:$0xf0]  ;;  %v7084_v48 = vld [vmem:[%s8622_s20 + $0xb60] sm:$0xf] }
 0x104   : > { %3179 = vmatpush.bf16.msrb.mxu1 %v6361_v50  ;;  %3148 = vmatmul.bf16.vlgmr.msra.gmra.mxu2 %v8722_v16  ;;  %v6502_v50 = vld [vmem:[%s8622_s20 + $0x708] sm:$0xf0] }
 0x105   : > { %3192 = vmatpush.bf16.msrb.mxu2 %v6745_v51  ;;  %3161 = vmatmul.bf16.vlgmr.msra.gmra.mxu3 %v8724_v17  ;;  %v6505_v60 = vor.u32 %v8138_v49, %v6502_v50  ;;  %v8289_v49 = vld [vmem:[%s8622_s20 + $0xb8c] sm:$0xf0] }
 0x106   : > { %3205 = vmatpush.bf16.msrb.mxu3 %v7129_v55  ;;  %v472_v55 = vld [vmem:[#allocation2 + $0x58] sm:$0xff] }
 0x107   : > { %3167 = vmatpush.bf16.msrb.mxu0 %v5929_v61  ;;  %v2941_v46 = vpop.f32.mrf.mxu2  ;;  %v2917_v58 = vpop.f32.mrf.mxu0  ;;  %v7934_v61 = vld [vmem:[%s8622_s20 + $0x7c] sm:$0xf] }
 0x108   : > { %3180 = vmatpush.bf16.msrb.mxu1 %v6313_v62  ;;  %v2942_v51 = vadd.f32 %v2941_v46, %v2929_v37  ;;  %v2954_v52 = vpop.f32.mrf.mxu3  ;;  %v5686_v62 = vld [vmem:[%s8622_s20 + $0xa8] sm:$0xf0]  ;;  %v2930_v0 = vpop.f32.mrf.mxu1  ;;  %v6793_v37 = vor.u32 %v8210_v21, %v6790_v22  ;;  %v6700_v46 = vld [vmem:[%s8622_s20 + $0x860] sm:$0xf]  ;;  %v8061_v21 = vld [vmem:[%s8622_s20 + $0x46c] sm:$0xf0] }
 0x109   : > { %3193 = vmatpush.bf16.msrb.mxu2 %v6697_v63  ;;  %v8030_v63 = vld [vmem:[%s8622_s20 + $0x37c] sm:$0xf]  ;;  %v5689_v8 = vor.u32 %v7934_v61, %v5686_v62  ;;  %v6652_v58 = vld [vmem:[%s8622_s20 + $0x800] sm:$0xf]  ;;  %v8277_v61 = vld [vmem:[%s8622_s20 + $0xb2c] sm:$0xf0]  ;;  %v5885_v62 = vor.u32 %v7989_v54, %v5884_v53 }
 0x10a   : > { %3206 = vmatpush.bf16.msrb.mxu3 %v7081_v3  ;;  %v2955_v57 = vadd.f32 %v2954_v52, %v2942_v51  ;;  %v8126_v3 = vld [vmem:[%s8622_s20 + $0x67c] sm:$0xf]  ;;  %v6317_v51 = vor.u32 %v8097_v45, %v6316_v43  ;;  %v6556_v22 = vld [vmem:[%s8622_s20 + $0x740] sm:$0xf]  ;;  %v8241_v43 = vld [vmem:[%s8622_s20 + $0xa0c] sm:$0xf0] }
 0x10b   : > { %3168 = vmatpush.bf16.msrb.mxu0 %v5881_v9  ;;  %v7922_v9 = vld [vmem:[%s8622_s20 + $0x1c] sm:$0xf]  ;;  %v6457_v12 = vor.u32 %v8126_v3, %v6454_v4  ;;  %v6220_v3 = vld [vmem:[%s8622_s20 + $0x4a0] sm:$0xf] }
 0x10c   : > { %3181 = vmatpush.bf16.msrb.mxu1 %v6265_v10  ;;  %v3428_v5 = vadd.f32 %v2955_v57, %v472_v55  ;;  %v5638_v10 = vld [vmem:[%s8622_s20 + $0x48] sm:$0xf0]  ;;  %v6268_v55 = vld [vmem:[%s8622_s20 + $0x500] sm:$0xf]  ;;  %v8085_v57 = vld [vmem:[%s8622_s20 + $0x52c] sm:$0xf0] }
 0x10d   : > { %3194 = vmatpush.bf16.msrb.mxu2 %v6649_v11  ;;  %v6073_v11 = vor.u32 %v8030_v63, %v6070_v2  ;;  %v5641_v27 = vor.u32 %v7922_v9, %v5638_v10  ;;  %v6269_v63 = vor.u32 %v8085_v57, %v6268_v55  ;;  %v7977_v2 = vld [vmem:[%s8622_s20 + $0x1cc] sm:$0xf0] }
 0x10e   : > { %3207 = vmatpush.bf16.msrb.mxu3 %v7033_v15  ;;  %3440 = vst [vmem:[#allocation2 + $0x58] sm:$0xff] %v3428_v5  ;;  %v8114_v15 = vld [vmem:[%s8622_s20 + $0x61c] sm:$0xf]  ;;  %v8073_v5 = vld [vmem:[%s8622_s20 + $0x4cc] sm:$0xf0] }
 0x10f   : > { %3169 = vmatpush.bf16.msrb.mxu0 %v5833_v23  ;;  %v2943_v18 = vpop.f32.mrf.mxu2  ;;  %v6409_v34 = vor.u32 %v8114_v15, %v6406_v20  ;;  %v8265_v9 = vld [vmem:[%s8622_s20 + $0xacc] sm:$0xf0] }
 0x110   : > { %3182 = vmatpush.bf16.msrb.mxu1 %v6217_v25  ;;  %v2956_v23 = vpop.f32.mrf.mxu3  ;;  %v8013_v25 = vld [vmem:[%s8622_s20 + $0x2ec] sm:$0xf0]  ;;  %v6172_v18 = vld [vmem:[%s8622_s20 + $0x440] sm:$0xf] }
 0x111   : > { %3195 = vmatpush.bf16.msrb.mxu2 %v6601_v26  ;;  %v6364_v26 = vld [vmem:[%s8622_s20 + $0x5c0] sm:$0xf]  ;;  %v5981_v38 = vor.u32 %v8013_v25, %v5980_v24  ;;  %v7965_v15 = vld [vmem:[%s8622_s20 + $0x16c] sm:$0xf0] }
 0x112   : > { %3208 = vmatpush.bf16.msrb.mxu3 %v6985_v33  ;;  %v6025_v33 = vor.u32 %v8018_v13, %v6022_v14  ;;  %v6365_v39 = vor.u32 %v8109_v28, %v6364_v26  ;;  %v6605_v13 = vor.u32 %v8169_v7, %v6604_v6  ;;  %v5788_v14 = vld [vmem:[%s8622_s20 + $0x140] sm:$0xf]  ;;  %v8157_v23 = vld [vmem:[%s8622_s20 + $0x76c] sm:$0xf0]  ;;  %v6173_v28 = vor.u32 %v8061_v21, %v6172_v18  ;;  %v8199_v18 = vld [vmem:[%s8622_s20 + $0x8c4] sm:$0xf] }
 0x113   : > { %3170 = vmatpush.bf16.msrb.mxu0 %v5785_v40  ;;  %v6749_v40 = vor.u32 %v8205_v30, %v6748_v29  ;;  %v6940_v25 = vld [vmem:[%s8622_s20 + $0xa40] sm:$0xf]  ;;  %v8253_v26 = vld [vmem:[%s8622_s20 + $0xa6c] sm:$0xf0]  ;;  %v6557_v29 = vor.u32 %v8157_v23, %v6556_v22  ;;  %v8295_v22 = vld [vmem:[%s8622_s20 + $0xbc4] sm:$0xf] }
 0x114   : > { %3183 = vmatpush.bf16.msrb.mxu1 %v6169_v41  ;;  %v5932_v41 = vld [vmem:[%s8622_s20 + $0x260] sm:$0xf]  ;;  %v6941_v36 = vor.u32 %v8253_v26, %v6940_v25  ;;  %v8037_v55 = vld [vmem:[%s8622_s20 + $0x3ac] sm:$0xf0]  ;;  %v7134_v23 = vld [vmem:[%s8622_s20 + $0xbf0] sm:$0xf0] }
 0x115   : > { %3196 = vmatpush.bf16.msrb.mxu2 %v6553_v42  ;;  %v8001_v42 = vld [vmem:[%s8622_s20 + $0x28c] sm:$0xf0]  ;;  %v5740_v30 = vld [vmem:[%s8622_s20 + $0xe0] sm:$0xf] }
 0x116   : > { %3209 = vmatpush.bf16.msrb.mxu3 %v6937_v47  ;;  %v8193_v47 = vld [vmem:[%s8622_s20 + $0x88c] sm:$0xf0]  ;;  %v5933_v50 = vor.u32 %v8001_v42, %v5932_v41  ;;  %v6892_v42 = vld [vmem:[%s8622_s20 + $0x9e0] sm:$0xf] }
 0x117   : > { %3171 = vmatpush.bf16.msrb.mxu0 %v5737_v56  ;;  %v6701_v52 = vor.u32 %v8193_v47, %v6700_v46  ;;  %v7085_v56 = vor.u32 %v8289_v49, %v7084_v48  ;;  %v6893_v54 = vor.u32 %v8241_v43, %v6892_v42  ;;  %v8133_v57 = vld [vmem:[%s8622_s20 + $0x6ac] sm:$0xf0]  ;;  %v7983_v42 = vld [vmem:[%s8622_s20 + $0x204] sm:$0xf]  ;;  %v5886_v43 = vld [vmem:[%s8622_s20 + $0x230] sm:$0xf0] }
 0x118   : > { %3184 = vmatpush.bf16.msrb.mxu1 %v6121_v59  ;;  %v8181_v59 = vld [vmem:[%s8622_s20 + $0x82c] sm:$0xf0] }
 0x119   : > { %3197 = vmatpush.bf16.msrb.mxu2 %v6505_v60  ;;  %v7036_v60 = vld [vmem:[%s8622_s20 + $0xb00] sm:$0xf]  ;;  %v6653_v0 = vor.u32 %v8181_v59, %v6652_v58  ;;  %v8121_v7 = vld [vmem:[%s8622_s20 + $0x64c] sm:$0xf0] }
 0x11a   : > { %3210 = vmatpush.bf16.msrb.mxu3 %v6889_v1  ;;  %v5836_v1 = vld [vmem:[%s8622_s20 + $0x1a0] sm:$0xf]  ;;  %v7037_v4 = vor.u32 %v8277_v61, %v7036_v60  ;;  %v8229_v60 = vld [vmem:[%s8622_s20 + $0x9ac] sm:$0xf0] }
 0x11b   : > { %3172 = vmatpush.bf16.msrb.mxu0 %v5689_v8  ;;  %v6988_v8 = vld [vmem:[%s8622_s20 + $0xaa0] sm:$0xf]  ;;  %v5837_v10 = vor.u32 %v7977_v2, %v5836_v1 }
 0x11c   : > { %3185 = vmatpush.bf16.msrb.mxu1 %v6073_v11  ;;  %v6989_v20 = vor.u32 %v8265_v9, %v6988_v8  ;;  %v6844_v59 = vld [vmem:[%s8622_s20 + $0x980] sm:$0xf]  ;;  %v8217_v9 = vld [vmem:[%s8622_s20 + $0x94c] sm:$0xf0] }
 0x11d   : > { %3198 = vmatpush.bf16.msrb.mxu2 %v6457_v12  ;;  %v6221_v12 = vor.u32 %v8073_v5, %v6220_v3  ;;  %v6028_v2 = vld [vmem:[%s8622_s20 + $0x320] sm:$0xf]  ;;  %v8025_v3 = vld [vmem:[%s8622_s20 + $0x34c] sm:$0xf0]  ;;  %v6845_v6 = vor.u32 %v8229_v60, %v6844_v59  ;;  %v8163_v59 = vld [vmem:[%s8622_s20 + $0x7a4] sm:$0xf] }
 0x11e   : > { %3211 = vmatpush.bf16.msrb.mxu3 %v6841_v19  ;;  %v6796_v8 = vld [vmem:[%s8622_s20 + $0x920] sm:$0xf]  ;;  %v6606_v60 = vld [vmem:[%s8622_s20 + $0x7d0] sm:$0xf0] }
 0x11f   : > { %3173 = vmatpush.bf16.msrb.mxu0 %v5641_v27  ;;  %v2967_v11 = vpop.f32.mrf.mxu0  ;;  %v5789_v27 = vor.u32 %v7965_v15, %v5788_v14  ;;  %v6366_v15 = vld [vmem:[%s8622_s20 + $0x5f0] sm:$0xf0] }
 0x120   : > { %3186 = vmatpush.bf16.msrb.mxu1 %v6025_v33  ;;  %v2980_v19 = vpop.f32.mrf.mxu1  ;;  %v7953_v33 = vld [vmem:[%s8622_s20 + $0x10c] sm:$0xf0] }
 0x121   : > { %3199 = vmatpush.bf16.msrb.mxu2 %v6409_v34  ;;  %v2981_v24 = vadd.f32 %v2980_v19, %v2967_v11  ;;  %v6124_v34 = vld [vmem:[%s8622_s20 + $0x3e0] sm:$0xf]  ;;  %v5741_v45 = vor.u32 %v7953_v33, %v5740_v30  ;;  %v8007_v11 = vld [vmem:[%s8622_s20 + $0x2c4] sm:$0xf]  ;;  %v6750_v19 = vld [vmem:[%s8622_s20 + $0x8f0] sm:$0xf0]  ;;  %v7137_v33 = vor.u32 %v8295_v22, %v7134_v23 }
 0x122   : > { %3212 = vmatpush.bf16.msrb.mxu3 %v6793_v37  ;;  %3174 = vmatmul.bf16.vlgmr.msrb.gmra.mxu0 %v8734_v31  ;;  %v8049_v37 = vld [vmem:[%s8622_s20 + $0x40c] sm:$0xf0]  ;;  %v8091_v30 = vld [vmem:[%s8622_s20 + $0x564] sm:$0xf] }
 0x123   : > { %3218 = vmatpush.bf16.msra.mxu0 %v5981_v38  ;;  %3187 = vmatmul.bf16.vlgmr.msrb.gmra.mxu1 %v8736_v32  ;;  %v6508_v38 = vld [vmem:[%s8622_s20 + $0x6e0] sm:$0xf]  ;;  %v6125_v48 = vor.u32 %v8049_v37, %v6124_v34  ;;  %v6318_v34 = vld [vmem:[%s8622_s20 + $0x590] sm:$0xf0]  ;;  %v8283_v37 = vld [vmem:[%s8622_s20 + $0xb64] sm:$0xf] }
 0x124   : > { %3231 = vmatpush.bf16.msra.mxu1 %v6365_v39  ;;  %3200 = vmatmul.bf16.vlgmr.msrb.gmra.mxu2 %v8722_v16  ;;  %v8145_v39 = vld [vmem:[%s8622_s20 + $0x70c] sm:$0xf0] }
 0x125   : > { %3244 = vmatpush.bf16.msra.mxu2 %v6749_v40  ;;  %3213 = vmatmul.bf16.vlgmr.msrb.gmra.mxu3 %v8724_v17  ;;  %v6509_v49 = vor.u32 %v8145_v39, %v6508_v38  ;;  %v7086_v38 = vld [vmem:[%s8622_s20 + $0xb90] sm:$0xf0] }
 0x126   : > { %3257 = vmatpush.bf16.msra.mxu3 %v7133_v44  ;;  %v473_v44 = vld [vmem:[#allocation2 + $0x18] sm:$0xff] }
 0x127   : > { %3219 = vmatpush.bf16.msra.mxu0 %v5933_v50  ;;  %v2993_v35 = vpop.f32.mrf.mxu2  ;;  %v2969_v47 = vpop.f32.mrf.mxu0  ;;  %v5692_v50 = vld [vmem:[%s8622_s20 + $0x80] sm:$0xf] }
 0x128   : > { %3232 = vmatpush.bf16.msra.mxu1 %v6317_v51  ;;  %v2994_v40 = vadd.f32 %v2993_v35, %v2981_v24  ;;  %v3006_v41 = vpop.f32.mrf.mxu3  ;;  %v7941_v51 = vld [vmem:[%s8622_s20 + $0xac] sm:$0xf0]  ;;  %v2982_v53 = vpop.f32.mrf.mxu1  ;;  %v6797_v24 = vor.u32 %v8217_v9, %v6796_v8  ;;  %v8187_v35 = vld [vmem:[%s8622_s20 + $0x864] sm:$0xf]  ;;  %v6174_v8 = vld [vmem:[%s8622_s20 + $0x470] sm:$0xf0] }
 0x129   : > { %3245 = vmatpush.bf16.msra.mxu2 %v6701_v52  ;;  %v6076_v52 = vld [vmem:[%s8622_s20 + $0x380] sm:$0xf]  ;;  %v5693_v61 = vor.u32 %v7941_v51, %v5692_v50  ;;  %v8175_v47 = vld [vmem:[%s8622_s20 + $0x804] sm:$0xf]  ;;  %v7038_v50 = vld [vmem:[%s8622_s20 + $0xb30] sm:$0xf0]  ;;  %v5889_v51 = vor.u32 %v7983_v42, %v5886_v43 }
 0x12a   : > { %3258 = vmatpush.bf16.msra.mxu3 %v7085_v56  ;;  %v3007_v46 = vadd.f32 %v3006_v41, %v2994_v40  ;;  %v6460_v56 = vld [vmem:[%s8622_s20 + $0x680] sm:$0xf]  ;;  %v6321_v40 = vor.u32 %v8091_v30, %v6318_v34  ;;  %v8151_v9 = vld [vmem:[%s8622_s20 + $0x744] sm:$0xf]  ;;  %v6894_v30 = vld [vmem:[%s8622_s20 + $0xa10] sm:$0xf0] }
 0x12b   : > { %3220 = vmatpush.bf16.msra.mxu0 %v5885_v62  ;;  %v5644_v62 = vld [vmem:[%s8622_s20 + $0x20] sm:$0xf]  ;;  %v6461_v1 = vor.u32 %v8133_v57, %v6460_v56  ;;  %v8067_v56 = vld [vmem:[%s8622_s20 + $0x4a4] sm:$0xf] }
 0x12c   : > { %3233 = vmatpush.bf16.msra.mxu1 %v6269_v63  ;;  %v3429_v58 = vadd.f32 %v3007_v46, %v473_v44  ;;  %v7929_v63 = vld [vmem:[%s8622_s20 + $0x4c] sm:$0xf0]  ;;  %v8079_v44 = vld [vmem:[%s8622_s20 + $0x504] sm:$0xf]  ;;  %v6270_v46 = vld [vmem:[%s8622_s20 + $0x530] sm:$0xf0] }
 0x12d   : > { %3246 = vmatpush.bf16.msra.mxu2 %v6653_v0  ;;  %v6077_v0 = vor.u32 %v8037_v55, %v6076_v52  ;;  %v5645_v14 = vor.u32 %v7929_v63, %v5644_v62  ;;  %v6273_v52 = vor.u32 %v8079_v44, %v6270_v46  ;;  %v5838_v55 = vld [vmem:[%s8622_s20 + $0x1d0] sm:$0xf0] }
 0x12e   : > { %3259 = vmatpush.bf16.msra.mxu3 %v7037_v4  ;;  %3441 = vst [vmem:[#allocation2 + $0x18] sm:$0xff] %v3429_v58  ;;  %v6412_v4 = vld [vmem:[%s8622_s20 + $0x620] sm:$0xf]  ;;  %v6222_v58 = vld [vmem:[%s8622_s20 + $0x4d0] sm:$0xf0] }
 0x12f   : > { %3221 = vmatpush.bf16.msra.mxu0 %v5837_v10  ;;  %v2995_v5 = vpop.f32.mrf.mxu2  ;;  %v6413_v21 = vor.u32 %v8121_v7, %v6412_v4  ;;  %v6990_v62 = vld [vmem:[%s8622_s20 + $0xad0] sm:$0xf0] }
 0x130   : > { %3234 = vmatpush.bf16.msra.mxu1 %v6221_v12  ;;  %v3008_v10 = vpop.f32.mrf.mxu3  ;;  %v5982_v12 = vld [vmem:[%s8622_s20 + $0x2f0] sm:$0xf0]  ;;  %v8055_v5 = vld [vmem:[%s8622_s20 + $0x444] sm:$0xf] }
 0x131   : > { %3247 = vmatpush.bf16.msra.mxu2 %v6605_v13  ;;  %v8103_v13 = vld [vmem:[%s8622_s20 + $0x5c4] sm:$0xf]  ;;  %v5985_v25 = vor.u32 %v8007_v11, %v5982_v12  ;;  %v5790_v4 = vld [vmem:[%s8622_s20 + $0x170] sm:$0xf0] }
 0x132   : > { %3260 = vmatpush.bf16.msra.mxu3 %v6989_v20  ;;  %v6029_v20 = vor.u32 %v8025_v3, %v6028_v2  ;;  %v6369_v26 = vor.u32 %v8103_v13, %v6366_v15  ;;  %v6609_v2 = vor.u32 %v8163_v59, %v6606_v60  ;;  %v7959_v3 = vld [vmem:[%s8622_s20 + $0x144] sm:$0xf]  ;;  %v6558_v10 = vld [vmem:[%s8622_s20 + $0x770] sm:$0xf0]  ;;  %v6177_v15 = vor.u32 %v8055_v5, %v6174_v8  ;;  %v6756_v5 = vld [vmem:[%s8622_s20 + $0x8c8] sm:$0xf] }
 0x133   : > { %3222 = vmatpush.bf16.msra.mxu0 %v5789_v27  ;;  %v6753_v27 = vor.u32 %v8199_v18, %v6750_v19  ;;  %v8247_v12 = vld [vmem:[%s8622_s20 + $0xa44] sm:$0xf]  ;;  %v6942_v13 = vld [vmem:[%s8622_s20 + $0xa70] sm:$0xf0]  ;;  %v6561_v18 = vor.u32 %v8151_v9, %v6558_v10  ;;  %v7140_v9 = vld [vmem:[%s8622_s20 + $0xbc8] sm:$0xf] }
 0x134   : > { %3235 = vmatpush.bf16.msra.mxu1 %v6173_v28  ;;  %v7995_v28 = vld [vmem:[%s8622_s20 + $0x264] sm:$0xf]  ;;  %v6945_v23 = vor.u32 %v8247_v12, %v6942_v13  ;;  %v6078_v44 = vld [vmem:[%s8622_s20 + $0x3b0] sm:$0xf0]  ;;  %v8302_v10 = vld [vmem:[%s8622_s20 + $0xbf4] sm:$0xf0] }
 0x135   : > { %3248 = vmatpush.bf16.msra.mxu2 %v6557_v29  ;;  %v5934_v29 = vld [vmem:[%s8622_s20 + $0x290] sm:$0xf0]  ;;  %v7947_v19 = vld [vmem:[%s8622_s20 + $0xe4] sm:$0xf] }
 0x136   : > { %3261 = vmatpush.bf16.msra.mxu3 %v6941_v36  ;;  %v6702_v36 = vld [vmem:[%s8622_s20 + $0x890] sm:$0xf0]  ;;  %v5937_v39 = vor.u32 %v7995_v28, %v5934_v29  ;;  %v8235_v29 = vld [vmem:[%s8622_s20 + $0x9e4] sm:$0xf] }
 0x137   : > { %3223 = vmatpush.bf16.msra.mxu0 %v5741_v45  ;;  %v6705_v41 = vor.u32 %v8187_v35, %v6702_v36  ;;  %v7089_v45 = vor.u32 %v8283_v37, %v7086_v38  ;;  %v6897_v43 = vor.u32 %v8235_v29, %v6894_v30  ;;  %v6462_v46 = vld [vmem:[%s8622_s20 + $0x6b0] sm:$0xf0]  ;;  %v5892_v29 = vld [vmem:[%s8622_s20 + $0x208] sm:$0xf]  ;;  %v7990_v30 = vld [vmem:[%s8622_s20 + $0x234] sm:$0xf0] }
 0x138   : > { %3236 = vmatpush.bf16.msra.mxu1 %v6125_v48  ;;  %v6654_v48 = vld [vmem:[%s8622_s20 + $0x830] sm:$0xf0] }
 0x139   : > { %3249 = vmatpush.bf16.msra.mxu2 %v6509_v49  ;;  %v8271_v49 = vld [vmem:[%s8622_s20 + $0xb04] sm:$0xf]  ;;  %v6657_v53 = vor.u32 %v8175_v47, %v6654_v48  ;;  %v6414_v60 = vld [vmem:[%s8622_s20 + $0x650] sm:$0xf0] }
 0x13a   : > { %3262 = vmatpush.bf16.msra.mxu3 %v6893_v54  ;;  %v7971_v54 = vld [vmem:[%s8622_s20 + $0x1a4] sm:$0xf]  ;;  %v7041_v57 = vor.u32 %v8271_v49, %v7038_v50  ;;  %v6846_v49 = vld [vmem:[%s8622_s20 + $0x9b0] sm:$0xf0] }
 0x13b   : > { %3224 = vmatpush.bf16.msra.mxu0 %v5693_v61  ;;  %v8259_v61 = vld [vmem:[%s8622_s20 + $0xaa4] sm:$0xf]  ;;  %v5841_v63 = vor.u32 %v7971_v54, %v5838_v55 }
 0x13c   : > { %3237 = vmatpush.bf16.msra.mxu1 %v6077_v0  ;;  %v6993_v7 = vor.u32 %v8259_v61, %v6990_v62  ;;  %v8223_v48 = vld [vmem:[%s8622_s20 + $0x984] sm:$0xf]  ;;  %v6798_v62 = vld [vmem:[%s8622_s20 + $0x950] sm:$0xf0] }
 0x13d   : > { %3250 = vmatpush.bf16.msra.mxu2 %v6461_v1  ;;  %v6225_v1 = vor.u32 %v8067_v56, %v6222_v58  ;;  %v8019_v55 = vld [vmem:[%s8622_s20 + $0x324] sm:$0xf]  ;;  %v6030_v56 = vld [vmem:[%s8622_s20 + $0x350] sm:$0xf0]  ;;  %v6849_v59 = vor.u32 %v8223_v48, %v6846_v49  ;;  %v6612_v48 = vld [vmem:[%s8622_s20 + $0x7a8] sm:$0xf] }
 0x13e   : > { %3263 = vmatpush.bf16.msra.mxu3 %v6845_v6  ;;  %v8211_v61 = vld [vmem:[%s8622_s20 + $0x924] sm:$0xf]  ;;  %v8170_v49 = vld [vmem:[%s8622_s20 + $0x7d4] sm:$0xf0] }
 0x13f   : > { %3225 = vmatpush.bf16.msra.mxu0 %v5645_v14  ;;  %v3019_v0 = vpop.f32.mrf.mxu0  ;;  %v5793_v14 = vor.u32 %v7959_v3, %v5790_v4  ;;  %v8110_v4 = vld [vmem:[%s8622_s20 + $0x5f4] sm:$0xf0] }
 0x140   : > { %3238 = vmatpush.bf16.msra.mxu1 %v6029_v20  ;;  %v3032_v6 = vpop.f32.mrf.mxu1  ;;  %v5742_v20 = vld [vmem:[%s8622_s20 + $0x110] sm:$0xf0] }
 0x141   : > { %3251 = vmatpush.bf16.msra.mxu2 %v6413_v21  ;;  %v3033_v11 = vadd.f32 %v3032_v6, %v3019_v0  ;;  %v8043_v21 = vld [vmem:[%s8622_s20 + $0x3e4] sm:$0xf]  ;;  %v5745_v34 = vor.u32 %v7947_v19, %v5742_v20  ;;  %v5988_v0 = vld [vmem:[%s8622_s20 + $0x2c8] sm:$0xf]  ;;  %v8206_v6 = vld [vmem:[%s8622_s20 + $0x8f4] sm:$0xf0]  ;;  %v7141_v20 = vor.u32 %v8302_v10, %v7140_v9 }
 0x142   : > { %3264 = vmatpush.bf16.msra.mxu3 %v6797_v24  ;;  %3226 = vmatmul.bf16.vlgmr.msra.gmra.mxu0 %v8734_v31  ;;  %v6126_v24 = vld [vmem:[%s8622_s20 + $0x410] sm:$0xf0]  ;;  %v6324_v19 = vld [vmem:[%s8622_s20 + $0x568] sm:$0xf] }
 0x143   : > { %3270 = vmatpush.bf16.msrb.mxu0 %v5985_v25  ;;  %3239 = vmatmul.bf16.vlgmr.msra.gmra.mxu1 %v8736_v32  ;;  %v8139_v25 = vld [vmem:[%s8622_s20 + $0x6e4] sm:$0xf]  ;;  %v6129_v37 = vor.u32 %v8043_v21, %v6126_v24  ;;  %v8098_v21 = vld [vmem:[%s8622_s20 + $0x594] sm:$0xf0]  ;;  %v7092_v24 = vld [vmem:[%s8622_s20 + $0xb68] sm:$0xf] }
 0x144   : > { %3283 = vmatpush.bf16.msrb.mxu1 %v6369_v26  ;;  %3252 = vmatmul.bf16.vlgmr.msra.gmra.mxu2 %v8722_v16  ;;  %v6510_v26 = vld [vmem:[%s8622_s20 + $0x710] sm:$0xf0] }
 0x145   : > { %3296 = vmatpush.bf16.msrb.mxu2 %v6753_v27  ;;  %3265 = vmatmul.bf16.vlgmr.msra.gmra.mxu3 %v8724_v17  ;;  %v6513_v38 = vor.u32 %v8139_v25, %v6510_v26  ;;  %v8290_v25 = vld [vmem:[%s8622_s20 + $0xb94] sm:$0xf0] }
 0x146   : > { %3309 = vmatpush.bf16.msrb.mxu3 %v7137_v33  ;;  %v474_v33 = vld [vmem:[#allocation2 + $0x50] sm:$0xff] }
 0x147   : > { %3271 = vmatpush.bf16.msrb.mxu0 %v5937_v39  ;;  %v3045_v22 = vpop.f32.mrf.mxu2  ;;  %v3021_v36 = vpop.f32.mrf.mxu0  ;;  %v7935_v39 = vld [vmem:[%s8622_s20 + $0x84] sm:$0xf] }
 0x148   : > { %3284 = vmatpush.bf16.msrb.mxu1 %v6321_v40  ;;  %v3046_v27 = vadd.f32 %v3045_v22, %v3033_v11  ;;  %v3058_v28 = vpop.f32.mrf.mxu3  ;;  %v5694_v40 = vld [vmem:[%s8622_s20 + $0xb0] sm:$0xf0]  ;;  %v3034_v42 = vpop.f32.mrf.mxu1  ;;  %v6801_v11 = vor.u32 %v8211_v61, %v6798_v62  ;;  %v6708_v22 = vld [vmem:[%s8622_s20 + $0x868] sm:$0xf]  ;;  %v8062_v61 = vld [vmem:[%s8622_s20 + $0x474] sm:$0xf0] }
 0x149   : > { %3297 = vmatpush.bf16.msrb.mxu2 %v6705_v41  ;;  %v8031_v41 = vld [vmem:[%s8622_s20 + $0x384] sm:$0xf]  ;;  %v5697_v50 = vor.u32 %v7935_v39, %v5694_v40  ;;  %v6660_v36 = vld [vmem:[%s8622_s20 + $0x808] sm:$0xf]  ;;  %v8278_v39 = vld [vmem:[%s8622_s20 + $0xb34] sm:$0xf0]  ;;  %v5893_v40 = vor.u32 %v7990_v30, %v5892_v29 }
 0x14a   : > { %3310 = vmatpush.bf16.msrb.mxu3 %v7089_v45  ;;  %v3059_v35 = vadd.f32 %v3058_v28, %v3046_v27  ;;  %v8127_v45 = vld [vmem:[%s8622_s20 + $0x684] sm:$0xf]  ;;  %v6325_v27 = vor.u32 %v8098_v21, %v6324_v19  ;;  %v6564_v62 = vld [vmem:[%s8622_s20 + $0x748] sm:$0xf]  ;;  %v8242_v19 = vld [vmem:[%s8622_s20 + $0xa14] sm:$0xf0] }
 0x14b   : > { %3272 = vmatpush.bf16.msrb.mxu0 %v5889_v51  ;;  %v7923_v51 = vld [vmem:[%s8622_s20 + $0x24] sm:$0xf]  ;;  %v6465_v54 = vor.u32 %v8127_v45, %v6462_v46  ;;  %v6228_v45 = vld [vmem:[%s8622_s20 + $0x4a8] sm:$0xf] }
 0x14c   : > { %3285 = vmatpush.bf16.msrb.mxu1 %v6273_v52  ;;  %v3430_v47 = vadd.f32 %v3059_v35, %v474_v33  ;;  %v5646_v52 = vld [vmem:[%s8622_s20 + $0x50] sm:$0xf0]  ;;  %v6276_v33 = vld [vmem:[%s8622_s20 + $0x508] sm:$0xf]  ;;  %v8086_v35 = vld [vmem:[%s8622_s20 + $0x534] sm:$0xf0] }
 0x14d   : > { %3298 = vmatpush.bf16.msrb.mxu2 %v6657_v53  ;;  %v6081_v53 = vor.u32 %v8031_v41, %v6078_v44  ;;  %v5649_v3 = vor.u32 %v7923_v51, %v5646_v52  ;;  %v6277_v41 = vor.u32 %v8086_v35, %v6276_v33  ;;  %v7978_v44 = vld [vmem:[%s8622_s20 + $0x1d4] sm:$0xf0] }
 0x14e   : > { %3311 = vmatpush.bf16.msrb.mxu3 %v7041_v57  ;;  %3442 = vst [vmem:[#allocation2 + $0x50] sm:$0xff] %v3430_v47  ;;  %v8115_v57 = vld [vmem:[%s8622_s20 + $0x624] sm:$0xf]  ;;  %v8074_v47 = vld [vmem:[%s8622_s20 + $0x4d4] sm:$0xf0] }
 0x14f   : > { %3273 = vmatpush.bf16.msrb.mxu0 %v5841_v63  ;;  %v3047_v58 = vpop.f32.mrf.mxu2  ;;  %v6417_v8 = vor.u32 %v8115_v57, %v6414_v60  ;;  %v8266_v51 = vld [vmem:[%s8622_s20 + $0xad4] sm:$0xf0] }
 0x150   : > { %3286 = vmatpush.bf16.msrb.mxu1 %v6225_v1  ;;  %v3060_v63 = vpop.f32.mrf.mxu3  ;;  %v8014_v1 = vld [vmem:[%s8622_s20 + $0x2f4] sm:$0xf0]  ;;  %v6180_v58 = vld [vmem:[%s8622_s20 + $0x448] sm:$0xf] }
 0x151   : > { %3299 = vmatpush.bf16.msrb.mxu2 %v6609_v2  ;;  %v6372_v2 = vld [vmem:[%s8622_s20 + $0x5c8] sm:$0xf]  ;;  %v5989_v12 = vor.u32 %v8014_v1, %v5988_v0  ;;  %v7966_v57 = vld [vmem:[%s8622_s20 + $0x174] sm:$0xf0] }
 0x152   : > { %3312 = vmatpush.bf16.msrb.mxu3 %v6993_v7  ;;  %v6033_v7 = vor.u32 %v8019_v55, %v6030_v56  ;;  %v6373_v13 = vor.u32 %v8110_v4, %v6372_v2  ;;  %v6613_v55 = vor.u32 %v8170_v49, %v6612_v48  ;;  %v5796_v56 = vld [vmem:[%s8622_s20 + $0x148] sm:$0xf]  ;;  %v8158_v63 = vld [vmem:[%s8622_s20 + $0x774] sm:$0xf0]  ;;  %v6181_v4 = vor.u32 %v8062_v61, %v6180_v58  ;;  %v8200_v58 = vld [vmem:[%s8622_s20 + $0x8cc] sm:$0xf] }
 0x153   : > { %3274 = vmatpush.bf16.msrb.mxu0 %v5793_v14  ;;  %v6757_v14 = vor.u32 %v8206_v6, %v6756_v5  ;;  %v6948_v1 = vld [vmem:[%s8622_s20 + $0xa48] sm:$0xf]  ;;  %v8254_v2 = vld [vmem:[%s8622_s20 + $0xa74] sm:$0xf0]  ;;  %v6565_v5 = vor.u32 %v8158_v63, %v6564_v62  ;;  %v8296_v62 = vld [vmem:[%s8622_s20 + $0xbcc] sm:$0xf] }
 0x154   : > { %3287 = vmatpush.bf16.msrb.mxu1 %v6177_v15  ;;  %v5940_v15 = vld [vmem:[%s8622_s20 + $0x268] sm:$0xf]  ;;  %v6949_v10 = vor.u32 %v8254_v2, %v6948_v1  ;;  %v8038_v33 = vld [vmem:[%s8622_s20 + $0x3b4] sm:$0xf0]  ;;  %v7142_v63 = vld [vmem:[%s8622_s20 + $0xbf8] sm:$0xf0] }
 0x155   : > { %3300 = vmatpush.bf16.msrb.mxu2 %v6561_v18  ;;  %v8002_v18 = vld [vmem:[%s8622_s20 + $0x294] sm:$0xf0]  ;;  %v5748_v6 = vld [vmem:[%s8622_s20 + $0xe8] sm:$0xf] }
 0x156   : > { %3313 = vmatpush.bf16.msrb.mxu3 %v6945_v23  ;;  %v8194_v23 = vld [vmem:[%s8622_s20 + $0x894] sm:$0xf0]  ;;  %v5941_v26 = vor.u32 %v8002_v18, %v5940_v15  ;;  %v6900_v18 = vld [vmem:[%s8622_s20 + $0x9e8] sm:$0xf] }
 0x157   : > { %3275 = vmatpush.bf16.msrb.mxu0 %v5745_v34  ;;  %v6709_v28 = vor.u32 %v8194_v23, %v6708_v22  ;;  %v7093_v34 = vor.u32 %v8290_v25, %v7092_v24  ;;  %v6901_v30 = vor.u32 %v8242_v19, %v6900_v18  ;;  %v8134_v35 = vld [vmem:[%s8622_s20 + $0x6b4] sm:$0xf0]  ;;  %v7984_v18 = vld [vmem:[%s8622_s20 + $0x20c] sm:$0xf]  ;;  %v5894_v19 = vld [vmem:[%s8622_s20 + $0x238] sm:$0xf0] }
 0x158   : > { %3288 = vmatpush.bf16.msrb.mxu1 %v6129_v37  ;;  %v8182_v37 = vld [vmem:[%s8622_s20 + $0x834] sm:$0xf0] }
 0x159   : > { %3301 = vmatpush.bf16.msrb.mxu2 %v6513_v38  ;;  %v7044_v38 = vld [vmem:[%s8622_s20 + $0xb08] sm:$0xf]  ;;  %v6661_v42 = vor.u32 %v8182_v37, %v6660_v36  ;;  %v8122_v49 = vld [vmem:[%s8622_s20 + $0x654] sm:$0xf0] }
 0x15a   : > { %3314 = vmatpush.bf16.msrb.mxu3 %v6897_v43  ;;  %v5844_v43 = vld [vmem:[%s8622_s20 + $0x1a8] sm:$0xf]  ;;  %v7045_v46 = vor.u32 %v8278_v39, %v7044_v38  ;;  %v8230_v38 = vld [vmem:[%s8622_s20 + $0x9b4] sm:$0xf0] }
 0x15b   : > { %3276 = vmatpush.bf16.msrb.mxu0 %v5697_v50  ;;  %v6996_v50 = vld [vmem:[%s8622_s20 + $0xaa8] sm:$0xf]  ;;  %v5845_v52 = vor.u32 %v7978_v44, %v5844_v43 }
 0x15c   : > { %3289 = vmatpush.bf16.msrb.mxu1 %v6081_v53  ;;  %v6997_v60 = vor.u32 %v8266_v51, %v6996_v50  ;;  %v6852_v37 = vld [vmem:[%s8622_s20 + $0x988] sm:$0xf]  ;;  %v8218_v51 = vld [vmem:[%s8622_s20 + $0x954] sm:$0xf0] }
 0x15d   : > { %3302 = vmatpush.bf16.msrb.mxu2 %v6465_v54  ;;  %v6229_v54 = vor.u32 %v8074_v47, %v6228_v45  ;;  %v6036_v44 = vld [vmem:[%s8622_s20 + $0x328] sm:$0xf]  ;;  %v8026_v45 = vld [vmem:[%s8622_s20 + $0x354] sm:$0xf0]  ;;  %v6853_v48 = vor.u32 %v8230_v38, %v6852_v37  ;;  %v8164_v37 = vld [vmem:[%s8622_s20 + $0x7ac] sm:$0xf] }
 0x15e   : > { %3315 = vmatpush.bf16.msrb.mxu3 %v6849_v59  ;;  %v6804_v50 = vld [vmem:[%s8622_s20 + $0x928] sm:$0xf]  ;;  %v6614_v38 = vld [vmem:[%s8622_s20 + $0x7d8] sm:$0xf0] }
 0x15f   : > { %3277 = vmatpush.bf16.msrb.mxu0 %v5649_v3  ;;  %v3071_v53 = vpop.f32.mrf.mxu0  ;;  %v5797_v3 = vor.u32 %v7966_v57, %v5796_v56  ;;  %v6374_v57 = vld [vmem:[%s8622_s20 + $0x5f8] sm:$0xf0] }
 0x160   : > { %3290 = vmatpush.bf16.msrb.mxu1 %v6033_v7  ;;  %v3084_v59 = vpop.f32.mrf.mxu1  ;;  %v7954_v7 = vld [vmem:[%s8622_s20 + $0x114] sm:$0xf0] }
 0x161   : > { %3303 = vmatpush.bf16.msrb.mxu2 %v6417_v8  ;;  %v3085_v0 = vadd.f32 %v3084_v59, %v3071_v53  ;;  %v6132_v8 = vld [vmem:[%s8622_s20 + $0x3e8] sm:$0xf]  ;;  %v5749_v21 = vor.u32 %v7954_v7, %v5748_v6  ;;  %v8008_v53 = vld [vmem:[%s8622_s20 + $0x2cc] sm:$0xf]  ;;  %v6758_v59 = vld [vmem:[%s8622_s20 + $0x8f8] sm:$0xf0]  ;;  %v7145_v7 = vor.u32 %v8296_v62, %v7142_v63 }
 0x162   : > { %3316 = vmatpush.bf16.msrb.mxu3 %v6801_v11  ;;  %3278 = vmatmul.bf16.vlgmr.msrb.gmra.mxu0 %v8734_v31  ;;  %v8050_v11 = vld [vmem:[%s8622_s20 + $0x414] sm:$0xf0]  ;;  %v8092_v6 = vld [vmem:[%s8622_s20 + $0x56c] sm:$0xf] }
 0x163   : > { %3322 = vmatpush.bf16.msra.mxu0 %v5989_v12  ;;  %3291 = vmatmul.bf16.vlgmr.msrb.gmra.mxu1 %v8736_v32  ;;  %v6516_v12 = vld [vmem:[%s8622_s20 + $0x6e8] sm:$0xf]  ;;  %v6133_v24 = vor.u32 %v8050_v11, %v6132_v8  ;;  %v6326_v8 = vld [vmem:[%s8622_s20 + $0x598] sm:$0xf0]  ;;  %v8284_v11 = vld [vmem:[%s8622_s20 + $0xb6c] sm:$0xf] }
 0x164   : > { %3335 = vmatpush.bf16.msra.mxu1 %v6373_v13  ;;  %3304 = vmatmul.bf16.vlgmr.msrb.gmra.mxu2 %v8722_v16  ;;  %v8146_v13 = vld [vmem:[%s8622_s20 + $0x714] sm:$0xf0] }
 0x165   : > { %3348 = vmatpush.bf16.msra.mxu2 %v6757_v14  ;;  %3317 = vmatmul.bf16.vlgmr.msrb.gmra.mxu3 %v8724_v17  ;;  %v6517_v25 = vor.u32 %v8146_v13, %v6516_v12  ;;  %v7094_v12 = vld [vmem:[%s8622_s20 + $0xb98] sm:$0xf0] }
 0x166   : > { %3361 = vmatpush.bf16.msra.mxu3 %v7141_v20  ;;  %v475_v20 = vld [vmem:[#allocation2 + $0x20] sm:$0xff] }
 0x167   : > { %3323 = vmatpush.bf16.msra.mxu0 %v5941_v26  ;;  %v3097_v9 = vpop.f32.mrf.mxu2  ;;  %v3073_v23 = vpop.f32.mrf.mxu0  ;;  %v5700_v26 = vld [vmem:[%s8622_s20 + $0x88] sm:$0xf] }
 0x168   : > { %3336 = vmatpush.bf16.msra.mxu1 %v6325_v27  ;;  %v3098_v14 = vadd.f32 %v3097_v9, %v3085_v0  ;;  %v3110_v15 = vpop.f32.mrf.mxu3  ;;  %v7942_v27 = vld [vmem:[%s8622_s20 + $0xb4] sm:$0xf0]  ;;  %v3086_v29 = vpop.f32.mrf.mxu1  ;;  %v6805_v0 = vor.u32 %v8218_v51, %v6804_v50  ;;  %v8188_v9 = vld [vmem:[%s8622_s20 + $0x86c] sm:$0xf]  ;;  %v6182_v50 = vld [vmem:[%s8622_s20 + $0x478] sm:$0xf0] }
 0x169   : > { %3349 = vmatpush.bf16.msra.mxu2 %v6709_v28  ;;  %v6084_v28 = vld [vmem:[%s8622_s20 + $0x388] sm:$0xf]  ;;  %v5701_v39 = vor.u32 %v7942_v27, %v5700_v26  ;;  %v8176_v23 = vld [vmem:[%s8622_s20 + $0x80c] sm:$0xf]  ;;  %v7046_v26 = vld [vmem:[%s8622_s20 + $0xb38] sm:$0xf0]  ;;  %v5897_v27 = vor.u32 %v7984_v18, %v5894_v19 }
 0x16a   : > { %3362 = vmatpush.bf16.msra.mxu3 %v7093_v34  ;;  %v3111_v22 = vadd.f32 %v3110_v15, %v3098_v14  ;;  %v6468_v34 = vld [vmem:[%s8622_s20 + $0x688] sm:$0xf]  ;;  %v6329_v14 = vor.u32 %v8092_v6, %v6326_v8  ;;  %v8152_v51 = vld [vmem:[%s8622_s20 + $0x74c] sm:$0xf]  ;;  %v6902_v6 = vld [vmem:[%s8622_s20 + $0xa18] sm:$0xf0] }
 0x16b   : > { %3324 = vmatpush.bf16.msra.mxu0 %v5893_v40  ;;  %v5652_v40 = vld [vmem:[%s8622_s20 + $0x28] sm:$0xf]  ;;  %v6469_v43 = vor.u32 %v8134_v35, %v6468_v34  ;;  %v8068_v34 = vld [vmem:[%s8622_s20 + $0x4ac] sm:$0xf] }
 0x16c   : > { %3337 = vmatpush.bf16.msra.mxu1 %v6277_v41  ;;  %v3431_v36 = vadd.f32 %v3111_v22, %v475_v20  ;;  %v7930_v41 = vld [vmem:[%s8622_s20 + $0x54] sm:$0xf0]  ;;  %v8080_v20 = vld [vmem:[%s8622_s20 + $0x50c] sm:$0xf]  ;;  %v6278_v22 = vld [vmem:[%s8622_s20 + $0x538] sm:$0xf0] }
 0x16d   : > { %3350 = vmatpush.bf16.msra.mxu2 %v6661_v42  ;;  %v6085_v42 = vor.u32 %v8038_v33, %v6084_v28  ;;  %v5653_v56 = vor.u32 %v7930_v41, %v5652_v40  ;;  %v6281_v28 = vor.u32 %v8080_v20, %v6278_v22  ;;  %v5846_v33 = vld [vmem:[%s8622_s20 + $0x1d8] sm:$0xf0] }
 0x16e   : > { %3363 = vmatpush.bf16.msra.mxu3 %v7045_v46  ;;  %3443 = vst [vmem:[#allocation2 + $0x20] sm:$0xff] %v3431_v36  ;;  %v6420_v46 = vld [vmem:[%s8622_s20 + $0x628] sm:$0xf]  ;;  %v6230_v36 = vld [vmem:[%s8622_s20 + $0x4d8] sm:$0xf0] }
 0x16f   : > { %3325 = vmatpush.bf16.msra.mxu0 %v5845_v52  ;;  %v3099_v47 = vpop.f32.mrf.mxu2  ;;  %v6421_v61 = vor.u32 %v8122_v49, %v6420_v46  ;;  %v6998_v40 = vld [vmem:[%s8622_s20 + $0xad8] sm:$0xf0] }
 0x170   : > { %3338 = vmatpush.bf16.msra.mxu1 %v6229_v54  ;;  %v3112_v52 = vpop.f32.mrf.mxu3  ;;  %v5990_v54 = vld [vmem:[%s8622_s20 + $0x2f8] sm:$0xf0]  ;;  %v8056_v47 = vld [vmem:[%s8622_s20 + $0x44c] sm:$0xf] }
 0x171   : > { %3351 = vmatpush.bf16.msra.mxu2 %v6613_v55  ;;  %v8104_v55 = vld [vmem:[%s8622_s20 + $0x5cc] sm:$0xf]  ;;  %v5993_v1 = vor.u32 %v8008_v53, %v5990_v54  ;;  %v5798_v46 = vld [vmem:[%s8622_s20 + $0x178] sm:$0xf0] }
 0x172   : > { %3364 = vmatpush.bf16.msra.mxu3 %v6997_v60  ;;  %v6037_v60 = vor.u32 %v8026_v45, %v6036_v44  ;;  %v6377_v2 = vor.u32 %v8104_v55, %v6374_v57  ;;  %v6617_v44 = vor.u32 %v8164_v37, %v6614_v38  ;;  %v7960_v45 = vld [vmem:[%s8622_s20 + $0x14c] sm:$0xf]  ;;  %v6566_v52 = vld [vmem:[%s8622_s20 + $0x778] sm:$0xf0]  ;;  %v6185_v57 = vor.u32 %v8056_v47, %v6182_v50 }
 0x173   : > { %3326 = vmatpush.bf16.msra.mxu0 %v5797_v3  ;;  %v6761_v3 = vor.u32 %v8200_v58, %v6758_v59  ;;  %v8248_v54 = vld [vmem:[%s8622_s20 + $0xa4c] sm:$0xf]  ;;  %v6950_v55 = vld [vmem:[%s8622_s20 + $0xa78] sm:$0xf0]  ;;  %v6569_v58 = vor.u32 %v8152_v51, %v6566_v52 }
 0x174   : > { %3339 = vmatpush.bf16.msra.mxu1 %v6181_v4  ;;  %v7996_v4 = vld [vmem:[%s8622_s20 + $0x26c] sm:$0xf]  ;;  %v6953_v63 = vor.u32 %v8248_v54, %v6950_v55  ;;  %v6086_v20 = vld [vmem:[%s8622_s20 + $0x3b8] sm:$0xf0] }
 0x175   : > { %3352 = vmatpush.bf16.msra.mxu2 %v6565_v5  ;;  %v5942_v5 = vld [vmem:[%s8622_s20 + $0x298] sm:$0xf0]  ;;  %v7948_v59 = vld [vmem:[%s8622_s20 + $0xec] sm:$0xf] }
 0x176   : > { %3365 = vmatpush.bf16.msra.mxu3 %v6949_v10  ;;  %v6710_v10 = vld [vmem:[%s8622_s20 + $0x898] sm:$0xf0]  ;;  %v5945_v13 = vor.u32 %v7996_v4, %v5942_v5  ;;  %v8236_v5 = vld [vmem:[%s8622_s20 + $0x9ec] sm:$0xf] }
 0x177   : > { %3327 = vmatpush.bf16.msra.mxu0 %v5749_v21  ;;  %v6713_v15 = vor.u32 %v8188_v9, %v6710_v10  ;;  %v7097_v21 = vor.u32 %v8284_v11, %v7094_v12  ;;  %v6905_v19 = vor.u32 %v8236_v5, %v6902_v6  ;;  %v6470_v22 = vld [vmem:[%s8622_s20 + $0x6b8] sm:$0xf0]  ;;  %v8116_v37 = vld [vmem:[%s8622_s20 + $0x62c] sm:$0xf] }
 0x178   : > { %3340 = vmatpush.bf16.msra.mxu1 %v6133_v24  ;;  %v6662_v24 = vld [vmem:[%s8622_s20 + $0x838] sm:$0xf0] }
 0x179   : > { %3353 = vmatpush.bf16.msra.mxu2 %v6517_v25  ;;  %v8272_v25 = vld [vmem:[%s8622_s20 + $0xb0c] sm:$0xf]  ;;  %v6665_v29 = vor.u32 %v8176_v23, %v6662_v24  ;;  %v6422_v38 = vld [vmem:[%s8622_s20 + $0x658] sm:$0xf0] }
 0x17a   : > { %3366 = vmatpush.bf16.msra.mxu3 %v6901_v30  ;;  %v7972_v30 = vld [vmem:[%s8622_s20 + $0x1ac] sm:$0xf]  ;;  %v7049_v35 = vor.u32 %v8272_v25, %v7046_v26  ;;  %v6854_v25 = vld [vmem:[%s8622_s20 + $0x9b8] sm:$0xf0] }
 0x17b   : > { %3328 = vmatpush.bf16.msra.mxu0 %v5701_v39  ;;  %v8260_v39 = vld [vmem:[%s8622_s20 + $0xaac] sm:$0xf]  ;;  %v5849_v41 = vor.u32 %v7972_v30, %v5846_v33  ;;  %v5654_v30 = vld [vmem:[%s8622_s20 + $0x58] sm:$0xf0] }
 0x17c   : > { %3341 = vmatpush.bf16.msra.mxu1 %v6085_v42  ;;  %v7001_v49 = vor.u32 %v8260_v39, %v6998_v40  ;;  %v8224_v24 = vld [vmem:[%s8622_s20 + $0x98c] sm:$0xf]  ;;  %v477_v52 = vld [vmem:[#allocation2 + $0x38] sm:$0xff] }
 0x17d   : > { %3354 = vmatpush.bf16.msra.mxu2 %v6469_v43  ;;  %v6233_v43 = vor.u32 %v8068_v34, %v6230_v36  ;;  %v8020_v33 = vld [vmem:[%s8622_s20 + $0x32c] sm:$0xf]  ;;  %v6038_v36 = vld [vmem:[%s8622_s20 + $0x358] sm:$0xf0] }
 0x17e   : > { %3367 = vmatpush.bf16.msra.mxu3 %v6853_v48  ;;  %v8212_v40 = vld [vmem:[%s8622_s20 + $0x92c] sm:$0xf] }
 0x17f   : > { %3329 = vmatpush.bf16.msra.mxu0 %v5653_v56  ;;  %v3123_v42 = vpop.f32.mrf.mxu0  ;;  %v5801_v56 = vor.u32 %v7960_v45, %v5798_v46 }
 0x180   : > { %3342 = vmatpush.bf16.msra.mxu1 %v6037_v60  ;;  %v3136_v48 = vpop.f32.mrf.mxu1  ;;  %v5750_v60 = vld [vmem:[%s8622_s20 + $0x118] sm:$0xf0] }
 0x181   : > { %3355 = vmatpush.bf16.msra.mxu2 %v6421_v61  ;;  %v3137_v53 = vadd.f32 %v3136_v48, %v3123_v42  ;;  %v8044_v61 = vld [vmem:[%s8622_s20 + $0x3ec] sm:$0xf]  ;;  %v5753_v8 = vor.u32 %v7948_v59, %v5750_v60 }
 0x182   : > { %3368 = vmatpush.bf16.msra.mxu3 %v6805_v0  ;;  %3330 = vmatmul.bf16.vlgmr.msra.gmra.mxu0 %v8734_v31  ;;  %v6134_v0 = vld [vmem:[%s8622_s20 + $0x418] sm:$0xf0] }
 0x183   : > { %3374 = vmatpush.bf16.msrb.mxu0 %v5993_v1  ;;  %3343 = vmatmul.bf16.vlgmr.msra.gmra.mxu1 %v8736_v32  ;;  %v8140_v1 = vld [vmem:[%s8622_s20 + $0x6ec] sm:$0xf]  ;;  %v6137_v11 = vor.u32 %v8044_v61, %v6134_v0 }
 0x184   : > { %3387 = vmatpush.bf16.msrb.mxu1 %v6377_v2  ;;  %3356 = vmatmul.bf16.vlgmr.msra.gmra.mxu2 %v8722_v16  ;;  %v6518_v2 = vld [vmem:[%s8622_s20 + $0x718] sm:$0xf0]  ;;  %v478_v61 = vld [vmem:[#allocation2 + $0x28] sm:$0xff] }
 0x185   : > { %3400 = vmatpush.bf16.msrb.mxu2 %v6761_v3  ;;  %3369 = vmatmul.bf16.vlgmr.msra.gmra.mxu3 %v8724_v17  ;;  %v6521_v12 = vor.u32 %v8140_v1, %v6518_v2 }
 0x186   : > { %3413 = vmatpush.bf16.msrb.mxu3 %v7145_v7  ;;  %v476_v7 = vld [vmem:[#allocation2 + $0x8] sm:$0xff] }
 0x187   : > { %3375 = vmatpush.bf16.msrb.mxu0 %v5945_v13  ;;  %v3149_v62 = vpop.f32.mrf.mxu2  ;;  %v3125_v10 = vpop.f32.mrf.mxu0  ;;  %v7936_v13 = vld [vmem:[%s8622_s20 + $0x8c] sm:$0xf] }
 0x188   : > { %3388 = vmatpush.bf16.msrb.mxu1 %v6329_v14  ;;  %v3150_v3 = vadd.f32 %v3149_v62, %v3137_v53  ;;  %v3162_v4 = vpop.f32.mrf.mxu3  ;;  %v5702_v14 = vld [vmem:[%s8622_s20 + $0xb8] sm:$0xf0]  ;;  %v3138_v18 = vpop.f32.mrf.mxu1  ;;  %v479_v10 = vld [vmem:[#allocation2 + $0x48] sm:$0xff] }
 0x189   : > { %3401 = vmatpush.bf16.msrb.mxu2 %v6713_v15  ;;  %v8032_v15 = vld [vmem:[%s8622_s20 + $0x38c] sm:$0xf]  ;;  %v5705_v26 = vor.u32 %v7936_v13, %v5702_v14 }
 0x18a   : > { %3414 = vmatpush.bf16.msrb.mxu3 %v7097_v21  ;;  %v3163_v9 = vadd.f32 %v3162_v4, %v3150_v3  ;;  %v8128_v21 = vld [vmem:[%s8622_s20 + $0x68c] sm:$0xf] }
 0x18b   : > { %3376 = vmatpush.bf16.msrb.mxu0 %v5897_v27  ;;  %v6089_v27 = vor.u32 %v8032_v15, %v6086_v20 }
 0x18c   : > { %3389 = vmatpush.bf16.msrb.mxu1 %v6281_v28  ;;  %v3432_v23 = vadd.f32 %v3163_v9, %v476_v7  ;;  %v6473_v28 = vor.u32 %v8128_v21, %v6470_v22 }
 0x18d   : > { %3402 = vmatpush.bf16.msrb.mxu2 %v6665_v29  ;;  %v7924_v29 = vld [vmem:[%s8622_s20 + $0x2c] sm:$0xf] }
 0x18e   : > { %3415 = vmatpush.bf16.msrb.mxu3 %v7049_v35  ;;  %3444 = vst [vmem:[#allocation2 + $0x8] sm:$0xff] %v3432_v23  ;;  %v6857_v35 = vor.u32 %v8224_v24, %v6854_v25  ;;  %v5657_v42 = vor.u32 %v7924_v29, %v5654_v30  ;;  %v480_v25 = vld [vmem:[#allocation2 + $0x10] sm:$0xff] }
 0x18f   : > { %3377 = vmatpush.bf16.msrb.mxu0 %v5849_v41  ;;  %v3151_v34 = vpop.f32.mrf.mxu2  ;;  %v6806_v41 = vld [vmem:[%s8622_s20 + $0x958] sm:$0xf0] }
 0x190   : > { %3390 = vmatpush.bf16.msrb.mxu1 %v6233_v43  ;;  %v3164_v39 = vpop.f32.mrf.mxu3  ;;  %v6041_v43 = vor.u32 %v8020_v33, %v6038_v36  ;;  %v6809_v45 = vor.u32 %v8212_v40, %v6806_v41  ;;  %v481_v41 = vld [vmem:[#allocation2 + $0x40] sm:$0xff] }
 0x191   : > { %3403 = vmatpush.bf16.msrb.mxu2 %v6617_v44  ;;  %v6425_v44 = vor.u32 %v8116_v37, %v6422_v38 }
 0x192   : > { %3416 = vmatpush.bf16.msrb.mxu3 %v7001_v49 }
 0x193   : > { %3378 = vmatpush.bf16.msrb.mxu0 %v5801_v56 }
 0x194   : > { %3391 = vmatpush.bf16.msrb.mxu1 %v6185_v57 }
 0x195   : > { %3404 = vmatpush.bf16.msrb.mxu2 %v6569_v58 }
 0x196   : > { %3417 = vmatpush.bf16.msrb.mxu3 %v6953_v63 }
 0x197   : > { %3379 = vmatpush.bf16.msrb.mxu0 %v5753_v8 }
 0x198   : > { %3392 = vmatpush.bf16.msrb.mxu1 %v6137_v11 }
 0x199   : > { %3405 = vmatpush.bf16.msrb.mxu2 %v6521_v12 }
 0x19a   : > { %3418 = vmatpush.bf16.msrb.mxu3 %v6905_v19 }
 0x19b   : > { %3380 = vmatpush.bf16.msrb.mxu0 %v5705_v26 }
 0x19c   : > { %3393 = vmatpush.bf16.msrb.mxu1 %v6089_v27 }
 0x19d   : > { %3406 = vmatpush.bf16.msrb.mxu2 %v6473_v28 }
 0x19e   : > { %3419 = vmatpush.bf16.msrb.mxu3 %v6857_v35 }
 0x19f   : > { %3381 = vmatpush.bf16.msrb.mxu0 %v5657_v42  ;;  %v3175_v46 = vpop.f32.mrf.mxu0 }
 0x1a0   : > { %3394 = vmatpush.bf16.msrb.mxu1 %v6041_v43  ;;  %v3188_v47 = vpop.f32.mrf.mxu1 }
 0x1a1   : > { %3407 = vmatpush.bf16.msrb.mxu2 %v6425_v44  ;;  %v3189_v48 = vadd.f32 %v3188_v47, %v3175_v46 }
 0x1a2   : > { %3420 = vmatpush.bf16.msrb.mxu3 %v6809_v45  ;;  %3382 = vmatmul.bf16.vlgmr.msrb.gmra.mxu0 %v8734_v31 }
 0x1a3   : > { %3395 = vmatmul.bf16.vlgmr.msrb.gmra.mxu1 %v8736_v32 }
 0x1a4   : > { %3408 = vmatmul.bf16.vlgmr.msrb.gmra.mxu2 %v8722_v16 }
 0x1a5   : > { %3421 = vmatmul.bf16.vlgmr.msrb.gmra.mxu3 %v8724_v17 }
 0x1a7   : > { %v3201_v49 = vpop.f32.mrf.mxu2  ;;  %v3177_v54 = vpop.f32.mrf.mxu0 }
 0x1a8   : > { %v3202_v50 = vadd.f32 %v3201_v49, %v3189_v48  ;;  %v3214_v51 = vpop.f32.mrf.mxu3  ;;  %v3190_v55 = vpop.f32.mrf.mxu1 }
 0x1aa   : > { %v3215_v53 = vadd.f32 %v3214_v51, %v3202_v50 }
 0x1ac   : > { %v3433_v56 = vadd.f32 %v3215_v53, %v477_v52 }
 0x1ae   : > { %3445 = vst [vmem:[#allocation2 + $0x38] sm:$0xff] %v3433_v56 }
 0x1af   : > { %v3203_v57 = vpop.f32.mrf.mxu2 }
 0x1b0   : > { %v3216_v31 = vpop.f32.mrf.mxu3 }
 0x1bf   : > { %v3227_v58 = vpop.f32.mrf.mxu0 }
 0x1c0   : > { %v3240_v32 = vpop.f32.mrf.mxu1 }
 0x1c1   : > { %v3241_v59 = vadd.f32 %v3240_v32, %v3227_v58 }
 0x1c7   : > { %v3253_v16 = vpop.f32.mrf.mxu2  ;;  %v3229_v63 = vpop.f32.mrf.mxu0 }
 0x1c8   : > { %v3254_v60 = vadd.f32 %v3253_v16, %v3241_v59  ;;  %v3266_v17 = vpop.f32.mrf.mxu3  ;;  %v3242_v0 = vpop.f32.mrf.mxu1 }
 0x1ca   : > { %v3267_v62 = vadd.f32 %v3266_v17, %v3254_v60 }
 0x1cc   : > { %v3434_v1 = vadd.f32 %v3267_v62, %v478_v61 }
 0x1ce   : > { %3446 = vst [vmem:[#allocation2 + $0x28] sm:$0xff] %v3434_v1 }
 0x1cf   : > { %v3255_v2 = vpop.f32.mrf.mxu2 }
 0x1d0   : > { %v3268_v3 = vpop.f32.mrf.mxu3 }
 0x1df   : > { %v3279_v4 = vpop.f32.mrf.mxu0 }
 0x1e0   : > { %v3292_v5 = vpop.f32.mrf.mxu1 }
 0x1e1   : > { %v3293_v6 = vadd.f32 %v3292_v5, %v3279_v4 }
 0x1e7   : > { %v3305_v7 = vpop.f32.mrf.mxu2  ;;  %v3281_v12 = vpop.f32.mrf.mxu0 }
 0x1e8   : > { %v3306_v8 = vadd.f32 %v3305_v7, %v3293_v6  ;;  %v3318_v9 = vpop.f32.mrf.mxu3  ;;  %v3294_v13 = vpop.f32.mrf.mxu1 }
 0x1ea   : > { %v3319_v11 = vadd.f32 %v3318_v9, %v3306_v8 }
 0x1ec   : > { %v3435_v14 = vadd.f32 %v3319_v11, %v479_v10 }
 0x1ee   : > { %3447 = vst [vmem:[#allocation2 + $0x48] sm:$0xff] %v3435_v14 }
 0x1ef   : > { %v3307_v15 = vpop.f32.mrf.mxu2 }
 0x1f0   : > { %v3320_v18 = vpop.f32.mrf.mxu3 }
 0x1ff   : > { %v3331_v19 = vpop.f32.mrf.mxu0 }
 0x200   : > { %v3344_v20 = vpop.f32.mrf.mxu1 }
 0x201   : > { %v3345_v21 = vadd.f32 %v3344_v20, %v3331_v19 }
 0x207   : > { %v3357_v22 = vpop.f32.mrf.mxu2  ;;  %v3333_v27 = vpop.f32.mrf.mxu0 }
 0x208   : > { %v3358_v23 = vadd.f32 %v3357_v22, %v3345_v21  ;;  %v3370_v24 = vpop.f32.mrf.mxu3  ;;  %v3346_v28 = vpop.f32.mrf.mxu1 }
 0x20a   : > { %v3371_v26 = vadd.f32 %v3370_v24, %v3358_v23 }
 0x20c   : > { %v3436_v29 = vadd.f32 %v3371_v26, %v480_v25 }
 0x20e   : > { %3448 = vst [vmem:[#allocation2 + $0x10] sm:$0xff] %v3436_v29 }
 0x20f   : > { %v3359_v30 = vpop.f32.mrf.mxu2 }
 0x210   : > { %v3372_v33 = vpop.f32.mrf.mxu3 }
 0x21f   : > { %v3383_v34 = vpop.f32.mrf.mxu0 }
 0x220   : > { %v3396_v35 = vpop.f32.mrf.mxu1 }
 0x221   : > { %v3397_v36 = vadd.f32 %v3396_v35, %v3383_v34 }
 0x227   : > { %v3409_v37 = vpop.f32.mrf.mxu2  ;;  %v3385_v40 = vpop.f32.mrf.mxu0 }
 0x228   : > { %v3410_v38 = vadd.f32 %v3409_v37, %v3397_v36  ;;  %v3422_v39 = vpop.f32.mrf.mxu3  ;;  %v3398_v42 = vpop.f32.mrf.mxu1 }
 0x22a   : > { %v3423_v43 = vadd.f32 %v3422_v39, %v3410_v38 }
 0x22c   : > { %v3437_v44 = vadd.f32 %v3423_v43, %v481_v41  ;;  %3453 = sbr.rel (%p7146_p6) target bundleno = 1196 (0x4ac), region = 80 }
 0x22e   : > { %3449 = vst [vmem:[#allocation2 + $0x40] sm:$0xff] %v3437_v44 }
 0x22f   : > { %v3411_v45 = vpop.f32.mrf.mxu2 }
 0x230   : > { %v3424_v46 = vpop.f32.mrf.mxu3 }
 0x231   : > { %v8310_v47 = vld [vmem:[%s10108_s3 + $0x38] sm:$0xff]  ;;  %v8309_v51 = vld [vmem:[%s10108_s3 + $0x30] sm:$0xff]  ;;  %v8308_v55 = vld [vmem:[%s10108_s3 + $0x28] sm:$0xff] }
 0x232   : > { %v8318_v48 = vld [vmem:[%s10108_s3 + $0x78] sm:$0xff]  ;;  %4302 = vmatpush.bf16.msra.mxu0 %v8310_v47  ;;  %v8317_v52 = vld [vmem:[%s10108_s3 + $0x70] sm:$0xff]  ;;  %v8316_v56 = vld [vmem:[%s10108_s3 + $0x68] sm:$0xff] }
 0x233   : > { %v8326_v49 = vld [vmem:[%s10108_s3 + $0xb8] sm:$0xff]  ;;  %4315 = vmatpush.bf16.msra.mxu1 %v8318_v48  ;;  %v8325_v53 = vld [vmem:[%s10108_s3 + $0xb0] sm:$0xff]  ;;  %v8324_v57 = vld [vmem:[%s10108_s3 + $0xa8] sm:$0xff] }
 0x234   : > { %v8334_v50 = vld [vmem:[%s10108_s3 + $0xf8] sm:$0xff]  ;;  %4328 = vmatpush.bf16.msra.mxu2 %v8326_v49  ;;  %v8333_v54 = vld [vmem:[%s10108_s3 + $0xf0] sm:$0xff]  ;;  %v8332_v31 = vld [vmem:[%s10108_s3 + $0xe8] sm:$0xff] }
 0x235   : > { %4341 = vmatpush.bf16.msra.mxu3 %v8334_v50  ;;  %v8307_v58 = vld [vmem:[%s10108_s3 + $0x20] sm:$0xff]  ;;  %v8306_v60 = vld [vmem:[%s10108_s3 + $0x18] sm:$0xff]  ;;  %v8305_v63 = vld [vmem:[%s10108_s3 + $0x10] sm:$0xff] }
 0x236   : > { %4303 = vmatpush.bf16.msra.mxu0 %v8309_v51  ;;  %v8315_v32 = vld [vmem:[%s10108_s3 + $0x60] sm:$0xff]  ;;  %v8314_v17 = vld [vmem:[%s10108_s3 + $0x58] sm:$0xff]  ;;  %v8313_v1 = vld [vmem:[%s10108_s3 + $0x50] sm:$0xff] }
 0x237   : > { %4316 = vmatpush.bf16.msra.mxu1 %v8317_v52  ;;  %v8323_v59 = vld [vmem:[%s10108_s3 + $0xa0] sm:$0xff]  ;;  %v8322_v61 = vld [vmem:[%s10108_s3 + $0x98] sm:$0xff]  ;;  %v8321_v2 = vld [vmem:[%s10108_s3 + $0x90] sm:$0xff] }
 0x238   : > { %4329 = vmatpush.bf16.msra.mxu2 %v8325_v53  ;;  %v8331_v16 = vld [vmem:[%s10108_s3 + $0xe0] sm:$0xff]  ;;  %v8330_v62 = vld [vmem:[%s10108_s3 + $0xd8] sm:$0xff]  ;;  %v8329_v3 = vld [vmem:[%s10108_s3 + $0xd0] sm:$0xff] }
 0x239   : > { %4342 = vmatpush.bf16.msra.mxu3 %v8333_v54  ;;  %v9518_v0 = vld [vmem:[%s10107_s2] sm:$0xff]  ;;  %v3456_v6 = vld [vmem:[#allocation2 + $0x58] sm:$0xff]  ;;  %v3454_v7 = vld [vmem:[#allocation2 + $0x30] sm:$0xff] }
 0x23a   : > { %4304 = vmatpush.bf16.msra.mxu0 %v8308_v55  ;;  %v3472_v4 = vperm.slane %v9518_v0, 2  ;;  %v3470_v5 = vperm.slane %v9518_v0, 0  ;;  %v3457_v8 = vld [vmem:[#allocation2 + $0x18] sm:$0xff]  ;;  %v3473_v9 = vperm.slane %v9518_v0, 3  ;;  %v3471_v10 = vperm.slane %v9518_v0, 1  ;;  %v3455_v11 = vld [vmem:[#allocation2] sm:$0xff] }
 0x23b   : > { %4317 = vmatpush.bf16.msra.mxu1 %v8316_v56  ;;  %v8304_v12 = vld [vmem:[%s10108_s3 + $0x8] sm:$0xff]  ;;  %v8303_v22 = vld [vmem:[%s10108_s3] sm:$0xff]  ;;  %v8342_v30 = vld [vmem:[%s10108_s3 + $0x138] sm:$0xff] }
 0x23c   : > { %4330 = vmatpush.bf16.msra.mxu2 %v8324_v57  ;;  %v8312_v13 = vld [vmem:[%s10108_s3 + $0x48] sm:$0xff]  ;;  %v3496_v14 = vadd.f32 %v3472_v4, %v3456_v6  ;;  %v3494_v15 = vadd.f32 %v3470_v5, %v3454_v7  ;;  %v3497_v20 = vadd.f32 %v3473_v9, %v3457_v8  ;;  %v3495_v21 = vadd.f32 %v3471_v10, %v3455_v11  ;;  %v8311_v23 = vld [vmem:[%s10108_s3 + $0x40] sm:$0xff]  ;;  %v8350_v33 = vld [vmem:[%s10108_s3 + $0x178] sm:$0xff] }
 0x23d   : > { %4343 = vmatpush.bf16.msra.mxu3 %v8332_v31  ;;  %v8320_v18 = vld [vmem:[%s10108_s3 + $0x88] sm:$0xff]  ;;  %v8319_v26 = vld [vmem:[%s10108_s3 + $0x80] sm:$0xff]  ;;  %v8358_v34 = vld [vmem:[%s10108_s3 + $0x1b8] sm:$0xff] }
 0x23e   : > { %4305 = vmatpush.bf16.msra.mxu0 %v8307_v58  ;;  %v8328_v19 = vld [vmem:[%s10108_s3 + $0xc8] sm:$0xff]  ;;  %v3508_v24 = vmax.f32 %v3496_v14, 0.0  ;;  %v3506_v25 = vmax.f32 %v3494_v15, 0.0  ;;  %v8327_v27 = vld [vmem:[%s10108_s3 + $0xc0] sm:$0xff]  ;;  %v3509_v28 = vmax.f32 %v3497_v20, 0.0  ;;  %v3507_v29 = vmax.f32 %v3495_v21, 0.0 }
 0x23f   : > { %4318 = vmatpush.bf16.msra.mxu1 %v8315_v32  ;;  %v8366_v35 = vld [vmem:[%s10108_s3 + $0x1f8] sm:$0xff]  ;;  %v8341_v40 = vld [vmem:[%s10108_s3 + $0x130] sm:$0xff]  ;;  %v8340_v44 = vld [vmem:[%s10108_s3 + $0x128] sm:$0xff]  ;;  %v3476_v58 = vperm.slane %v9518_v0, 6  ;;  %v3474_v32 = vperm.slane %v9518_v0, 4 }
 0x240   : > { %4331 = vmatpush.bf16.msra.mxu2 %v8323_v59  ;;  %v3520_v36 = vpack.c.bf16 %v3508_v24, %v3508_v24  ;;  %v3518_v37 = vpack.c.bf16 %v3506_v25, %v3506_v25  ;;  %v3521_v38 = vpack.c.bf16 %v3509_v28, %v3509_v28  ;;  %v3519_v39 = vpack.c.bf16 %v3507_v29, %v3507_v29  ;;  %v8349_v41 = vld [vmem:[%s10108_s3 + $0x170] sm:$0xff]  ;;  %v8348_v45 = vld [vmem:[%s10108_s3 + $0x168] sm:$0xff]  ;;  %v8339_v48 = vld [vmem:[%s10108_s3 + $0x120] sm:$0xff] }
 0x241   : > { %4344 = vmatpush.bf16.msra.mxu3 %v8331_v16  ;;  %v8357_v42 = vld [vmem:[%s10108_s3 + $0x1b0] sm:$0xff]  ;;  %v8356_v46 = vld [vmem:[%s10108_s3 + $0x1a8] sm:$0xff]  ;;  %v8347_v49 = vld [vmem:[%s10108_s3 + $0x160] sm:$0xff] }
 0x242   : > { %4306 = vmatpush.bf16.msra.mxu0 %v8306_v60  ;;  %v8365_v43 = vld [vmem:[%s10108_s3 + $0x1f0] sm:$0xff]  ;;  %v8364_v47 = vld [vmem:[%s10108_s3 + $0x1e8] sm:$0xff]  ;;  %v8355_v50 = vld [vmem:[%s10108_s3 + $0x1a0] sm:$0xff] }
 0x243   : > { %4319 = vmatpush.bf16.msra.mxu1 %v8314_v17  ;;  %v8363_v51 = vld [vmem:[%s10108_s3 + $0x1e0] sm:$0xff]  ;;  %v8338_v52 = vld [vmem:[%s10108_s3 + $0x118] sm:$0xff]  ;;  %v8337_v56 = vld [vmem:[%s10108_s3 + $0x110] sm:$0xff]  ;;  %v3477_v17 = vperm.slane %v9518_v0, 7 }
 0x244   : > { %4332 = vmatpush.bf16.msra.mxu2 %v8322_v61  ;;  %v8346_v53 = vld [vmem:[%s10108_s3 + $0x158] sm:$0xff]  ;;  %v8345_v57 = vld [vmem:[%s10108_s3 + $0x150] sm:$0xff]  ;;  %v3460_v16 = vld [vmem:[#allocation2 + $0x8] sm:$0xff]  ;;  %v3475_v61 = vperm.slane %v9518_v0, 5 }
 0x245   : > { %4345 = vmatpush.bf16.msra.mxu3 %v8330_v62  ;;  %v8354_v54 = vld [vmem:[%s10108_s3 + $0x198] sm:$0xff]  ;;  %v8353_v31 = vld [vmem:[%s10108_s3 + $0x190] sm:$0xff]  ;;  %v8352_v0 = vld [vmem:[%s10108_s3 + $0x188] sm:$0xff] }
 0x246   : > { %4307 = vmatpush.bf16.msra.mxu0 %v8305_v63  ;;  %v8362_v55 = vld [vmem:[%s10108_s3 + $0x1d8] sm:$0xff]  ;;  %v8361_v59 = vld [vmem:[%s10108_s3 + $0x1d0] sm:$0xff]  ;;  %v3459_v63 = vld [vmem:[#allocation2 + $0x20] sm:$0xff] }
 0x247   : > { %4320 = vmatpush.bf16.msra.mxu1 %v8313_v1  ;;  %v3458_v60 = vld [vmem:[#allocation2 + $0x50] sm:$0xff]  ;;  %v3461_v62 = vld [vmem:[#allocation2 + $0x38] sm:$0xff]  ;;  %v8336_v1 = vld [vmem:[%s10108_s3 + $0x108] sm:$0xff]  ;;  %v3499_v7 = vadd.f32 %v3475_v61, %v3459_v63 }
 0x248   : > { %4333 = vmatpush.bf16.msra.mxu2 %v8321_v2  ;;  %v8344_v2 = vld [vmem:[%s10108_s3 + $0x148] sm:$0xff]  ;;  %v3498_v4 = vadd.f32 %v3474_v32, %v3458_v60  ;;  %v3501_v6 = vadd.f32 %v3477_v17, %v3461_v62  ;;  %v8335_v8 = vld [vmem:[%s10108_s3 + $0x100] sm:$0xff]  ;;  %v8390_v20 = vld [vmem:[%s10108_s3 + $0x2b8] sm:$0xff] }
 0x249   : > { %4346 = vmatpush.bf16.msra.mxu3 %v8329_v3  ;;  %v3500_v3 = vadd.f32 %v3476_v58, %v3460_v16  ;;  %v8360_v5 = vld [vmem:[%s10108_s3 + $0x1c8] sm:$0xff]  ;;  %v8343_v9 = vld [vmem:[%s10108_s3 + $0x140] sm:$0xff]  ;;  %v3511_v15 = vmax.f32 %v3499_v7, 0.0  ;;  %v8398_v21 = vld [vmem:[%s10108_s3 + $0x2f8] sm:$0xff] }
 0x24a   : > { %4308 = vmatpush.bf16.msra.mxu0 %v8304_v12  ;;  %v3510_v11 = vmax.f32 %v3498_v4, 0.0  ;;  %v8351_v12 = vld [vmem:[%s10108_s3 + $0x180] sm:$0xff]  ;;  %v3513_v14 = vmax.f32 %v3501_v6, 0.0  ;;  %v8389_v28 = vld [vmem:[%s10108_s3 + $0x2b0] sm:$0xff]  ;;  %v8368_v58 = vld [vmem:[%s10108_s3 + $0x208] sm:$0xff] }
 0x24b   : > { %4321 = vmatpush.bf16.msra.mxu1 %v8312_v13  ;;  %v3512_v10 = vmax.f32 %v3500_v3, 0.0  ;;  %v8359_v13 = vld [vmem:[%s10108_s3 + $0x1c0] sm:$0xff]  ;;  %v3523_v25 = vpack.c.bf16 %v3511_v15, %v3511_v15  ;;  %v8397_v29 = vld [vmem:[%s10108_s3 + $0x2f0] sm:$0xff]  ;;  %v8376_v32 = vld [vmem:[%s10108_s3 + $0x248] sm:$0xff] }
 0x24c   : > { %4334 = vmatpush.bf16.msra.mxu2 %v8320_v18  ;;  %v8374_v18 = vld [vmem:[%s10108_s3 + $0x238] sm:$0xff]  ;;  %v3525_v24 = vpack.c.bf16 %v3513_v14, %v3513_v14  ;;  %v8384_v60 = vld [vmem:[%s10108_s3 + $0x288] sm:$0xff]  ;;  %v8367_v63 = vld [vmem:[%s10108_s3 + $0x200] sm:$0xff] }
 0x24d   : > { %4347 = vmatpush.bf16.msra.mxu3 %v8328_v19  ;;  %v8382_v19 = vld [vmem:[%s10108_s3 + $0x278] sm:$0xff]  ;;  %v8392_v17 = vld [vmem:[%s10108_s3 + $0x2c8] sm:$0xff]  ;;  %v8383_v4 = vld [vmem:[%s10108_s3 + $0x280] sm:$0xff] }
 0x24e   : > { %4309 = vmatpush.bf16.msra.mxu0 %v8303_v22  ;;  %v3524_v22 = vpack.c.bf16 %v3512_v10, %v3512_v10 }
 0x24f   : > { %4322 = vmatpush.bf16.msra.mxu1 %v8311_v23  ;;  %v3522_v23 = vpack.c.bf16 %v3510_v11, %v3510_v11 }
 0x250   : > { %4335 = vmatpush.bf16.msra.mxu2 %v8319_v26  ;;  %v8373_v26 = vld [vmem:[%s10108_s3 + $0x230] sm:$0xff] }
 0x251   : > { %4348 = vmatpush.bf16.msra.mxu3 %v8327_v27  ;;  %4310 = vmatmul.bf16.vlgmr.msra.gmra.mxu0 %v3518_v37  ;;  %v8381_v27 = vld [vmem:[%s10108_s3 + $0x270] sm:$0xff]  ;;  %v8379_v37 = vld [vmem:[%s10108_s3 + $0x260] sm:$0xff] }
 0x252   : > { %4354 = vmatpush.bf16.msrb.mxu0 %v8342_v30  ;;  %4323 = vmatmul.bf16.vlgmr.msra.gmra.mxu1 %v3519_v39  ;;  %v8372_v30 = vld [vmem:[%s10108_s3 + $0x228] sm:$0xff]  ;;  %v8395_v39 = vld [vmem:[%s10108_s3 + $0x2e0] sm:$0xff] }
 0x253   : > { %4367 = vmatpush.bf16.msrb.mxu1 %v8350_v33  ;;  %4336 = vmatmul.bf16.vlgmr.msra.gmra.mxu2 %v3520_v36  ;;  %v8380_v33 = vld [vmem:[%s10108_s3 + $0x268] sm:$0xff]  ;;  %v8371_v36 = vld [vmem:[%s10108_s3 + $0x220] sm:$0xff] }
 0x254   : > { %4380 = vmatpush.bf16.msrb.mxu2 %v8358_v34  ;;  %4349 = vmatmul.bf16.vlgmr.msra.gmra.mxu3 %v3521_v38  ;;  %v8388_v34 = vld [vmem:[%s10108_s3 + $0x2a8] sm:$0xff]  ;;  %v8387_v38 = vld [vmem:[%s10108_s3 + $0x2a0] sm:$0xff] }
 0x255   : > { %4393 = vmatpush.bf16.msrb.mxu3 %v8366_v35  ;;  %v8396_v35 = vld [vmem:[%s10108_s3 + $0x2e8] sm:$0xff] }
 0x256   : > { %4355 = vmatpush.bf16.msrb.mxu0 %v8341_v40  ;;  %v8370_v40 = vld [vmem:[%s10108_s3 + $0x218] sm:$0xff] }
 0x257   : > { %4368 = vmatpush.bf16.msrb.mxu1 %v8349_v41  ;;  %v8378_v41 = vld [vmem:[%s10108_s3 + $0x258] sm:$0xff] }
 0x258   : > { %4381 = vmatpush.bf16.msrb.mxu2 %v8357_v42  ;;  %v3467_v42 = vld [vmem:[%s10107_s2 + $0x8] sm:$0xf] }
 0x259   : > { %4394 = vmatpush.bf16.msrb.mxu3 %v8365_v43  ;;  %v8386_v43 = vld [vmem:[%s10108_s3 + $0x298] sm:$0xff] }
 0x25a   : > { %4356 = vmatpush.bf16.msrb.mxu0 %v8340_v44  ;;  %v8394_v44 = vld [vmem:[%s10108_s3 + $0x2d8] sm:$0xff] }
 0x25b   : > { %4369 = vmatpush.bf16.msrb.mxu1 %v8348_v45  ;;  %v8369_v45 = vld [vmem:[%s10108_s3 + $0x210] sm:$0xff] }
 0x25c   : > { %4382 = vmatpush.bf16.msrb.mxu2 %v8356_v46  ;;  %v8377_v46 = vld [vmem:[%s10108_s3 + $0x250] sm:$0xff] }
 0x25d   : > { %4395 = vmatpush.bf16.msrb.mxu3 %v8364_v47  ;;  %v3478_v47 = vperm.slane %v3467_v42, 0 }
 0x25e   : > { %4357 = vmatpush.bf16.msrb.mxu0 %v8339_v48  ;;  %v3479_v48 = vperm.slane %v3467_v42, 1 }
 0x25f   : > { %4370 = vmatpush.bf16.msrb.mxu1 %v8347_v49  ;;  %v8385_v49 = vld [vmem:[%s10108_s3 + $0x290] sm:$0xff] }
 0x260   : > { %4383 = vmatpush.bf16.msrb.mxu2 %v8355_v50  ;;  %v3462_v50 = vld [vmem:[#allocation2 + $0x28] sm:$0xff] }
 0x261   : > { %4396 = vmatpush.bf16.msrb.mxu3 %v8363_v51  ;;  %v3463_v51 = vld [vmem:[#allocation2 + $0x48] sm:$0xff] }
 0x262   : > { %4358 = vmatpush.bf16.msrb.mxu0 %v8338_v52  ;;  %v3480_v52 = vperm.slane %v3467_v42, 2 }
 0x263   : > { %4371 = vmatpush.bf16.msrb.mxu1 %v8346_v53  ;;  %v3481_v53 = vperm.slane %v3467_v42, 3 }
 0x264   : > { %4384 = vmatpush.bf16.msrb.mxu2 %v8354_v54  ;;  %v8393_v54 = vld [vmem:[%s10108_s3 + $0x2d0] sm:$0xff] }
 0x265   : > { %4397 = vmatpush.bf16.msrb.mxu3 %v8362_v55  ;;  %v3464_v55 = vld [vmem:[#allocation2 + $0x10] sm:$0xff] }
 0x266   : > { %4359 = vmatpush.bf16.msrb.mxu0 %v8337_v56  ;;  %v3465_v56 = vld [vmem:[#allocation2 + $0x40] sm:$0xff] }
 0x267   : > { %4372 = vmatpush.bf16.msrb.mxu1 %v8345_v57  ;;  %v3502_v57 = vadd.f32 %v3478_v47, %v3462_v50  ;;  %v3505_v16 = vadd.f32 %v3481_v53, %v3465_v56 }
 0x268   : > { %4385 = vmatpush.bf16.msrb.mxu2 %v8353_v31  ;;  %v3503_v31 = vadd.f32 %v3479_v48, %v3463_v51  ;;  %v4463_v48 = vlaneseq }
 0x269   : > { %4398 = vmatpush.bf16.msrb.mxu3 %v8361_v59  ;;  %v3504_v59 = vadd.f32 %v3480_v52, %v3464_v55  ;;  %v3514_v61 = vmax.f32 %v3502_v57, 0.0  ;;  %v3517_v3 = vmax.f32 %v3505_v16, 0.0  ;;  %v8528_v55 = vmov 0.0  }
 0x26a   : > { %4360 = vmatpush.bf16.msrb.mxu0 %v8336_v1  ;;  %v3515_v62 = vmax.f32 %v3503_v31, 0.0  ;;  %v8375_v1 = vld [vmem:[%s10108_s3 + $0x240] sm:$0xff]  ;;  %v4464_v50 = vshrl.u32 %v4463_v48, 7 }
 0x26b   : > { %4373 = vmatpush.bf16.msrb.mxu1 %v8344_v2  ;;  %v3516_v2 = vmax.f32 %v3504_v59, 0.0  ;;  %v8509_v48 = vld [vmem:[%s10112_s7] ss:$0 sm:$0xff] }
 0x26c   : > { %4386 = vmatpush.bf16.msrb.mxu2 %v8352_v0  ;;  %v8391_v0 = vld [vmem:[%s10108_s3 + $0x2c0] sm:$0xff]  ;;  %v3527_v6 = vpack.c.bf16 %v3515_v62, %v3515_v62  ;;  %vm4465_vm0 = vcmp.lt.s32.totalorder %v4464_v50, 2 }
 0x26d   : > { %4399 = vmatpush.bf16.msrb.mxu3 %v8360_v5  ;;  %v3526_v5 = vpack.c.bf16 %v3514_v61, %v3514_v61  ;;  %v3528_v7 = vpack.c.bf16 %v3516_v2, %v3516_v2  ;;  %v7532_v56 = vsel %vm4465_vm0, 1.0, %v8528_v55  ;;  %v8399_v55 = vld [vmem:[%s10116_s11] sm:$0xff] }
 0x26e   : > { %4361 = vmatpush.bf16.msrb.mxu0 %v8335_v8  ;;  %v3529_v8 = vpack.c.bf16 %v3517_v3, %v3517_v3 }
 0x26f   : > { %4374 = vmatpush.bf16.msrb.mxu1 %v8343_v9 }
 0x270   : > { %4387 = vmatpush.bf16.msrb.mxu2 %v8351_v12 }
 0x271   : > { %4400 = vmatpush.bf16.msrb.mxu3 %v8359_v13  ;;  %4362 = vmatmul.bf16.vlgmr.msrb.gmra.mxu0 %v3522_v23 }
 0x272   : > { %4406 = vmatpush.bf16.msra.mxu0 %v8374_v18  ;;  %4375 = vmatmul.bf16.vlgmr.msrb.gmra.mxu1 %v3523_v25 }
 0x273   : > { %4419 = vmatpush.bf16.msra.mxu1 %v8382_v19  ;;  %4388 = vmatmul.bf16.vlgmr.msrb.gmra.mxu2 %v3524_v22  ;;  %v8506_v19 = vld [vmem:[%s10109_s4] ss:$0 sm:$0xff] }
 0x274   : > { %4432 = vmatpush.bf16.msra.mxu2 %v8390_v20  ;;  %4401 = vmatmul.bf16.vlgmr.msrb.gmra.mxu3 %v3525_v24 }
 0x275   : > { %4445 = vmatpush.bf16.msra.mxu3 %v8398_v21 }
 0x276   : > { %4407 = vmatpush.bf16.msra.mxu0 %v8373_v26 }
 0x277   : > { %4420 = vmatpush.bf16.msra.mxu1 %v8381_v27 }
 0x278   : > { %4433 = vmatpush.bf16.msra.mxu2 %v8389_v28 }
 0x279   : > { %4446 = vmatpush.bf16.msra.mxu3 %v8397_v29 }
 0x27a   : > { %4408 = vmatpush.bf16.msra.mxu0 %v8372_v30 }
 0x27b   : > { %4421 = vmatpush.bf16.msra.mxu1 %v8380_v33 }
 0x27c   : > { %4434 = vmatpush.bf16.msra.mxu2 %v8388_v34 }
 0x27d   : > { %4447 = vmatpush.bf16.msra.mxu3 %v8396_v35 }
 0x27e   : > { %4409 = vmatpush.bf16.msra.mxu0 %v8371_v36 }
 0x27f   : > { %4422 = vmatpush.bf16.msra.mxu1 %v8379_v37 }
 0x280   : > { %4435 = vmatpush.bf16.msra.mxu2 %v8387_v38 }
 0x281   : > { %4448 = vmatpush.bf16.msra.mxu3 %v8395_v39 }
 0x282   : > { %4410 = vmatpush.bf16.msra.mxu0 %v8370_v40 }
 0x283   : > { %4423 = vmatpush.bf16.msra.mxu1 %v8378_v41 }
 0x284   : > { %4436 = vmatpush.bf16.msra.mxu2 %v8386_v43 }
 0x285   : > { %4449 = vmatpush.bf16.msra.mxu3 %v8394_v44 }
 0x286   : > { %4411 = vmatpush.bf16.msra.mxu0 %v8369_v45 }
 0x287   : > { %4424 = vmatpush.bf16.msra.mxu1 %v8377_v46 }
 0x288   : > { %4437 = vmatpush.bf16.msra.mxu2 %v8385_v49 }
 0x289   : > { %4450 = vmatpush.bf16.msra.mxu3 %v8393_v54 }
 0x28a   : > { %4412 = vmatpush.bf16.msra.mxu0 %v8368_v58 }
 0x28b   : > { %4425 = vmatpush.bf16.msra.mxu1 %v8376_v32 }
 0x28c   : > { %4438 = vmatpush.bf16.msra.mxu2 %v8384_v60 }
 0x28d   : > { %4451 = vmatpush.bf16.msra.mxu3 %v8392_v17 }
 0x28e   : > { %4413 = vmatpush.bf16.msra.mxu0 %v8367_v63 }
 0x28f   : > { %4426 = vmatpush.bf16.msra.mxu1 %v8375_v1 }
 0x290   : > { %4439 = vmatpush.bf16.msra.mxu2 %v8383_v4 }
 0x291   : > { %4452 = vmatpush.bf16.msra.mxu3 %v8391_v0  ;;  %4414 = vmatmul.bf16.vlgmr.msra.gmra.mxu0 %v3526_v5 }
 0x292   : > { %4427 = vmatmul.bf16.vlgmr.msra.gmra.mxu1 %v3527_v6 }
 0x293   : > { %4440 = vmatmul.bf16.vlgmr.msra.gmra.mxu2 %v3528_v7  ;;  %v8406_v7 = vld [vmem:[%s10116_s11 + $0x38] sm:$0xff] }
 0x294   : > { %4453 = vmatmul.bf16.vlgmr.msra.gmra.mxu3 %v3529_v8  ;;  %v8414_v8 = vld [vmem:[%s10116_s11 + $0x78] sm:$0xff]  ;;  %5403 = vmatpush.bf16.msrb.mxu0 %v8406_v7 }
 0x295   : > { %5416 = vmatpush.bf16.msrb.mxu1 %v8414_v8  ;;  %v8434_v7 = vld [vmem:[%s10116_s11 + $0x118] sm:$0xff] }
 0x296   : > { %v8442_v8 = vld [vmem:[%s10116_s11 + $0x158] sm:$0xff] }
 0x2ce   : > { %v4311_v9 = vpop.f32.mrf.mxu0 }
 0x2cf   : > { %v4324_v10 = vpop.f32.mrf.mxu1  ;;  %v4312_v21 = vadd.f32 %v8506_v19, %v4311_v9  ;;  %v8422_v9 = vld [vmem:[%s10116_s11 + $0xb8] sm:$0xff]  ;;  %v8404_v19 = vld [vmem:[%s10116_s11 + $0x28] sm:$0xff] }
 0x2d0   : > { %5429 = vmatpush.bf16.msrb.mxu2 %v8422_v9  ;;  %v8450_v9 = vld [vmem:[%s10116_s11 + $0x198] sm:$0xff] }
 0x2d1   : > { %v4325_v23 = vadd.f32 %v4324_v10, %v4312_v21  ;;  %v8430_v10 = vld [vmem:[%s10116_s11 + $0xf8] sm:$0xff]  ;;  %v8420_v21 = vld [vmem:[%s10116_s11 + $0xa8] sm:$0xff] }
 0x2d2   : > { %5442 = vmatpush.bf16.msrb.mxu3 %v8430_v10  ;;  %v8458_v10 = vld [vmem:[%s10116_s11 + $0x1d8] sm:$0xff] }
 0x2d6   : > { %v4337_v11 = vpop.f32.mrf.mxu2  ;;  %v4313_v13 = vpop.f32.mrf.mxu0 }
 0x2d7   : > { %v4350_v12 = vpop.f32.mrf.mxu3  ;;  %v4326_v14 = vpop.f32.mrf.mxu1  ;;  %v4338_v27 = vadd.f32 %v4337_v11, %v4325_v23  ;;  %v8413_v13 = vld [vmem:[%s10116_s11 + $0x70] sm:$0xff]  ;;  %v8403_v23 = vld [vmem:[%s10116_s11 + $0x20] sm:$0xff] }
 0x2d8   : > { %v8421_v14 = vld [vmem:[%s10116_s11 + $0xb0] sm:$0xff]  ;;  %5417 = vmatpush.bf16.msrb.mxu1 %v8413_v13 }
 0x2d9   : > { %v4351_v29 = vadd.f32 %v4350_v12, %v4338_v27  ;;  %v8405_v12 = vld [vmem:[%s10116_s11 + $0x30] sm:$0xff]  ;;  %5430 = vmatpush.bf16.msrb.mxu2 %v8421_v14 }
 0x2da   : > { %5404 = vmatpush.bf16.msrb.mxu0 %v8405_v12  ;;  %v8441_v12 = vld [vmem:[%s10116_s11 + $0x150] sm:$0xff] }
 0x2db   : > { %v8449_v13 = vld [vmem:[%s10116_s11 + $0x190] sm:$0xff] }
 0x2dc   : > { %v8457_v14 = vld [vmem:[%s10116_s11 + $0x1d0] sm:$0xff] }
 0x2dd   : > { %5431 = vmatpush.bf16.msrb.mxu2 %v8420_v21  ;;  %v8456_v21 = vld [vmem:[%s10116_s11 + $0x1c8] sm:$0xff] }
 0x2de   : > { %v4339_v15 = vpop.f32.mrf.mxu2  ;;  %5405 = vmatpush.bf16.msrb.mxu0 %v8404_v19  ;;  %v4516_v19 = vstv %s4515_s15 }
 0x2df   : > { %v4352_v18 = vpop.f32.mrf.mxu3  ;;  %v8429_v15 = vld [vmem:[%s10116_s11 + $0xf0] sm:$0xff] }
 0x2e0   : > { %5443 = vmatpush.bf16.msrb.mxu3 %v8429_v15  ;;  %v8432_v15 = vld [vmem:[%s10116_s11 + $0x108] sm:$0xff] }
 0x2e2   : > { %5406 = vmatpush.bf16.msrb.mxu0 %v8403_v23 }
 0x2ee   : > { %v4363_v20 = vpop.f32.mrf.mxu0 }
 0x2ef   : > { %v4376_v22 = vpop.f32.mrf.mxu1  ;;  %v4364_v34 = vadd.f32 %v4363_v20, %v4351_v29  ;;  %v8412_v20 = vld [vmem:[%s10116_s11 + $0x68] sm:$0xff]  ;;  %v8402_v29 = vld [vmem:[%s10116_s11 + $0x18] sm:$0xff] }
 0x2f0   : > { %5418 = vmatpush.bf16.msrb.mxu1 %v8412_v20  ;;  %5407 = vmatpush.bf16.msrb.mxu0 %v8402_v29  ;;  %v8448_v20 = vld [vmem:[%s10116_s11 + $0x188] sm:$0xff] }
 0x2f1   : > { %v4377_v35 = vadd.f32 %v4376_v22, %v4364_v34  ;;  %v8428_v22 = vld [vmem:[%s10116_s11 + $0xe8] sm:$0xff]  ;;  %v8418_v34 = vld [vmem:[%s10116_s11 + $0x98] sm:$0xff] }
 0x2f2   : > { %5444 = vmatpush.bf16.msrb.mxu3 %v8428_v22 }
 0x2f6   : > { %v4389_v24 = vpop.f32.mrf.mxu2  ;;  %v4365_v26 = vpop.f32.mrf.mxu0 }
 0x2f7   : > { %v4402_v25 = vpop.f32.mrf.mxu3  ;;  %v4378_v28 = vpop.f32.mrf.mxu1  ;;  %v4390_v36 = vadd.f32 %v4389_v24, %v4377_v35  ;;  %v8411_v24 = vld [vmem:[%s10116_s11 + $0x60] sm:$0xff]  ;;  %v8426_v35 = vld [vmem:[%s10116_s11 + $0xd8] sm:$0xff] }
 0x2f8   : > { %v8427_v26 = vld [vmem:[%s10116_s11 + $0xe0] sm:$0xff]  ;;  %5419 = vmatpush.bf16.msrb.mxu1 %v8411_v24 }
 0x2f9   : > { %v4403_v37 = vadd.f32 %v4402_v25, %v4390_v36  ;;  %v8419_v25 = vld [vmem:[%s10116_s11 + $0xa0] sm:$0xff]  ;;  %5445 = vmatpush.bf16.msrb.mxu3 %v8427_v26 }
 0x2fa   : > { %5432 = vmatpush.bf16.msrb.mxu2 %v8419_v25  ;;  %v8431_v25 = vld [vmem:[%s10116_s11 + $0x100] sm:$0xff] }
 0x2fb   : > { %v8439_v26 = vld [vmem:[%s10116_s11 + $0x140] sm:$0xff] }
 0x2fd   : > { %5446 = vmatpush.bf16.msrb.mxu3 %v8426_v35  ;;  %v4527_v35 = vld [vmem:[%s10114_s9] sm:$0xff] }
 0x2fe   : > { %v4391_v30 = vpop.f32.mrf.mxu2  ;;  %5433 = vmatpush.bf16.msrb.mxu2 %v8418_v34 }
 0x2ff   : > { %v4404_v33 = vpop.f32.mrf.mxu3  ;;  %v8410_v30 = vld [vmem:[%s10116_s11 + $0x58] sm:$0xff] }
 0x300   : > { %5420 = vmatpush.bf16.msrb.mxu1 %v8410_v30 }
 0x30e   : > { %v4415_v38 = vpop.f32.mrf.mxu0 }
 0x30f   : > { %v4428_v39 = vpop.f32.mrf.mxu1  ;;  %v4416_v40 = vadd.f32 %v4415_v38, %v4403_v37  ;;  %v8401_v37 = vld [vmem:[%s10116_s11 + $0x10] sm:$0xff] }
 0x310   : > { %v8409_v38 = vld [vmem:[%s10116_s11 + $0x50] sm:$0xff]  ;;  %5408 = vmatpush.bf16.msrb.mxu0 %v8401_v37 }
 0x311   : > { %v4429_v41 = vadd.f32 %v4428_v39, %v4416_v40  ;;  %v8417_v40 = vld [vmem:[%s10116_s11 + $0x90] sm:$0xff]  ;;  %5421 = vmatpush.bf16.msrb.mxu1 %v8409_v38  ;;  %v4531_v38 = vperm.slane %v4527_v35, 0 }
 0x312   : > { %5434 = vmatpush.bf16.msrb.mxu2 %v8417_v40  ;;  %v4533_v40 = vperm.slane %v4527_v35, 2 }
 0x316   : > { %v4441_v42 = vpop.f32.mrf.mxu2  ;;  %v4417_v45 = vpop.f32.mrf.mxu0 }
 0x317   : > { %v4454_v43 = vpop.f32.mrf.mxu3  ;;  %v4442_v44 = vadd.f32 %v4441_v42, %v4429_v41  ;;  %v4430_v46 = vpop.f32.mrf.mxu1  ;;  %v8425_v41 = vld [vmem:[%s10116_s11 + $0xd0] sm:$0xff] }
 0x318   : > { %5447 = vmatpush.bf16.msrb.mxu3 %v8425_v41  ;;  %v8508_v46 = vld [vmem:[%s10111_s6] ss:$0 sm:$0xff]  ;;  %v4534_v41 = vperm.slane %v4527_v35, 3 }
 0x319   : > { %v4455_v47 = vadd.f32 %v4454_v43, %v4442_v44  ;;  %v8507_v43 = vld [vmem:[%s10110_s5] ss:$0 sm:$0xff] }
 0x31b   : > { %v4459_v49 = vmul.f32 1.442695, %v4455_v47  ;;  %vm4458_vm1 = vcmp.gt.f32.partialorder %v4455_v47, 0.0 }
 0x31d   : > { %8511 = vpow2.f32 %v4459_v49 }
 0x31e   : > { %v4443_v51 = vpop.f32.mrf.mxu2 }
 0x31f   : > { %v4456_v52 = vpop.f32.mrf.mxu3  ;;  %v8400_v51 = vld [vmem:[%s10116_s11 + $0x8] sm:$0xff] }
 0x320   : > { %v8408_v52 = vld [vmem:[%s10116_s11 + $0x48] sm:$0xff]  ;;  %5409 = vmatpush.bf16.msrb.mxu0 %v8400_v51 }
 0x321   : > { %5422 = vmatpush.bf16.msrb.mxu1 %v8408_v52 }
 0x323   : > { %v8512_v53 = vpop.eup %8511 }
 0x324   : > { %v7531_v54 = vadd.f32 -1.0, %v8512_v53  ;;  %v8416_v53 = vld [vmem:[%s10116_s11 + $0x88] sm:$0xff]  ;;  %5410 = vmatpush.bf16.msrb.mxu0 %v8399_v55 }
 0x325   : > { %5435 = vmatpush.bf16.msrb.mxu2 %v8416_v53 }
 0x326   : > { %v4462_v57 = vsel %vm4458_vm1, %v4455_v47, %v7531_v54  ;;  %v8424_v54 = vld [vmem:[%s10116_s11 + $0xc8] sm:$0xff] }
 0x327   : > { %v4468_v31 = vmul.f32 %v7532_v56, %v4462_v57  ;;  %5448 = vmatpush.bf16.msrb.mxu3 %v8424_v54 }
 0x329   : > { %v4469_v58 = vrot.slane %v4468_v31, 4 }
 0x32b   : > { %v4470_v32 = vadd.f32 %v4469_v58, %v4468_v31  ;;  %v8423_v31 = vld [vmem:[%s10116_s11 + $0xc0] sm:$0xff]  ;;  %v8438_v58 = vld [vmem:[%s10116_s11 + $0x138] sm:$0xff] }
 0x32c   : > { %5449 = vmatpush.bf16.msrb.mxu3 %v8423_v31  ;;  %5455 = vmatpush.bf16.msra.mxu0 %v8438_v58 }
 0x32d   : > { %v4471_v59 = vrot.slane %v4470_v32, 2 }
 0x32f   : > { %v4472_v16 = vadd.f32 %v4471_v59, %v4470_v32  ;;  %v8446_v32 = vld [vmem:[%s10116_s11 + $0x178] sm:$0xff] }
 0x330   : > { %v8454_v59 = vld [vmem:[%s10116_s11 + $0x1b8] sm:$0xff] }
 0x331   : > { %v4473_v60 = vrot.slane %v4472_v16, 1 }
 0x333   : > { %v4474_v17 = vadd.f32 %v4473_v60, %v4472_v16  ;;  %v8462_v16 = vld [vmem:[%s10116_s11 + $0x1f8] sm:$0xff]  ;;  %v8437_v60 = vld [vmem:[%s10116_s11 + $0x130] sm:$0xff] }
 0x334   : > { %5494 = vmatpush.bf16.msra.mxu3 %v8462_v16  ;;  %5456 = vmatpush.bf16.msra.mxu0 %v8437_v60 }
 0x335   : > { %v4475_v61 = vmul.f32 0.5, %v4474_v17  ;;  %v8445_v17 = vld [vmem:[%s10116_s11 + $0x170] sm:$0xff] }
 0x337   : > { %v9759_v62 = vsub.f32 %v4462_v57, %v4475_v61  ;;  %v8415_v57 = vld [vmem:[%s10116_s11 + $0x80] sm:$0xff]  ;;  %v8453_v61 = vld [vmem:[%s10116_s11 + $0x1b0] sm:$0xff] }
 0x338   : > { %5436 = vmatpush.bf16.msrb.mxu2 %v8415_v57 }
 0x339   : > { %v4477_v63 = vmul.f32 %v7532_v56, %v9759_v62  ;;  %v8407_v56 = vld [vmem:[%s10116_s11 + $0x40] sm:$0xff] }
 0x33a   : > { %5423 = vmatpush.bf16.msrb.mxu1 %v8407_v56 }
 0x33b   : > { %v4478_v1 = vmul.f32 %v4477_v63, %v4477_v63  ;;  %v8436_v63 = vld [vmem:[%s10116_s11 + $0x128] sm:$0xff] }
 0x33c   : > { %5481 = vmatpush.bf16.msra.mxu2 %v8454_v59  ;;  %5457 = vmatpush.bf16.msra.mxu0 %v8436_v63  ;;  %v4536_v59 = vperm.slane %v4527_v35, 5  ;;  %v8478_v63 = vld [vmem:[%s10116_s11 + $0x278] sm:$0xff] }
 0x33d   : > { %v4479_v2 = vrot.slane %v4478_v1, 4 }
 0x33e   : > { %5468 = vmatpush.bf16.msra.mxu1 %v8446_v32  ;;  %v4535_v32 = vperm.slane %v4527_v35, 4 }
 0x33f   : > { %v4480_v3 = vadd.f32 %v4479_v2, %v4478_v1  ;;  %v8444_v1 = vld [vmem:[%s10116_s11 + $0x168] sm:$0xff] }
 0x340   : > { %5482 = vmatpush.bf16.msra.mxu2 %v8453_v61  ;;  %v8452_v2 = vld [vmem:[%s10116_s11 + $0x1a8] sm:$0xff] }
 0x341   : > { %v4481_v4 = vrot.slane %v4480_v3, 2 }
 0x342   : > { %5469 = vmatpush.bf16.msra.mxu1 %v8445_v17 }
 0x343   : > { %v4482_v0 = vadd.f32 %v4481_v4, %v4480_v3  ;;  %v8460_v3 = vld [vmem:[%s10116_s11 + $0x1e8] sm:$0xff]  ;;  %v8435_v4 = vld [vmem:[%s10116_s11 + $0x120] sm:$0xff] }
 0x344   : > { %5483 = vmatpush.bf16.msra.mxu2 %v8452_v2  ;;  %5458 = vmatpush.bf16.msra.mxu0 %v8435_v4  ;;  %v8494_v2 = vld [vmem:[%s10116_s11 + $0x2f8] sm:$0xff]  ;;  %v4538_v4 = vperm.slane %v4527_v35, 7 }
 0x345   : > { %v4483_v5 = vrot.slane %v4482_v0, 1 }
 0x346   : > { %5470 = vmatpush.bf16.msra.mxu1 %v8444_v1  ;;  %v8486_v1 = vld [vmem:[%s10116_s11 + $0x2b8] sm:$0xff] }
 0x347   : > { %v4484_v6 = vadd.f32 %v4483_v5, %v4482_v0  ;;  %v8443_v0 = vld [vmem:[%s10116_s11 + $0x160] sm:$0xff] }
 0x348   : > { %v8451_v5 = vld [vmem:[%s10116_s11 + $0x1a0] sm:$0xff]  ;;  %5459 = vmatpush.bf16.msra.mxu0 %v8434_v7 }
 0x349   : > { %v4485_v11 = vmul.f32 0.5, %v4484_v6  ;;  %v8459_v6 = vld [vmem:[%s10116_s11 + $0x1e0] sm:$0xff]  ;;  %5484 = vmatpush.bf16.msra.mxu2 %v8451_v5  ;;  %v8477_v5 = vld [vmem:[%s10116_s11 + $0x270] sm:$0xff] }
 0x34a   : > { %5471 = vmatpush.bf16.msra.mxu1 %v8443_v0  ;;  %v8469_v0 = vld [vmem:[%s10116_s11 + $0x230] sm:$0xff] }
 0x34b   : > { %v4486_v18 = vadd.f32 1e-05, %v4485_v11  ;;  %v8433_v11 = vld [vmem:[%s10116_s11 + $0x110] sm:$0xff] }
 0x34c   : > { %5460 = vmatpush.bf16.msra.mxu0 %v8433_v11  ;;  %v8493_v11 = vld [vmem:[%s10116_s11 + $0x2f0] sm:$0xff] }
 0x34d   : > { %8513 = vrsqrt.f32 %v4486_v18  ;;  %vm4493_vm3 = vweird.f32 %v4486_v18  ;;  %5485 = vmatpush.bf16.msra.mxu2 %v8450_v9 }
 0x34e   : > { %5472 = vmatpush.bf16.msra.mxu1 %v8442_v8 }
 0x350   : > { %5461 = vmatpush.bf16.msra.mxu0 %v8432_v15 }
 0x351   : > { %5486 = vmatpush.bf16.msra.mxu2 %v8449_v13 }
 0x352   : > { %5473 = vmatpush.bf16.msra.mxu1 %v8441_v12 }
 0x353   : > { %v8514_v27 = vpop.eup %8513 }
 0x354   : > { %v4488_v28 = vmul.f32 %v8514_v27, %v4486_v18  ;;  %vm4494_vm2 = vweird.f32 %v8514_v27  ;;  %v8440_v18 = vld [vmem:[%s10116_s11 + $0x148] sm:$0xff]  ;;  %5462 = vmatpush.bf16.msra.mxu0 %v8431_v25 }
 0x355   : > { %vm4495_vm4 = vmor %vm4493_vm3, %vm4494_vm2  ;;  %5487 = vmatpush.bf16.msra.mxu2 %v8448_v20 }
 0x356   : > { %v4489_v33 = vmul.f32 %v8514_v27, %v4488_v28  ;;  %5474 = vmatpush.bf16.msra.mxu1 %v8440_v18  ;;  %v8455_v28 = vld [vmem:[%s10116_s11 + $0x1c0] sm:$0xff]  ;;  %v8468_v18 = vld [vmem:[%s10116_s11 + $0x228] sm:$0xff] }
 0x358   : > { %v4490_v36 = vmul.f32 0.5, %v4489_v33 }
 0x35a   : > { %v4491_v39 = vsub.f32 1.5, %v4490_v36  ;;  %5475 = vmatpush.bf16.msra.mxu1 %v8439_v26  ;;  %v9970_v36 = vld [vmem:[%s10115_s10] sm:$0xff] }
 0x35b   : > { %v4575_v7 = vperm.slane %v9970_v36, 4  ;;  %v4576_v9 = vperm.slane %v9970_v36, 5  ;;  %v4577_v13 = vperm.slane %v9970_v36, 6  ;;  %v4578_v15 = vperm.slane %v9970_v36, 7  ;;  %v8467_v26 = vld [vmem:[%s10116_s11 + $0x220] sm:$0xff] }
 0x35c   : > { %v4492_v42 = vmul.f32 %v8514_v27, %v4491_v39  ;;  %v4532_v39 = vperm.slane %v4527_v35, 1 }
 0x35e   : > { %v4496_v44 = vsel %vm4495_vm4, %v8514_v27, %v4492_v42  ;;  %v8447_v27 = vld [vmem:[%s10116_s11 + $0x180] sm:$0xff] }
 0x35f   : > { %v4497_v45 = vmul.f32 %v4496_v44, %v9759_v62  ;;  %v8461_v62 = vld [vmem:[%s10116_s11 + $0x1f0] sm:$0xff]  ;;  %5488 = vmatpush.bf16.msra.mxu2 %v8447_v27  ;;  %v4572_v44 = vperm.slane %v9970_v36, 1  ;;  %v8475_v27 = vld [vmem:[%s10116_s11 + $0x260] sm:$0xff] }
 0x360   : > { %5495 = vmatpush.bf16.msra.mxu3 %v8461_v62  ;;  %v8470_v62 = vld [vmem:[%s10116_s11 + $0x238] sm:$0xff] }
 0x361   : > { %v4502_v47 = vmul.f32 %v8507_v43, %v4497_v45  ;;  %v4571_v43 = vperm.slane %v9970_v36, 0  ;;  %v4573_v45 = vperm.slane %v9970_v36, 2 }
 0x363   : > { %v4507_v49 = vadd.f32 %v8508_v46, %v4502_v47  ;;  %v4574_v46 = vperm.slane %v9970_v36, 3  ;;  %v4528_v36 = vld [vmem:[%s10114_s9 + $0x8] sm:$0xf] }
 0x364   : > { %5496 = vmatpush.bf16.msra.mxu3 %v8460_v3  ;;  %v4537_v3 = vperm.slane %v4527_v35, 6 }
 0x365   : > { %v4512_v50 = vmul.f32 %v8509_v48, %v4507_v49 }
 0x367   : > { %4513 = vadd.xlane.f32.xlu0 %v4512_v50 }
 0x368   : > { %5497 = vmatpush.bf16.msra.mxu3 %v8459_v6 }
 0x36c   : > { %5498 = vmatpush.bf16.msra.mxu3 %v8458_v10  ;;  %v8485_v10 = vld [vmem:[%s10116_s11 + $0x2b0] sm:$0xff] }
 0x370   : > { %5499 = vmatpush.bf16.msra.mxu3 %v8457_v14 }
 0x374   : > { %5500 = vmatpush.bf16.msra.mxu3 %v8456_v21 }
 0x378   : > { %5501 = vmatpush.bf16.msra.mxu3 %v8455_v28 }
 0x3da   : > { %v4514_v22 = vpop.xlane.xlu0 %4513 }
 0x3db   : > { %v4517_v23 = vadd.f32 %v4516_v19, %v4514_v22  ;;  %v8476_v19 = vld [vmem:[%s10116_s11 + $0x268] sm:$0xff] }
 0x3dc   : > { %v8484_v22 = vld [vmem:[%s10116_s11 + $0x2a8] sm:$0xff] }
 0x3dd   : > { %v4518_v24 = vand.u32 2147483647, %v4517_v23  ;;  %vm4524_vm5 = vcmp.ge.f32.partialorder %v4517_v23, 0.0  ;;  %v8492_v23 = vld [vmem:[%s10116_s11 + $0x2e8] sm:$0xff] }
 0x3df   : > { %v4519_v29 = vsub.f32 0.0, %v4518_v24 }
 0x3e1   : > { %v4520_v30 = vmul.f32 1.442695, %v4519_v29 }
 0x3e3   : > { %8515 = vpow2.f32 %v4520_v30  ;;  %v8483_v30 = vld [vmem:[%s10116_s11 + $0x2a0] sm:$0xff] }
 0x3e9   : > { %v8516_v33 = vpop.eup %8515 }
 0x3ea   : > { %v4522_v34 = vadd.f32 1.0, %v8516_v33 }
 0x3ec   : > { %8517 = vrcp.f32 %v4522_v34 }
 0x3f2   : > { %v8518_v37 = vpop.eup %8517 }
 0x3f3   : > { %v4525_v42 = vmul.f32 %v8518_v37, %v8516_v33  ;;  %v8491_v33 = vld [vmem:[%s10116_s11 + $0x2e0] sm:$0xff] }
 0x3f5   : > { %v9976_v47 = vsel %vm4524_vm5, %v8518_v37, %v4525_v42 }
 0x3f6   : > { %v4555_v48 = vmul.f32 %v4531_v38, %v9976_v47  ;;  %v4556_v49 = vmul.f32 %v4532_v39, %v9976_v47  ;;  %v4557_v50 = vmul.f32 %v4533_v40, %v9976_v47  ;;  %v4558_v51 = vmul.f32 %v4534_v41, %v9976_v47  ;;  %v8466_v39 = vld [vmem:[%s10116_s11 + $0x218] sm:$0xff] }
 0x3f7   : > { %v4559_v6 = vmul.f32 %v4535_v32, %v9976_v47  ;;  %v4560_v8 = vmul.f32 %v4536_v59, %v9976_v47  ;;  %v4561_v12 = vmul.f32 %v4537_v3, %v9976_v47  ;;  %v4562_v14 = vmul.f32 %v4538_v4, %v9976_v47  ;;  %v8474_v40 = vld [vmem:[%s10116_s11 + $0x258] sm:$0xff]  ;;  %v8463_v3 = vld [vmem:[%s10116_s11 + $0x200] sm:$0xff] }
 0x3f8   : > { %v4595_v52 = vadd.f32 %v4571_v43, %v4555_v48  ;;  %v4596_v53 = vadd.f32 %v4572_v44, %v4556_v49  ;;  %v4597_v54 = vadd.f32 %v4573_v45, %v4557_v50  ;;  %v4598_v55 = vadd.f32 %v4574_v46, %v4558_v51  ;;  %v8482_v43 = vld [vmem:[%s10116_s11 + $0x298] sm:$0xff]  ;;  %v4568_v48 = vld [vmem:[%s10115_s10 + $0x8] sm:$0xf]  ;;  %v8465_v51 = vld [vmem:[%s10116_s11 + $0x210] sm:$0xff] }
 0x3f9   : > { %v4599_v20 = vadd.f32 %v4575_v7, %v4559_v6  ;;  %v4600_v21 = vadd.f32 %v4576_v9, %v4560_v8  ;;  %v4601_v24 = vadd.f32 %v4577_v13, %v4561_v12  ;;  %v4602_v25 = vadd.f32 %v4578_v15, %v4562_v14  ;;  %v8490_v44 = vld [vmem:[%s10116_s11 + $0x2d8] sm:$0xff]  ;;  %v8471_v4 = vld [vmem:[%s10116_s11 + $0x240] sm:$0xff] }
 0x3fa   : > { %v4607_v56 = vmax.f32 %v4595_v52, 0.0  ;;  %v4608_v57 = vmax.f32 %v4596_v53, 0.0  ;;  %v4609_v31 = vmax.f32 %v4597_v54, 0.0  ;;  %v4610_v58 = vmax.f32 %v4598_v55, 0.0  ;;  %v8473_v52 = vld [vmem:[%s10116_s11 + $0x250] sm:$0xff] }
 0x3fb   : > { %v4611_v28 = vmax.f32 %v4599_v20, 0.0  ;;  %v4612_v29 = vmax.f32 %v4600_v21, 0.0  ;;  %v4613_v34 = vmax.f32 %v4601_v24, 0.0  ;;  %v4614_v35 = vmax.f32 %v4602_v25, 0.0  ;;  %v8481_v53 = vld [vmem:[%s10116_s11 + $0x290] sm:$0xff] }
 0x3fc   : > { %v4619_v16 = vpack.c.bf16 %v4607_v56, %v4607_v56  ;;  %v4620_v60 = vpack.c.bf16 %v4608_v57, %v4608_v57  ;;  %v4621_v17 = vpack.c.bf16 %v4609_v31, %v4609_v31  ;;  %v4622_v61 = vpack.c.bf16 %v4610_v58, %v4610_v58  ;;  %v8489_v54 = vld [vmem:[%s10116_s11 + $0x2d0] sm:$0xff] }
 0x3fd   : > { %v4623_v37 = vpack.c.bf16 %v4611_v28, %v4611_v28  ;;  %v4624_v38 = vpack.c.bf16 %v4612_v29, %v4612_v29  ;;  %v4625_v41 = vpack.c.bf16 %v4613_v34, %v4613_v34  ;;  %v4626_v42 = vpack.c.bf16 %v4614_v35, %v4614_v35 }
 0x3fe   : > { %5411 = vmatmul.bf16.vlgmr.msrb.gmra.mxu0 %v4619_v16  ;;  %5424 = vmatmul.bf16.vlgmr.msrb.gmra.mxu1 %v4620_v60  ;;  %v4539_v45 = vperm.slane %v4528_v36, 0  ;;  %v4540_v46 = vperm.slane %v4528_v36, 1  ;;  %v4541_v49 = vperm.slane %v4528_v36, 2  ;;  %v4542_v50 = vperm.slane %v4528_v36, 3  ;;  %v8464_v60 = vld [vmem:[%s10116_s11 + $0x208] sm:$0xff] }
 0x3ff   : > { %5437 = vmatmul.bf16.vlgmr.msrb.gmra.mxu2 %v4621_v17  ;;  %5450 = vmatmul.bf16.vlgmr.msrb.gmra.mxu3 %v4622_v61  ;;  %v4579_v56 = vperm.slane %v4568_v48, 0  ;;  %v4580_v31 = vperm.slane %v4568_v48, 1  ;;  %v4581_v32 = vperm.slane %v4568_v48, 2  ;;  %v4582_v16 = vperm.slane %v4568_v48, 3  ;;  %v8472_v17 = vld [vmem:[%s10116_s11 + $0x248] sm:$0xff] }
 0x400   : > { %5507 = vmatpush.bf16.msrb.mxu0 %v8470_v62  ;;  %5520 = vmatpush.bf16.msrb.mxu1 %v8478_v63  ;;  %v4563_v55 = vmul.f32 %v4539_v45, %v9976_v47  ;;  %v4564_v57 = vmul.f32 %v4540_v46, %v9976_v47  ;;  %v4565_v58 = vmul.f32 %v4541_v49, %v9976_v47  ;;  %v8480_v61 = vld [vmem:[%s10116_s11 + $0x288] sm:$0xff] }
 0x401   : > { %5533 = vmatpush.bf16.msrb.mxu2 %v8486_v1  ;;  %5546 = vmatpush.bf16.msrb.mxu3 %v8494_v2  ;;  %v4566_v59 = vmul.f32 %v4542_v50, %v9976_v47  ;;  %v8488_v47 = vld [vmem:[%s10116_s11 + $0x2c8] sm:$0xff] }
 0x402   : > { %v4603_v62 = vadd.f32 %v4579_v56, %v4563_v55  ;;  %v4604_v63 = vadd.f32 %v4580_v31, %v4564_v57  ;;  %v4605_v1 = vadd.f32 %v4581_v32, %v4565_v58 }
 0x403   : > { %v4606_v2 = vadd.f32 %v4582_v16, %v4566_v59 }
 0x404   : > { %5508 = vmatpush.bf16.msrb.mxu0 %v8469_v0  ;;  %5521 = vmatpush.bf16.msrb.mxu1 %v8477_v5  ;;  %v8479_v0 = vld [vmem:[%s10116_s11 + $0x280] sm:$0xff]  ;;  %v4615_v6 = vmax.f32 %v4603_v62, 0.0  ;;  %v4616_v7 = vmax.f32 %v4604_v63, 0.0  ;;  %v4617_v8 = vmax.f32 %v4605_v1, 0.0 }
 0x405   : > { %5534 = vmatpush.bf16.msrb.mxu2 %v8485_v10  ;;  %5547 = vmatpush.bf16.msrb.mxu3 %v8493_v11  ;;  %v8487_v5 = vld [vmem:[%s10116_s11 + $0x2c0] sm:$0xff]  ;;  %v4618_v9 = vmax.f32 %v4606_v2, 0.0 }
 0x406   : > { %v4627_v10 = vpack.c.bf16 %v4615_v6, %v4615_v6  ;;  %v4628_v11 = vpack.c.bf16 %v4616_v7, %v4616_v7  ;;  %v4629_v12 = vpack.c.bf16 %v4617_v8, %v4617_v8 }
 0x407   : > { %v4630_v13 = vpack.c.bf16 %v4618_v9, %v4618_v9 }
 0x408   : > { %5509 = vmatpush.bf16.msrb.mxu0 %v8468_v18  ;;  %5522 = vmatpush.bf16.msrb.mxu1 %v8476_v19  ;;  %v8510_v18 = vld [vmem:[%s10117_s12] ss:$0 sm:$0xff] }
 0x409   : > { %5535 = vmatpush.bf16.msrb.mxu2 %v8484_v22  ;;  %5548 = vmatpush.bf16.msrb.mxu3 %v8492_v23 }
 0x40c   : > { %5510 = vmatpush.bf16.msrb.mxu0 %v8467_v26  ;;  %5523 = vmatpush.bf16.msrb.mxu1 %v8475_v27 }
 0x40d   : > { %5536 = vmatpush.bf16.msrb.mxu2 %v8483_v30  ;;  %5549 = vmatpush.bf16.msrb.mxu3 %v8491_v33 }
 0x40e   : > { %5463 = vmatmul.bf16.vlgmr.msra.gmra.mxu0 %v4623_v37  ;;  %5476 = vmatmul.bf16.vlgmr.msra.gmra.mxu1 %v4624_v38 }
 0x40f   : > { %5489 = vmatmul.bf16.vlgmr.msra.gmra.mxu2 %v4625_v41  ;;  %5502 = vmatmul.bf16.vlgmr.msra.gmra.mxu3 %v4626_v42 }
 0x410   : > { %5511 = vmatpush.bf16.msrb.mxu0 %v8466_v39  ;;  %5524 = vmatpush.bf16.msrb.mxu1 %v8474_v40 }
 0x411   : > { %5537 = vmatpush.bf16.msrb.mxu2 %v8482_v43  ;;  %5550 = vmatpush.bf16.msrb.mxu3 %v8490_v44 }
 0x414   : > { %5512 = vmatpush.bf16.msrb.mxu0 %v8465_v51  ;;  %5525 = vmatpush.bf16.msrb.mxu1 %v8473_v52 }
 0x415   : > { %5538 = vmatpush.bf16.msrb.mxu2 %v8481_v53  ;;  %5551 = vmatpush.bf16.msrb.mxu3 %v8489_v54 }
 0x418   : > { %5513 = vmatpush.bf16.msrb.mxu0 %v8464_v60  ;;  %5526 = vmatpush.bf16.msrb.mxu1 %v8472_v17 }
 0x419   : > { %5539 = vmatpush.bf16.msrb.mxu2 %v8480_v61  ;;  %5552 = vmatpush.bf16.msrb.mxu3 %v8488_v47 }
 0x41c   : > { %5514 = vmatpush.bf16.msrb.mxu0 %v8463_v3  ;;  %5527 = vmatpush.bf16.msrb.mxu1 %v8471_v4 }
 0x41d   : > { %5540 = vmatpush.bf16.msrb.mxu2 %v8479_v0  ;;  %5553 = vmatpush.bf16.msrb.mxu3 %v8487_v5 }
 0x41f   : > { %5515 = vmatmul.bf16.vlgmr.msrb.gmra.mxu0 %v4627_v10  ;;  %5528 = vmatmul.bf16.vlgmr.msrb.gmra.mxu1 %v4628_v11 }
 0x420   : > { %5541 = vmatmul.bf16.vlgmr.msrb.gmra.mxu2 %v4629_v12  ;;  %5554 = vmatmul.bf16.vlgmr.msrb.gmra.mxu3 %v4630_v13 }
 0x47b   : > { %v5412_v14 = vpop.f32.mrf.mxu0  ;;  %v5425_v15 = vpop.f32.mrf.mxu1 }
 0x47c   : > { %v5413_v23 = vadd.f32 %v8510_v18, %v5412_v14 }
 0x47e   : > { %v5426_v24 = vadd.f32 %v5425_v15, %v5413_v23 }
 0x482   : > { %v5438_v19 = vpop.f32.mrf.mxu2  ;;  %v5451_v20 = vpop.f32.mrf.mxu3 }
 0x483   : > { %v5414_v21 = vpop.f32.mrf.mxu0  ;;  %v5427_v22 = vpop.f32.mrf.mxu1  ;;  %v5439_v29 = vadd.f32 %v5438_v19, %v5426_v24 }
 0x485   : > { %v5452_v30 = vadd.f32 %v5451_v20, %v5439_v29 }
 0x48a   : > { %v5440_v25 = vpop.f32.mrf.mxu2  ;;  %v5453_v26 = vpop.f32.mrf.mxu3 }
 0x48b   : > { %v5464_v27 = vpop.f32.mrf.mxu0  ;;  %v5477_v28 = vpop.f32.mrf.mxu1 }
 0x48c   : > { %v5465_v33 = vadd.f32 %v5464_v27, %v5452_v30 }
 0x48e   : > { %v5478_v38 = vadd.f32 %v5477_v28, %v5465_v33 }
 0x492   : > { %v5490_v34 = vpop.f32.mrf.mxu2  ;;  %v5503_v35 = vpop.f32.mrf.mxu3 }
 0x493   : > { %v5466_v36 = vpop.f32.mrf.mxu0  ;;  %v5479_v37 = vpop.f32.mrf.mxu1  ;;  %v5491_v39 = vadd.f32 %v5490_v34, %v5478_v38 }
 0x495   : > { %v5504_v42 = vadd.f32 %v5503_v35, %v5491_v39 }
 0x49a   : > { %v5492_v40 = vpop.f32.mrf.mxu2  ;;  %v5505_v41 = vpop.f32.mrf.mxu3 }
 0x49c   : > { %v5516_v43 = vpop.f32.mrf.mxu0  ;;  %v5529_v44 = vpop.f32.mrf.mxu1 }
 0x49d   : > { %v5517_v45 = vadd.f32 %v5516_v43, %v5504_v42 }
 0x49f   : > { %v5530_v46 = vadd.f32 %v5529_v44, %v5517_v45 }
 0x4a3   : > { %v5542_v48 = vpop.f32.mrf.mxu2  ;;  %v5555_v49 = vpop.f32.mrf.mxu3 }
 0x4a4   : > { %v5543_v50 = vadd.f32 %v5542_v48, %v5530_v46  ;;  %v5518_v51 = vpop.f32.mrf.mxu0  ;;  %v5531_v52 = vpop.f32.mrf.mxu1 }
 0x4a6   : > { %v5556_v53 = vadd.f32 %v5555_v49, %v5543_v50 }
 0x4a8   : > { %v5559_v54 = vmax.f32 %v5556_v53, 0.0 }
 0x4aa   : > { %5560 = vst [vmem:[%s10118_s13] sm:$0xff] %v5559_v54 }
 0x4ab   : > { %v5544_v55 = vpop.f32.mrf.mxu2  ;;  %v5557_v56 = vpop.f32.mrf.mxu3 }
 0x4ac PF: > { %s24_s27 = sadd.s32 1, %s8525_s27  }
 0x4ad   : > { %p21_p7 = scmp.ge.s32.totalorder %s24_s27, 4  }
 0x4af   :  { %23 = sbr.rel (!%p21_p7) target bundleno = 2 (0x2), region = 109 }

</bundles_post_ra>
